<compile_context>
chip_gen: v5e
topology: v5e:2x2
jax: 0.10.0
libtpu: 0.0.40
codegen_flags: <defaults>
</compile_context>

<pallas_src>
import math

import jax
import jax.numpy as jnp
from jax import lax
from jax.experimental import pallas as pl
from jax.experimental.pallas import tpu as pltpu

# ---------------------------------------------------------------- model dims
PHONEMES = ['AA', 'AE', 'AH', 'AO', 'AW', 'AY', 'B', 'CH', 'D', 'DH', 'EH',
            'ER', 'EY', 'F', 'G', 'HH', 'IH', 'IY', 'JH', 'K', 'L', 'M', 'N',
            'NG', 'OW', 'OY', 'P', 'R', 'S', 'SH', 'T', 'TH', 'UH', 'UW', 'V',
            'W', 'Y', 'Z', 'ZH', 'spn']
TOKENS = ['<PAD>', '<EOS>', '<CTC_token>', '<UNK>', ' '] + PHONEMES
NUM_PHONEMES = len(TOKENS)              # 45: phoneme-head classes = decoder vocab
BLANK_ID = TOKENS.index('<CTC_token>')  # 2

B = 2          # batch
S_N = 16       # neuro sequence length (patch_size = 1 -> num_patches = S_N)
D_IN = 32      # neuro feature dim     (reference: 256)
H = 64         # hidden / embed dim    (reference: 768)
NH = 4         # attention heads
HD = H // NH
FF = 4 * H
ENC_LAYERS = 2  # reference: 7
DEC_LAYERS = 2  # reference: 12
S_T = 8        # text sequence length
VOCAB = NUM_PHONEMES
MAX_POS = 64
PATCH_SIZE = 1
CLS_PAD = 128   # class dim padded 45 -> 128 for lane-dense stores


# ---------------------------------------------------------------- in-kernel helpers
def _layernorm(x, g, b, eps):
    # x: (rows, H) f32 ; g, b: (1, H)
    mean = jnp.mean(x, axis=-1, keepdims=True)
    var = jnp.mean(jnp.square(x - mean), axis=-1, keepdims=True)
    return (x - mean) * lax.rsqrt(var + eps) * g + b


def _gelu_erf(y):          # BERT gelu
    return 0.5 * y * (1.0 + lax.erf(y * (1.0 / math.sqrt(2.0))))


def _gelu_tanh(y):         # GPT2 gelu_new
    c = math.sqrt(2.0 / math.pi)
    return 0.5 * y * (1.0 + jnp.tanh(c * (y + 0.044715 * y * y * y)))


def _log_softmax(logits):
    m = jnp.max(logits, axis=-1, keepdims=True)
    s = logits - m
    lse = jnp.log(jnp.sum(jnp.exp(s), axis=-1, keepdims=True))
    return s - lse


def _mha(qkv, add_mask, scale):
    # qkv: (S, 3H) f32 laid out as [q | k | v]; heads statically unrolled.
    parts = []
    for h in range(NH):
        q = qkv[:, h * HD:(h + 1) * HD]
        k = qkv[:, H + h * HD:H + (h + 1) * HD]
        v = qkv[:, 2 * H + h * HD:2 * H + (h + 1) * HD]
        s = jnp.dot(q, k.T, preferred_element_type=jnp.float32) * scale
        if add_mask is not None:
            s = s + add_mask
        s = s - jnp.max(s, axis=-1, keepdims=True)
        p = jnp.exp(s)
        p = p * pl.reciprocal(jnp.sum(p, axis=-1, keepdims=True), approx=True)
        parts.append(jnp.dot(p, v, preferred_element_type=jnp.float32))
    return jnp.concatenate(parts, axis=-1)   # (S, H)


# ---------------------------------------------------------------- fused kernel
def _seq2seq_kernel(
        # ---- encoder inputs
        neuro_ref, lin_w, lin_b, pe, emb_g, emb_b,
        e_qkv_w, e_qkv_b, e_o_w, e_o_b, e_ln1_g, e_ln1_b,
        e_i_w, e_i_b, e_fo_w, e_fo_b, e_ln2_g, e_ln2_b,
        ph_w, ph_b,
        # ---- decoder inputs
        hdec_ref, mask_ref,
        d_at_w, d_at_b, d_pr_w, d_pr_b, d_ln1_g, d_ln1_b,
        d_fc_w, d_fc_b, d_fp_w, d_fp_b, d_ln2_g, d_ln2_b,
        lnf_g, lnf_b, lm_w, lm_b,
        # ---- outputs
        ph_logp_ref, lm_logits_ref, lm_logp_ref):
    scale = 1.0 / math.sqrt(HD)

    # ======================= BERT encoder =======================
    x = neuro_ref[0]                                         # (S_N, D_IN)
    h = (jnp.dot(x, lin_w[...], preferred_element_type=jnp.float32)
         + lin_b[...] + pe[...])
    h = _layernorm(h, emb_g[...], emb_b[...], 1e-12)
    for l in range(ENC_LAYERS):                              # statically unrolled
        qkv = (jnp.dot(h, e_qkv_w[l], preferred_element_type=jnp.float32)
               + e_qkv_b[l])
        ctx = _mha(qkv, None, scale)                         # encoder unmasked
        attn = (jnp.dot(ctx, e_o_w[l], preferred_element_type=jnp.float32)
                + e_o_b[l])
        h1 = _layernorm(attn + h, e_ln1_g[l], e_ln1_b[l], 1e-12)
        inter = _gelu_erf(jnp.dot(h1, e_i_w[l], preferred_element_type=jnp.float32)
                          + e_i_b[l])
        ffo = (jnp.dot(inter, e_fo_w[l], preferred_element_type=jnp.float32)
               + e_fo_b[l])
        h = _layernorm(ffo + h1, e_ln2_g[l], e_ln2_b[l], 1e-12)
    ph_logits = (jnp.dot(h, ph_w[...], preferred_element_type=jnp.float32)
                 + ph_b[...])                                # (S_N, 128) padded
    ph_logp_ref[0] = _log_softmax(ph_logits).astype(ph_logp_ref.dtype)

    # ======================= GPT2 decoder =======================
    y = hdec_ref[0]                                          # (S_T, H)
    t = y.shape[0]
    key_ok = mask_ref[0] > 0.0                               # (1, T)
    row = lax.broadcasted_iota(jnp.int32, (t, t), 0)
    col = lax.broadcasted_iota(jnp.int32, (t, t), 1)
    allowed = (col <= row) & key_ok                          # causal & key-padding
    add_mask = jnp.where(allowed, 0.0, -1e9).astype(jnp.float32)

    for l in range(DEC_LAYERS):                              # statically unrolled
        h1 = _layernorm(y, d_ln1_g[l], d_ln1_b[l], 1e-5)
        qkv = (jnp.dot(h1, d_at_w[l], preferred_element_type=jnp.float32)
               + d_at_b[l])
        ctx = _mha(qkv, add_mask, scale)
        attn = (jnp.dot(ctx, d_pr_w[l], preferred_element_type=jnp.float32)
                + d_pr_b[l])
        y1 = y + attn
        h2 = _layernorm(y1, d_ln2_g[l], d_ln2_b[l], 1e-5)
        ff = _gelu_tanh(jnp.dot(h2, d_fc_w[l], preferred_element_type=jnp.float32)
                        + d_fc_b[l])
        ff = (jnp.dot(ff, d_fp_w[l], preferred_element_type=jnp.float32)
              + d_fp_b[l])
        y = y1 + ff

    hf = _layernorm(y, lnf_g[...], lnf_b[...], 1e-5)
    lm_logits = (jnp.dot(hf, lm_w[...], preferred_element_type=jnp.float32)
                 + lm_b[...])                                # (S_T, 128) padded
    lm_logits_ref[0] = lm_logits.astype(lm_logits_ref.dtype)
    lm_logp_ref[0] = _log_softmax(lm_logits).astype(lm_logp_ref.dtype)


# ---------------------------------------------------------------- BlockSpec helpers
def _const_spec(a):
    z = (0,) * a.ndim
    return pl.BlockSpec(a.shape, lambda i, z=z: z)     # weight stays VMEM-resident


def _batch_spec(shape):
    rest = tuple(shape[1:])
    z = (0,) * len(rest)
    return pl.BlockSpec((1,) + rest, lambda i, z=z: (i,) + z)


_PAR = pltpu.CompilerParams(dimension_semantics=("parallel",))


# ---------------------------------------------------------------- Pallas wrapper
def seq2seq_fused(enc, dec, neuro, pe, h0_dec, mask_b1t):
    b, s, _ = neuro.shape
    t = h0_dec.shape[1]
    enc_w = (enc['lin_w'], enc['lin_b'], pe, enc['emb_ln_g'], enc['emb_ln_b'],
             enc['qkv_w'], enc['qkv_b'], enc['o_w'], enc['o_b'],
             enc['ln1_g'], enc['ln1_b'], enc['i_w'], enc['i_b'],
             enc['fo_w'], enc['fo_b'], enc['ln2_g'], enc['ln2_b'],
             enc['ph_w_pad'], enc['ph_b_pad'])
    dec_w = (dec['attn_w'], dec['attn_b'], dec['proj_w'], dec['proj_b'],
             dec['ln1_g'], dec['ln1_b'], dec['fc_w'], dec['fc_b'],
             dec['fproj_w'], dec['fproj_b'], dec['ln2_g'], dec['ln2_b'],
             dec['lnf_g'], dec['lnf_b'], dec['lm_w_pad'], dec['lm_b_pad'])
    args = (neuro,) + enc_w + (h0_dec, mask_b1t) + dec_w
    in_specs = ([_batch_spec(neuro.shape)]
                + [_const_spec(a) for a in enc_w]
                + [_batch_spec(h0_dec.shape), _batch_spec(mask_b1t.shape)]
                + [_const_spec(a) for a in dec_w])
    out_shape = (jax.ShapeDtypeStruct((b, s, CLS_PAD), jnp.float32),
                 jax.ShapeDtypeStruct((b, t, CLS_PAD), jnp.float32),
                 jax.ShapeDtypeStruct((b, t, CLS_PAD), jnp.float32))
    out_specs = (_batch_spec((b, s, CLS_PAD)),
                 _batch_spec((b, t, CLS_PAD)),
                 _batch_spec((b, t, CLS_PAD)))
    return pl.pallas_call(
        _seq2seq_kernel,
        out_shape=out_shape,
        grid=(b,),
        in_specs=in_specs,
        out_specs=out_specs,
        compiler_params=_PAR,
    )(*args)


# ---------------------------------------------------------------- masks + CTC (glue)
def adjust_mask(neuro_mask, patch_size=PATCH_SIZE):
    b, s = neuro_mask.shape
    num_patches = s // patch_size
    return neuro_mask.reshape(b, num_patches, patch_size).sum(axis=2) > 0


def ctc_loss_fn(log_probs, targets, input_lengths, target_lengths, blank):
    # log_probs: (T, N, C); targets: (N, L). reduction='mean', zero_infinity=True.
    # TODO(synk): CTC alpha recursion is a sequential DP; kept in plain JAX (lax.scan).
    T, N, C = log_probs.shape
    L = targets.shape[1]
    S = 2 * L + 1
    NEG = jnp.float32(-1e30)
    ext = jnp.full((N, S), blank, jnp.int32).at[:, 1::2].set(targets.astype(jnp.int32))
    ext_prev2 = jnp.concatenate([jnp.full((N, 2), -1, jnp.int32), ext[:, :-2]], axis=1)
    allow_skip = (ext != blank) & (ext != ext_prev2)

    emit0 = jnp.take_along_axis(log_probs[0], ext, axis=1)
    alpha0 = jnp.full((N, S), NEG)
    alpha0 = alpha0.at[:, 0].set(emit0[:, 0])
    alpha0 = alpha0.at[:, 1].set(jnp.where(target_lengths > 0, emit0[:, 1], NEG))

    def step(alpha, xs):
        lp_t, t = xs
        emit = jnp.take_along_axis(lp_t, ext, axis=1)
        a1 = jnp.concatenate([jnp.full((N, 1), NEG), alpha[:, :-1]], axis=1)
        a2 = jnp.concatenate([jnp.full((N, 2), NEG), alpha[:, :-2]], axis=1)
        a2 = jnp.where(allow_skip, a2, NEG)
        m = jnp.maximum(jnp.maximum(alpha, a1), a2)
        lse = m + jnp.log(jnp.exp(alpha - m) + jnp.exp(a1 - m) + jnp.exp(a2 - m))
        new = lse + emit
        new = jnp.where((t < input_lengths)[:, None], new, alpha)
        return new, None

    alpha, _ = lax.scan(step, alpha0, (log_probs[1:], jnp.arange(1, T)))
    idx_last = (2 * target_lengths).astype(jnp.int32)
    idx_prev = jnp.maximum(2 * target_lengths - 1, 0).astype(jnp.int32)
    a_last = jnp.take_along_axis(alpha, idx_last[:, None], axis=1)[:, 0]
    a_prev = jnp.take_along_axis(alpha, idx_prev[:, None], axis=1)[:, 0]
    a_prev = jnp.where(target_lengths > 0, a_prev, NEG)
    loss = -jnp.logaddexp(a_last, a_prev)
    loss = jnp.where(jnp.isinf(loss) | (loss > 1e29), 0.0, loss)   # zero_infinity
    loss = loss / jnp.maximum(target_lengths.astype(jnp.float32), 1.0)
    return jnp.mean(loss)


# ---------------------------------------------------------------- full forward
def seq2seq_forward(params, neuro, neuro_mask, text_ids_x, text_ids, text_mask,
                    transcription_lens):
    enc, dec = params['encoder'], params['decoder']
    b, s, _ = neuro.shape
    t = text_ids_x.shape[1]

    # tiny XLA-side prep: position/type embeds, decoder token+pos embed gather
    pe = enc['pos_emb'][:s] + enc['type_emb'][0:1]               # (S_N, H)
    h0_dec = dec['wte'][text_ids_x] + dec['wpe'][:t][None]       # (B, S_T, H)
    mask_b1t = text_mask.astype(jnp.float32).reshape(b, 1, t)

    enc_attn_mask = adjust_mask(neuro_mask)
    # TODO(synk): default GPT2Config has add_cross_attention=False, so the HF decoder
    # ignores encoder_hidden_states / encoder_attention_mask; we match that behavior.
    del enc_attn_mask

    ph_logp_pad, lm_logits_pad, lm_logp_pad = seq2seq_fused(
        enc, dec, neuro, pe, h0_dec, mask_b1t)

    lm_logits = lm_logits_pad[:, :, :VOCAB]
    # causal-LM loss: shift logits/labels, mean cross-entropy (labels = text_ids)
    shift_logp = lm_logp_pad[:, :-1, :].reshape(b * (t - 1), CLS_PAD)
    shift_labels = text_ids[:, 1:].reshape(b * (t - 1))
    nll = -jnp.take_along_axis(shift_logp, shift_labels[:, None], axis=1)[:, 0]
    lm_loss = jnp.mean(nll)

    log_probs_tnc = jnp.transpose(ph_logp_pad, (1, 0, 2))        # permute(1, 0, 2)
    input_lengths = jnp.full((b,), s, jnp.int32)
    ctc = ctc_loss_fn(log_probs_tnc, text_ids_x, input_lengths, transcription_lens,
                      blank=BLANK_ID)
    decoder_outputs = {'loss': lm_loss, 'logits': lm_logits}
    return decoder_outputs, ctc


# ---------------------------------------------------------------- params init
def init_params(key):
    keys = iter(jax.random.split(key, 128))
    std = 0.02

    def dense(d_in, d_out):
        w = jax.random.normal(next(keys), (d_in, d_out), jnp.float32) * std
        b = jnp.zeros((1, d_out), jnp.float32)
        return w, b

    def ones(n): return jnp.ones((1, n), jnp.float32)
    def zeros(n): return jnp.zeros((1, n), jnp.float32)

    def stack(lst):
        return jnp.stack(lst, axis=0)

    enc = {}
    enc['lin_w'], enc['lin_b'] = dense(D_IN * PATCH_SIZE, H)
    enc['pos_emb'] = jax.random.normal(next(keys), (MAX_POS, H), jnp.float32) * std
    enc['type_emb'] = jax.random.normal(next(keys), (2, H), jnp.float32) * std
    enc['emb_ln_g'], enc['emb_ln_b'] = ones(H), zeros(H)
    layers = []
    for _ in range(ENC_LAYERS):
        p = {}
        p['qkv_w'], p['qkv_b'] = dense(H, 3 * H)     # fused q|k|v projection
        p['o_w'], p['o_b'] = dense(H, H)
        p['ln1_g'], p['ln1_b'] = ones(H), zeros(H)
        p['i_w'], p['i_b'] = dense(H, FF)
        p['fo_w'], p['fo_b'] = dense(FF, H)
        p['ln2_g'], p['ln2_b'] = ones(H), zeros(H)
        layers.append(p)
    for k in layers[0]:
        enc[k] = stack([lp[k] for lp in layers])     # (L, ...) stacked weights
    # phoneme head, class dim padded 45 -> 128; padded classes biased to -1e9
    ph_w = jax.random.normal(next(keys), (H, NUM_PHONEMES), jnp.float32) * std
    enc['ph_w_pad'] = jnp.pad(ph_w, ((0, 0), (0, CLS_PAD - NUM_PHONEMES)))
    enc['ph_b_pad'] = jnp.concatenate(
        [jnp.zeros((1, NUM_PHONEMES), jnp.float32),
         jnp.full((1, CLS_PAD - NUM_PHONEMES), -1e9, jnp.float32)], axis=1)

    dec = {}
    dec['wte'] = jax.random.normal(next(keys), (VOCAB, H), jnp.float32) * std
    dec['wpe'] = jax.random.normal(next(keys), (MAX_POS, H), jnp.float32) * 0.01
    layers = []
    for _ in range(DEC_LAYERS):
        p = {}
        p['ln1_g'], p['ln1_b'] = ones(H), zeros(H)
        p['attn_w'], p['attn_b'] = dense(H, 3 * H)
        p['proj_w'], p['proj_b'] = dense(H, H)
        p['ln2_g'], p['ln2_b'] = ones(H), zeros(H)
        p['fc_w'], p['fc_b'] = dense(H, FF)
        p['fproj_w'], p['fproj_b'] = dense(FF, H)
        layers.append(p)
    for k in layers[0]:
        dec[k] = stack([lp[k] for lp in layers])     # (L, ...) stacked weights
    dec['lnf_g'], dec['lnf_b'] = ones(H), zeros(H)
    # tied LM head: wte^T, pre-padded/transposed once; no real bias, pad = -1e9
    dec['lm_w_pad'] = jnp.pad(dec['wte'], ((0, CLS_PAD - VOCAB), (0, 0))).T
    dec['lm_b_pad'] = jnp.concatenate(
        [jnp.zeros((1, VOCAB), jnp.float32),
         jnp.full((1, CLS_PAD - VOCAB), -1e9, jnp.float32)], axis=1)
    return {'encoder': enc, 'decoder': dec}


# ---------------------------------------------------------------- main
if __name__ == "__main__":
    root = jax.random.PRNGKey(0)
    pkey, k1, k2, k3 = jax.random.split(root, 4)
    params = init_params(pkey)

    neuro = jax.random.normal(k1, (B, S_N, D_IN), jnp.float32)
    neuro_mask = jnp.ones((B, S_N), jnp.float32)
    text_ids_x = jax.random.randint(k2, (B, S_T), 5, VOCAB, dtype=jnp.int32)
    text_ids = jax.random.randint(k3, (B, S_T), 5, VOCAB, dtype=jnp.int32)
    text_mask = jnp.ones((B, S_T), jnp.float32)
    transcription_lens = jnp.array([6, 4], jnp.int32)

    fwd = jax.jit(seq2seq_forward)
    decoder_outputs, ctc_loss = fwd(params, neuro, neuro_mask, text_ids_x,
                                    text_ids, text_mask, transcription_lens)
    jax.block_until_ready((decoder_outputs, ctc_loss))
    assert decoder_outputs['logits'].shape == (B, S_T, VOCAB)
    assert decoder_outputs['loss'].shape == ()
    assert ctc_loss.shape == ()
    assert bool(jnp.isfinite(decoder_outputs['loss']))
    assert bool(jnp.isfinite(ctc_loss))
    print("KERNEL_OK")
</pallas_src>

<mosaic_0001>
module attributes {stable_mosaic.version = 11 : i64} {
  func.func @_seq2seq_kernel(%arg0: i32, %arg1: memref<1x16x32xf32, #tpu.memory_space<vmem>>, %arg2: memref<32x64xf32, #tpu.memory_space<vmem>>, %arg3: memref<1x64xf32, #tpu.memory_space<vmem>>, %arg4: memref<16x64xf32, #tpu.memory_space<vmem>>, %arg5: memref<1x64xf32, #tpu.memory_space<vmem>>, %arg6: memref<1x64xf32, #tpu.memory_space<vmem>>, %arg7: memref<2x64x192xf32, #tpu.memory_space<vmem>>, %arg8: memref<2x1x192xf32, #tpu.memory_space<vmem>>, %arg9: memref<2x64x64xf32, #tpu.memory_space<vmem>>, %arg10: memref<2x1x64xf32, #tpu.memory_space<vmem>>, %arg11: memref<2x1x64xf32, #tpu.memory_space<vmem>>, %arg12: memref<2x1x64xf32, #tpu.memory_space<vmem>>, %arg13: memref<2x64x256xf32, #tpu.memory_space<vmem>>, %arg14: memref<2x1x256xf32, #tpu.memory_space<vmem>>, %arg15: memref<2x256x64xf32, #tpu.memory_space<vmem>>, %arg16: memref<2x1x64xf32, #tpu.memory_space<vmem>>, %arg17: memref<2x1x64xf32, #tpu.memory_space<vmem>>, %arg18: memref<2x1x64xf32, #tpu.memory_space<vmem>>, %arg19: memref<64x128xf32, #tpu.memory_space<vmem>>, %arg20: memref<1x128xf32, #tpu.memory_space<vmem>>, %arg21: memref<1x8x64xf32, #tpu.memory_space<vmem>>, %arg22: memref<1x1x8xf32, #tpu.memory_space<vmem>>, %arg23: memref<2x64x192xf32, #tpu.memory_space<vmem>>, %arg24: memref<2x1x192xf32, #tpu.memory_space<vmem>>, %arg25: memref<2x64x64xf32, #tpu.memory_space<vmem>>, %arg26: memref<2x1x64xf32, #tpu.memory_space<vmem>>, %arg27: memref<2x1x64xf32, #tpu.memory_space<vmem>>, %arg28: memref<2x1x64xf32, #tpu.memory_space<vmem>>, %arg29: memref<2x64x256xf32, #tpu.memory_space<vmem>>, %arg30: memref<2x1x256xf32, #tpu.memory_space<vmem>>, %arg31: memref<2x256x64xf32, #tpu.memory_space<vmem>>, %arg32: memref<2x1x64xf32, #tpu.memory_space<vmem>>, %arg33: memref<2x1x64xf32, #tpu.memory_space<vmem>>, %arg34: memref<2x1x64xf32, #tpu.memory_space<vmem>>, %arg35: memref<1x64xf32, #tpu.memory_space<vmem>>, %arg36: memref<1x64xf32, #tpu.memory_space<vmem>>, %arg37: memref<64x128xf32, #tpu.memory_space<vmem>>, %arg38: memref<1x128xf32, #tpu.memory_space<vmem>>, %arg39: memref<1x16x128xf32, #tpu.memory_space<vmem>>, %arg40: memref<1x8x128xf32, #tpu.memory_space<vmem>>, %arg41: memref<1x8x128xf32, #tpu.memory_space<vmem>>) attributes {dimension_semantics = [#tpu.dimension_semantics<parallel>], iteration_bounds = array<i64: 2>, scalar_prefetch = 0 : i64, scratch_operands = 0 : i64, tpu.core_type = #tpu.core_type<tc>, window_params = [{transform_indices = @transform_0, window_bounds = array<i64: 1, 16, 32>}, {pipeline_mode = #tpu.pipeline_mode<synchronous>, transform_indices = @transform_1, window_bounds = array<i64: 32, 64>}, {pipeline_mode = #tpu.pipeline_mode<synchronous>, transform_indices = @transform_2, window_bounds = array<i64: 1, 64>}, {pipeline_mode = #tpu.pipeline_mode<synchronous>, transform_indices = @transform_3, window_bounds = array<i64: 16, 64>}, {pipeline_mode = #tpu.pipeline_mode<synchronous>, transform_indices = @transform_4, window_bounds = array<i64: 1, 64>}, {pipeline_mode = #tpu.pipeline_mode<synchronous>, transform_indices = @transform_5, window_bounds = array<i64: 1, 64>}, {pipeline_mode = #tpu.pipeline_mode<synchronous>, transform_indices = @transform_6, window_bounds = array<i64: 2, 64, 192>}, {pipeline_mode = #tpu.pipeline_mode<synchronous>, transform_indices = @transform_7, window_bounds = array<i64: 2, 1, 192>}, {pipeline_mode = #tpu.pipeline_mode<synchronous>, transform_indices = @transform_8, window_bounds = array<i64: 2, 64, 64>}, {pipeline_mode = #tpu.pipeline_mode<synchronous>, transform_indices = @transform_9, window_bounds = array<i64: 2, 1, 64>}, {pipeline_mode = #tpu.pipeline_mode<synchronous>, transform_indices = @transform_10, window_bounds = array<i64: 2, 1, 64>}, {pipeline_mode = #tpu.pipeline_mode<synchronous>, transform_indices = @transform_11, window_bounds = array<i64: 2, 1, 64>}, {pipeline_mode = #tpu.pipeline_mode<synchronous>, transform_indices = @transform_12, window_bounds = array<i64: 2, 64, 256>}, {pipeline_mode = #tpu.pipeline_mode<synchronous>, transform_indices = @transform_13, window_bounds = array<i64: 2, 1, 256>}, {pipeline_mode = #tpu.pipeline_mode<synchronous>, transform_indices = @transform_14, window_bounds = array<i64: 2, 256, 64>}, {pipeline_mode = #tpu.pipeline_mode<synchronous>, transform_indices = @transform_15, window_bounds = array<i64: 2, 1, 64>}, {pipeline_mode = #tpu.pipeline_mode<synchronous>, transform_indices = @transform_16, window_bounds = array<i64: 2, 1, 64>}, {pipeline_mode = #tpu.pipeline_mode<synchronous>, transform_indices = @transform_17, window_bounds = array<i64: 2, 1, 64>}, {pipeline_mode = #tpu.pipeline_mode<synchronous>, transform_indices = @transform_18, window_bounds = array<i64: 64, 128>}, {pipeline_mode = #tpu.pipeline_mode<synchronous>, transform_indices = @transform_19, window_bounds = array<i64: 1, 128>}, {transform_indices = @transform_20, window_bounds = array<i64: 1, 8, 64>}, {transform_indices = @transform_21, window_bounds = array<i64: 1, 1, 8>}, {pipeline_mode = #tpu.pipeline_mode<synchronous>, transform_indices = @transform_22, window_bounds = array<i64: 2, 64, 192>}, {pipeline_mode = #tpu.pipeline_mode<synchronous>, transform_indices = @transform_23, window_bounds = array<i64: 2, 1, 192>}, {pipeline_mode = #tpu.pipeline_mode<synchronous>, transform_indices = @transform_24, window_bounds = array<i64: 2, 64, 64>}, {pipeline_mode = #tpu.pipeline_mode<synchronous>, transform_indices = @transform_25, window_bounds = array<i64: 2, 1, 64>}, {pipeline_mode = #tpu.pipeline_mode<synchronous>, transform_indices = @transform_26, window_bounds = array<i64: 2, 1, 64>}, {pipeline_mode = #tpu.pipeline_mode<synchronous>, transform_indices = @transform_27, window_bounds = array<i64: 2, 1, 64>}, {pipeline_mode = #tpu.pipeline_mode<synchronous>, transform_indices = @transform_28, window_bounds = array<i64: 2, 64, 256>}, {pipeline_mode = #tpu.pipeline_mode<synchronous>, transform_indices = @transform_29, window_bounds = array<i64: 2, 1, 256>}, {pipeline_mode = #tpu.pipeline_mode<synchronous>, transform_indices = @transform_30, window_bounds = array<i64: 2, 256, 64>}, {pipeline_mode = #tpu.pipeline_mode<synchronous>, transform_indices = @transform_31, window_bounds = array<i64: 2, 1, 64>}, {pipeline_mode = #tpu.pipeline_mode<synchronous>, transform_indices = @transform_32, window_bounds = array<i64: 2, 1, 64>}, {pipeline_mode = #tpu.pipeline_mode<synchronous>, transform_indices = @transform_33, window_bounds = array<i64: 2, 1, 64>}, {pipeline_mode = #tpu.pipeline_mode<synchronous>, transform_indices = @transform_34, window_bounds = array<i64: 1, 64>}, {pipeline_mode = #tpu.pipeline_mode<synchronous>, transform_indices = @transform_35, window_bounds = array<i64: 1, 64>}, {pipeline_mode = #tpu.pipeline_mode<synchronous>, transform_indices = @transform_36, window_bounds = array<i64: 64, 128>}, {pipeline_mode = #tpu.pipeline_mode<synchronous>, transform_indices = @transform_37, window_bounds = array<i64: 1, 128>}, {transform_indices = @transform_38, window_bounds = array<i64: 1, 16, 128>}, {transform_indices = @transform_39, window_bounds = array<i64: 1, 8, 128>}, {transform_indices = @transform_40, window_bounds = array<i64: 1, 8, 128>}]} {
    %c0 = arith.constant 0 : index
    %c0_0 = arith.constant 0 : index
    %c0_1 = arith.constant 0 : index
    %0 = vector.load %arg1[%c0, %c0_0, %c0_1] : memref<1x16x32xf32, #tpu.memory_space<vmem>>, vector<1x16x32xf32>
    %1 = vector.shape_cast %0 : vector<1x16x32xf32> to vector<16x32xf32>
    %c0_2 = arith.constant 0 : index
    %c0_3 = arith.constant 0 : index
    %2 = vector.load %arg2[%c0_2, %c0_3] : memref<32x64xf32, #tpu.memory_space<vmem>>, vector<32x64xf32>
    %cst = arith.constant dense<0.000000e+00> : vector<16x64xf32>
    %3 = tpu.matmul %1, %2, %cst {dimension_numbers = #tpu.dot_dimension_numbers<[1], [0], [0], [1], [0, 0, 1, 1], [], []>} : vector<16x32xf32>, vector<32x64xf32>, vector<16x64xf32> -> vector<16x64xf32>
    %c0_4 = arith.constant 0 : index
    %c0_5 = arith.constant 0 : index
    %4 = vector.load %arg3[%c0_4, %c0_5] : memref<1x64xf32, #tpu.memory_space<vmem>>, vector<1x64xf32>
    %5 = vector.broadcast %4 : vector<1x64xf32> to vector<16x64xf32>
    %6 = arith.addf %3, %5 : vector<16x64xf32>
    %c0_6 = arith.constant 0 : index
    %c0_7 = arith.constant 0 : index
    %7 = vector.load %arg4[%c0_6, %c0_7] : memref<16x64xf32, #tpu.memory_space<vmem>>, vector<16x64xf32>
    %8 = arith.addf %6, %7 : vector<16x64xf32>
    %c0_8 = arith.constant 0 : index
    %c0_9 = arith.constant 0 : index
    %9 = vector.load %arg5[%c0_8, %c0_9] : memref<1x64xf32, #tpu.memory_space<vmem>>, vector<1x64xf32>
    %c0_10 = arith.constant 0 : index
    %c0_11 = arith.constant 0 : index
    %10 = vector.load %arg6[%c0_10, %c0_11] : memref<1x64xf32, #tpu.memory_space<vmem>>, vector<1x64xf32>
    %cst_12 = arith.constant dense<0.000000e+00> : vector<16xf32>
    %11 = vector.multi_reduction <add>, %8, %cst_12 [1] : vector<16x64xf32> to vector<16xf32>
    %12 = vector.shape_cast %11 : vector<16xf32> to vector<16x1xf32>
    %cst_13 = arith.constant 6.400000e+01 : f32
    %13 = vector.broadcast %cst_13 : f32 to vector<16x1xf32>
    %14 = arith.divf %12, %13 : vector<16x1xf32>
    %15 = vector.broadcast %14 : vector<16x1xf32> to vector<16x64xf32>
    %16 = arith.subf %8, %15 : vector<16x64xf32>
    %17 = arith.mulf %16, %16 : vector<16x64xf32>
    %cst_14 = arith.constant dense<0.000000e+00> : vector<16xf32>
    %18 = vector.multi_reduction <add>, %17, %cst_14 [1] : vector<16x64xf32> to vector<16xf32>
    %19 = vector.shape_cast %18 : vector<16xf32> to vector<16x1xf32>
    %cst_15 = arith.constant 6.400000e+01 : f32
    %20 = vector.broadcast %cst_15 : f32 to vector<16x1xf32>
    %21 = arith.divf %19, %20 : vector<16x1xf32>
    %22 = vector.broadcast %14 : vector<16x1xf32> to vector<16x64xf32>
    %23 = arith.subf %8, %22 : vector<16x64xf32>
    %cst_16 = arith.constant 9.99999996E-13 : f32
    %24 = vector.broadcast %cst_16 : f32 to vector<16x1xf32>
    %25 = arith.addf %21, %24 : vector<16x1xf32>
    %26 = math.rsqrt %25 : vector<16x1xf32>
    %27 = vector.broadcast %26 : vector<16x1xf32> to vector<16x64xf32>
    %28 = arith.mulf %23, %27 : vector<16x64xf32>
    %29 = vector.broadcast %9 : vector<1x64xf32> to vector<16x64xf32>
    %30 = arith.mulf %28, %29 : vector<16x64xf32>
    %31 = vector.broadcast %10 : vector<1x64xf32> to vector<16x64xf32>
    %32 = arith.addf %30, %31 : vector<16x64xf32>
    %c0_17 = arith.constant 0 : index
    %c0_18 = arith.constant 0 : index
    %c0_19 = arith.constant 0 : index
    %33 = vector.load %arg7[%c0_17, %c0_18, %c0_19] : memref<2x64x192xf32, #tpu.memory_space<vmem>>, vector<1x64x192xf32>
    %34 = vector.shape_cast %33 : vector<1x64x192xf32> to vector<64x192xf32>
    %cst_20 = arith.constant dense<0.000000e+00> : vector<16x192xf32>
    %35 = tpu.matmul %32, %34, %cst_20 {dimension_numbers = #tpu.dot_dimension_numbers<[1], [0], [0], [1], [0, 0, 1, 1], [], []>} : vector<16x64xf32>, vector<64x192xf32>, vector<16x192xf32> -> vector<16x192xf32>
    %c0_21 = arith.constant 0 : index
    %c0_22 = arith.constant 0 : index
    %c0_23 = arith.constant 0 : index
    %36 = vector.load %arg8[%c0_21, %c0_22, %c0_23] : memref<2x1x192xf32, #tpu.memory_space<vmem>>, vector<1x1x192xf32>
    %37 = vector.shape_cast %36 : vector<1x1x192xf32> to vector<1x192xf32>
    %38 = vector.broadcast %37 : vector<1x192xf32> to vector<16x192xf32>
    %39 = arith.addf %35, %38 : vector<16x192xf32>
    %40 = vector.extract_strided_slice %39 {offsets = [0, 0], sizes = [16, 16], strides = [1, 1]} : vector<16x192xf32> to vector<16x16xf32>
    %41 = vector.extract_strided_slice %39 {offsets = [0, 64], sizes = [16, 16], strides = [1, 1]} : vector<16x192xf32> to vector<16x16xf32>
    %42 = vector.extract_strided_slice %39 {offsets = [0, 128], sizes = [16, 16], strides = [1, 1]} : vector<16x192xf32> to vector<16x16xf32>
    %43 = tpu.transpose %41, [1, 0] : vector<16x16xf32> -> vector<16x16xf32>
    %cst_24 = arith.constant dense<0.000000e+00> : vector<16x16xf32>
    %44 = tpu.matmul %40, %43, %cst_24 {dimension_numbers = #tpu.dot_dimension_numbers<[1], [0], [0], [1], [0, 0, 1, 1], [], []>} : vector<16x16xf32>, vector<16x16xf32>, vector<16x16xf32> -> vector<16x16xf32>
    %cst_25 = arith.constant 2.500000e-01 : f32
    %45 = vector.broadcast %cst_25 : f32 to vector<16x16xf32>
    %46 = arith.mulf %44, %45 : vector<16x16xf32>
    %cst_26 = arith.constant dense<0xFF800000> : vector<16xf32>
    %47 = vector.multi_reduction <maximumf>, %46, %cst_26 [1] : vector<16x16xf32> to vector<16xf32>
    %48 = vector.shape_cast %47 : vector<16xf32> to vector<16x1xf32>
    %49 = vector.broadcast %48 : vector<16x1xf32> to vector<16x16xf32>
    %50 = arith.subf %46, %49 : vector<16x16xf32>
    %51 = math.exp %50 : vector<16x16xf32>
    %cst_27 = arith.constant dense<0.000000e+00> : vector<16xf32>
    %52 = vector.multi_reduction <add>, %51, %cst_27 [1] : vector<16x16xf32> to vector<16xf32>
    %53 = vector.shape_cast %52 : vector<16xf32> to vector<16x1xf32>
    %54 = tpu.reciprocal %53 {approx = true} : vector<16x1xf32> -> vector<16x1xf32>
    %55 = vector.broadcast %54 : vector<16x1xf32> to vector<16x16xf32>
    %56 = arith.mulf %51, %55 : vector<16x16xf32>
    %cst_28 = arith.constant dense<0.000000e+00> : vector<16x16xf32>
    %57 = tpu.matmul %56, %42, %cst_28 {dimension_numbers = #tpu.dot_dimension_numbers<[1], [0], [0], [1], [0, 0, 1, 1], [], []>} : vector<16x16xf32>, vector<16x16xf32>, vector<16x16xf32> -> vector<16x16xf32>
    %58 = vector.extract_strided_slice %39 {offsets = [0, 16], sizes = [16, 16], strides = [1, 1]} : vector<16x192xf32> to vector<16x16xf32>
    %59 = vector.extract_strided_slice %39 {offsets = [0, 80], sizes = [16, 16], strides = [1, 1]} : vector<16x192xf32> to vector<16x16xf32>
    %60 = vector.extract_strided_slice %39 {offsets = [0, 144], sizes = [16, 16], strides = [1, 1]} : vector<16x192xf32> to vector<16x16xf32>
    %61 = tpu.transpose %59, [1, 0] : vector<16x16xf32> -> vector<16x16xf32>
    %cst_29 = arith.constant dense<0.000000e+00> : vector<16x16xf32>
    %62 = tpu.matmul %58, %61, %cst_29 {dimension_numbers = #tpu.dot_dimension_numbers<[1], [0], [0], [1], [0, 0, 1, 1], [], []>} : vector<16x16xf32>, vector<16x16xf32>, vector<16x16xf32> -> vector<16x16xf32>
    %cst_30 = arith.constant 2.500000e-01 : f32
    %63 = vector.broadcast %cst_30 : f32 to vector<16x16xf32>
    %64 = arith.mulf %62, %63 : vector<16x16xf32>
    %cst_31 = arith.constant dense<0xFF800000> : vector<16xf32>
    %65 = vector.multi_reduction <maximumf>, %64, %cst_31 [1] : vector<16x16xf32> to vector<16xf32>
    %66 = vector.shape_cast %65 : vector<16xf32> to vector<16x1xf32>
    %67 = vector.broadcast %66 : vector<16x1xf32> to vector<16x16xf32>
    %68 = arith.subf %64, %67 : vector<16x16xf32>
    %69 = math.exp %68 : vector<16x16xf32>
    %cst_32 = arith.constant dense<0.000000e+00> : vector<16xf32>
    %70 = vector.multi_reduction <add>, %69, %cst_32 [1] : vector<16x16xf32> to vector<16xf32>
    %71 = vector.shape_cast %70 : vector<16xf32> to vector<16x1xf32>
    %72 = tpu.reciprocal %71 {approx = true} : vector<16x1xf32> -> vector<16x1xf32>
    %73 = vector.broadcast %72 : vector<16x1xf32> to vector<16x16xf32>
    %74 = arith.mulf %69, %73 : vector<16x16xf32>
    %cst_33 = arith.constant dense<0.000000e+00> : vector<16x16xf32>
    %75 = tpu.matmul %74, %60, %cst_33 {dimension_numbers = #tpu.dot_dimension_numbers<[1], [0], [0], [1], [0, 0, 1, 1], [], []>} : vector<16x16xf32>, vector<16x16xf32>, vector<16x16xf32> -> vector<16x16xf32>
    %76 = vector.extract_strided_slice %39 {offsets = [0, 32], sizes = [16, 16], strides = [1, 1]} : vector<16x192xf32> to vector<16x16xf32>
    %77 = vector.extract_strided_slice %39 {offsets = [0, 96], sizes = [16, 16], strides = [1, 1]} : vector<16x192xf32> to vector<16x16xf32>
    %78 = vector.extract_strided_slice %39 {offsets = [0, 160], sizes = [16, 16], strides = [1, 1]} : vector<16x192xf32> to vector<16x16xf32>
    %79 = tpu.transpose %77, [1, 0] : vector<16x16xf32> -> vector<16x16xf32>
    %cst_34 = arith.constant dense<0.000000e+00> : vector<16x16xf32>
    %80 = tpu.matmul %76, %79, %cst_34 {dimension_numbers = #tpu.dot_dimension_numbers<[1], [0], [0], [1], [0, 0, 1, 1], [], []>} : vector<16x16xf32>, vector<16x16xf32>, vector<16x16xf32> -> vector<16x16xf32>
    %cst_35 = arith.constant 2.500000e-01 : f32
    %81 = vector.broadcast %cst_35 : f32 to vector<16x16xf32>
    %82 = arith.mulf %80, %81 : vector<16x16xf32>
    %cst_36 = arith.constant dense<0xFF800000> : vector<16xf32>
    %83 = vector.multi_reduction <maximumf>, %82, %cst_36 [1] : vector<16x16xf32> to vector<16xf32>
    %84 = vector.shape_cast %83 : vector<16xf32> to vector<16x1xf32>
    %85 = vector.broadcast %84 : vector<16x1xf32> to vector<16x16xf32>
    %86 = arith.subf %82, %85 : vector<16x16xf32>
    %87 = math.exp %86 : vector<16x16xf32>
    %cst_37 = arith.constant dense<0.000000e+00> : vector<16xf32>
    %88 = vector.multi_reduction <add>, %87, %cst_37 [1] : vector<16x16xf32> to vector<16xf32>
    %89 = vector.shape_cast %88 : vector<16xf32> to vector<16x1xf32>
    %90 = tpu.reciprocal %89 {approx = true} : vector<16x1xf32> -> vector<16x1xf32>
    %91 = vector.broadcast %90 : vector<16x1xf32> to vector<16x16xf32>
    %92 = arith.mulf %87, %91 : vector<16x16xf32>
    %cst_38 = arith.constant dense<0.000000e+00> : vector<16x16xf32>
    %93 = tpu.matmul %92, %78, %cst_38 {dimension_numbers = #tpu.dot_dimension_numbers<[1], [0], [0], [1], [0, 0, 1, 1], [], []>} : vector<16x16xf32>, vector<16x16xf32>, vector<16x16xf32> -> vector<16x16xf32>
    %94 = vector.extract_strided_slice %39 {offsets = [0, 48], sizes = [16, 16], strides = [1, 1]} : vector<16x192xf32> to vector<16x16xf32>
    %95 = vector.extract_strided_slice %39 {offsets = [0, 112], sizes = [16, 16], strides = [1, 1]} : vector<16x192xf32> to vector<16x16xf32>
    %96 = vector.extract_strided_slice %39 {offsets = [0, 176], sizes = [16, 16], strides = [1, 1]} : vector<16x192xf32> to vector<16x16xf32>
    %97 = tpu.transpose %95, [1, 0] : vector<16x16xf32> -> vector<16x16xf32>
    %cst_39 = arith.constant dense<0.000000e+00> : vector<16x16xf32>
    %98 = tpu.matmul %94, %97, %cst_39 {dimension_numbers = #tpu.dot_dimension_numbers<[1], [0], [0], [1], [0, 0, 1, 1], [], []>} : vector<16x16xf32>, vector<16x16xf32>, vector<16x16xf32> -> vector<16x16xf32>
    %cst_40 = arith.constant 2.500000e-01 : f32
    %99 = vector.broadcast %cst_40 : f32 to vector<16x16xf32>
    %100 = arith.mulf %98, %99 : vector<16x16xf32>
    %cst_41 = arith.constant dense<0xFF800000> : vector<16xf32>
    %101 = vector.multi_reduction <maximumf>, %100, %cst_41 [1] : vector<16x16xf32> to vector<16xf32>
    %102 = vector.shape_cast %101 : vector<16xf32> to vector<16x1xf32>
    %103 = vector.broadcast %102 : vector<16x1xf32> to vector<16x16xf32>
    %104 = arith.subf %100, %103 : vector<16x16xf32>
    %105 = math.exp %104 : vector<16x16xf32>
    %cst_42 = arith.constant dense<0.000000e+00> : vector<16xf32>
    %106 = vector.multi_reduction <add>, %105, %cst_42 [1] : vector<16x16xf32> to vector<16xf32>
    %107 = vector.shape_cast %106 : vector<16xf32> to vector<16x1xf32>
    %108 = tpu.reciprocal %107 {approx = true} : vector<16x1xf32> -> vector<16x1xf32>
    %109 = vector.broadcast %108 : vector<16x1xf32> to vector<16x16xf32>
    %110 = arith.mulf %105, %109 : vector<16x16xf32>
    %cst_43 = arith.constant dense<0.000000e+00> : vector<16x16xf32>
    %111 = tpu.matmul %110, %96, %cst_43 {dimension_numbers = #tpu.dot_dimension_numbers<[1], [0], [0], [1], [0, 0, 1, 1], [], []>} : vector<16x16xf32>, vector<16x16xf32>, vector<16x16xf32> -> vector<16x16xf32>
    %112 = tpu.concatenate %57, %75, %93, %111 in 1 : vector<16x16xf32>, vector<16x16xf32>, vector<16x16xf32>, vector<16x16xf32> -> vector<16x64xf32>
    %c0_44 = arith.constant 0 : index
    %c0_45 = arith.constant 0 : index
    %c0_46 = arith.constant 0 : index
    %113 = vector.load %arg9[%c0_44, %c0_45, %c0_46] : memref<2x64x64xf32, #tpu.memory_space<vmem>>, vector<1x64x64xf32>
    %114 = vector.shape_cast %113 : vector<1x64x64xf32> to vector<64x64xf32>
    %cst_47 = arith.constant dense<0.000000e+00> : vector<16x64xf32>
    %115 = tpu.matmul %112, %114, %cst_47 {dimension_numbers = #tpu.dot_dimension_numbers<[1], [0], [0], [1], [0, 0, 1, 1], [], []>} : vector<16x64xf32>, vector<64x64xf32>, vector<16x64xf32> -> vector<16x64xf32>
    %c0_48 = arith.constant 0 : index
    %c0_49 = arith.constant 0 : index
    %c0_50 = arith.constant 0 : index
    %116 = vector.load %arg10[%c0_48, %c0_49, %c0_50] : memref<2x1x64xf32, #tpu.memory_space<vmem>>, vector<1x1x64xf32>
    %117 = vector.shape_cast %116 : vector<1x1x64xf32> to vector<1x64xf32>
    %118 = vector.broadcast %117 : vector<1x64xf32> to vector<16x64xf32>
    %119 = arith.addf %115, %118 : vector<16x64xf32>
    %120 = arith.addf %119, %32 : vector<16x64xf32>
    %c0_51 = arith.constant 0 : index
    %c0_52 = arith.constant 0 : index
    %c0_53 = arith.constant 0 : index
    %121 = vector.load %arg11[%c0_51, %c0_52, %c0_53] : memref<2x1x64xf32, #tpu.memory_space<vmem>>, vector<1x1x64xf32>
    %122 = vector.shape_cast %121 : vector<1x1x64xf32> to vector<1x64xf32>
    %c0_54 = arith.constant 0 : index
    %c0_55 = arith.constant 0 : index
    %c0_56 = arith.constant 0 : index
    %123 = vector.load %arg12[%c0_54, %c0_55, %c0_56] : memref<2x1x64xf32, #tpu.memory_space<vmem>>, vector<1x1x64xf32>
    %124 = vector.shape_cast %123 : vector<1x1x64xf32> to vector<1x64xf32>
    %cst_57 = arith.constant dense<0.000000e+00> : vector<16xf32>
    %125 = vector.multi_reduction <add>, %120, %cst_57 [1] : vector<16x64xf32> to vector<16xf32>
    %126 = vector.shape_cast %125 : vector<16xf32> to vector<16x1xf32>
    %cst_58 = arith.constant 6.400000e+01 : f32
    %127 = vector.broadcast %cst_58 : f32 to vector<16x1xf32>
    %128 = arith.divf %126, %127 : vector<16x1xf32>
    %129 = vector.broadcast %128 : vector<16x1xf32> to vector<16x64xf32>
    %130 = arith.subf %120, %129 : vector<16x64xf32>
    %131 = arith.mulf %130, %130 : vector<16x64xf32>
    %cst_59 = arith.constant dense<0.000000e+00> : vector<16xf32>
    %132 = vector.multi_reduction <add>, %131, %cst_59 [1] : vector<16x64xf32> to vector<16xf32>
    %133 = vector.shape_cast %132 : vector<16xf32> to vector<16x1xf32>
    %cst_60 = arith.constant 6.400000e+01 : f32
    %134 = vector.broadcast %cst_60 : f32 to vector<16x1xf32>
    %135 = arith.divf %133, %134 : vector<16x1xf32>
    %136 = vector.broadcast %128 : vector<16x1xf32> to vector<16x64xf32>
    %137 = arith.subf %120, %136 : vector<16x64xf32>
    %cst_61 = arith.constant 9.99999996E-13 : f32
    %138 = vector.broadcast %cst_61 : f32 to vector<16x1xf32>
    %139 = arith.addf %135, %138 : vector<16x1xf32>
    %140 = math.rsqrt %139 : vector<16x1xf32>
    %141 = vector.broadcast %140 : vector<16x1xf32> to vector<16x64xf32>
    %142 = arith.mulf %137, %141 : vector<16x64xf32>
    %143 = vector.broadcast %122 : vector<1x64xf32> to vector<16x64xf32>
    %144 = arith.mulf %142, %143 : vector<16x64xf32>
    %145 = vector.broadcast %124 : vector<1x64xf32> to vector<16x64xf32>
    %146 = arith.addf %144, %145 : vector<16x64xf32>
    %c0_62 = arith.constant 0 : index
    %c0_63 = arith.constant 0 : index
    %c0_64 = arith.constant 0 : index
    %147 = vector.load %arg13[%c0_62, %c0_63, %c0_64] : memref<2x64x256xf32, #tpu.memory_space<vmem>>, vector<1x64x256xf32>
    %148 = vector.shape_cast %147 : vector<1x64x256xf32> to vector<64x256xf32>
    %cst_65 = arith.constant dense<0.000000e+00> : vector<16x256xf32>
    %149 = tpu.matmul %146, %148, %cst_65 {dimension_numbers = #tpu.dot_dimension_numbers<[1], [0], [0], [1], [0, 0, 1, 1], [], []>} : vector<16x64xf32>, vector<64x256xf32>, vector<16x256xf32> -> vector<16x256xf32>
    %c0_66 = arith.constant 0 : index
    %c0_67 = arith.constant 0 : index
    %c0_68 = arith.constant 0 : index
    %150 = vector.load %arg14[%c0_66, %c0_67, %c0_68] : memref<2x1x256xf32, #tpu.memory_space<vmem>>, vector<1x1x256xf32>
    %151 = vector.shape_cast %150 : vector<1x1x256xf32> to vector<1x256xf32>
    %152 = vector.broadcast %151 : vector<1x256xf32> to vector<16x256xf32>
    %153 = arith.addf %149, %152 : vector<16x256xf32>
    %cst_69 = arith.constant 5.000000e-01 : f32
    %154 = vector.broadcast %cst_69 : f32 to vector<16x256xf32>
    %155 = arith.mulf %154, %153 : vector<16x256xf32>
    %cst_70 = arith.constant 0.707106769 : f32
    %156 = vector.broadcast %cst_70 : f32 to vector<16x256xf32>
    %157 = arith.mulf %153, %156 : vector<16x256xf32>
    %158 = math.erf %157 : vector<16x256xf32>
    %cst_71 = arith.constant 1.000000e+00 : f32
    %159 = vector.broadcast %cst_71 : f32 to vector<16x256xf32>
    %160 = arith.addf %159, %158 : vector<16x256xf32>
    %161 = arith.mulf %155, %160 : vector<16x256xf32>
    %c0_72 = arith.constant 0 : index
    %c0_73 = arith.constant 0 : index
    %c0_74 = arith.constant 0 : index
    %162 = vector.load %arg15[%c0_72, %c0_73, %c0_74] : memref<2x256x64xf32, #tpu.memory_space<vmem>>, vector<1x256x64xf32>
    %163 = vector.shape_cast %162 : vector<1x256x64xf32> to vector<256x64xf32>
    %cst_75 = arith.constant dense<0.000000e+00> : vector<16x64xf32>
    %164 = tpu.matmul %161, %163, %cst_75 {dimension_numbers = #tpu.dot_dimension_numbers<[1], [0], [0], [1], [0, 0, 1, 1], [], []>} : vector<16x256xf32>, vector<256x64xf32>, vector<16x64xf32> -> vector<16x64xf32>
    %c0_76 = arith.constant 0 : index
    %c0_77 = arith.constant 0 : index
    %c0_78 = arith.constant 0 : index
    %165 = vector.load %arg16[%c0_76, %c0_77, %c0_78] : memref<2x1x64xf32, #tpu.memory_space<vmem>>, vector<1x1x64xf32>
    %166 = vector.shape_cast %165 : vector<1x1x64xf32> to vector<1x64xf32>
    %167 = vector.broadcast %166 : vector<1x64xf32> to vector<16x64xf32>
    %168 = arith.addf %164, %167 : vector<16x64xf32>
    %169 = arith.addf %168, %146 : vector<16x64xf32>
    %c0_79 = arith.constant 0 : index
    %c0_80 = arith.constant 0 : index
    %c0_81 = arith.constant 0 : index
    %170 = vector.load %arg17[%c0_79, %c0_80, %c0_81] : memref<2x1x64xf32, #tpu.memory_space<vmem>>, vector<1x1x64xf32>
    %171 = vector.shape_cast %170 : vector<1x1x64xf32> to vector<1x64xf32>
    %c0_82 = arith.constant 0 : index
    %c0_83 = arith.constant 0 : index
    %c0_84 = arith.constant 0 : index
    %172 = vector.load %arg18[%c0_82, %c0_83, %c0_84] : memref<2x1x64xf32, #tpu.memory_space<vmem>>, vector<1x1x64xf32>
    %173 = vector.shape_cast %172 : vector<1x1x64xf32> to vector<1x64xf32>
    %cst_85 = arith.constant dense<0.000000e+00> : vector<16xf32>
    %174 = vector.multi_reduction <add>, %169, %cst_85 [1] : vector<16x64xf32> to vector<16xf32>
    %175 = vector.shape_cast %174 : vector<16xf32> to vector<16x1xf32>
    %cst_86 = arith.constant 6.400000e+01 : f32
    %176 = vector.broadcast %cst_86 : f32 to vector<16x1xf32>
    %177 = arith.divf %175, %176 : vector<16x1xf32>
    %178 = vector.broadcast %177 : vector<16x1xf32> to vector<16x64xf32>
    %179 = arith.subf %169, %178 : vector<16x64xf32>
    %180 = arith.mulf %179, %179 : vector<16x64xf32>
    %cst_87 = arith.constant dense<0.000000e+00> : vector<16xf32>
    %181 = vector.multi_reduction <add>, %180, %cst_87 [1] : vector<16x64xf32> to vector<16xf32>
    %182 = vector.shape_cast %181 : vector<16xf32> to vector<16x1xf32>
    %cst_88 = arith.constant 6.400000e+01 : f32
    %183 = vector.broadcast %cst_88 : f32 to vector<16x1xf32>
    %184 = arith.divf %182, %183 : vector<16x1xf32>
    %185 = vector.broadcast %177 : vector<16x1xf32> to vector<16x64xf32>
    %186 = arith.subf %169, %185 : vector<16x64xf32>
    %cst_89 = arith.constant 9.99999996E-13 : f32
    %187 = vector.broadcast %cst_89 : f32 to vector<16x1xf32>
    %188 = arith.addf %184, %187 : vector<16x1xf32>
    %189 = math.rsqrt %188 : vector<16x1xf32>
    %190 = vector.broadcast %189 : vector<16x1xf32> to vector<16x64xf32>
    %191 = arith.mulf %186, %190 : vector<16x64xf32>
    %192 = vector.broadcast %171 : vector<1x64xf32> to vector<16x64xf32>
    %193 = arith.mulf %191, %192 : vector<16x64xf32>
    %194 = vector.broadcast %173 : vector<1x64xf32> to vector<16x64xf32>
    %195 = arith.addf %193, %194 : vector<16x64xf32>
    %c1 = arith.constant 1 : index
    %c0_90 = arith.constant 0 : index
    %c0_91 = arith.constant 0 : index
    %196 = vector.load %arg7[%c1, %c0_90, %c0_91] : memref<2x64x192xf32, #tpu.memory_space<vmem>>, vector<1x64x192xf32>
    %197 = vector.shape_cast %196 : vector<1x64x192xf32> to vector<64x192xf32>
    %cst_92 = arith.constant dense<0.000000e+00> : vector<16x192xf32>
    %198 = tpu.matmul %195, %197, %cst_92 {dimension_numbers = #tpu.dot_dimension_numbers<[1], [0], [0], [1], [0, 0, 1, 1], [], []>} : vector<16x64xf32>, vector<64x192xf32>, vector<16x192xf32> -> vector<16x192xf32>
    %c1_93 = arith.constant 1 : index
    %c0_94 = arith.constant 0 : index
    %c0_95 = arith.constant 0 : index
    %199 = vector.load %arg8[%c1_93, %c0_94, %c0_95] : memref<2x1x192xf32, #tpu.memory_space<vmem>>, vector<1x1x192xf32>
    %200 = vector.shape_cast %199 : vector<1x1x192xf32> to vector<1x192xf32>
    %201 = vector.broadcast %200 : vector<1x192xf32> to vector<16x192xf32>
    %202 = arith.addf %198, %201 : vector<16x192xf32>
    %203 = vector.extract_strided_slice %202 {offsets = [0, 0], sizes = [16, 16], strides = [1, 1]} : vector<16x192xf32> to vector<16x16xf32>
    %204 = vector.extract_strided_slice %202 {offsets = [0, 64], sizes = [16, 16], strides = [1, 1]} : vector<16x192xf32> to vector<16x16xf32>
    %205 = vector.extract_strided_slice %202 {offsets = [0, 128], sizes = [16, 16], strides = [1, 1]} : vector<16x192xf32> to vector<16x16xf32>
    %206 = tpu.transpose %204, [1, 0] : vector<16x16xf32> -> vector<16x16xf32>
    %cst_96 = arith.constant dense<0.000000e+00> : vector<16x16xf32>
    %207 = tpu.matmul %203, %206, %cst_96 {dimension_numbers = #tpu.dot_dimension_numbers<[1], [0], [0], [1], [0, 0, 1, 1], [], []>} : vector<16x16xf32>, vector<16x16xf32>, vector<16x16xf32> -> vector<16x16xf32>
    %cst_97 = arith.constant 2.500000e-01 : f32
    %208 = vector.broadcast %cst_97 : f32 to vector<16x16xf32>
    %209 = arith.mulf %207, %208 : vector<16x16xf32>
    %cst_98 = arith.constant dense<0xFF800000> : vector<16xf32>
    %210 = vector.multi_reduction <maximumf>, %209, %cst_98 [1] : vector<16x16xf32> to vector<16xf32>
    %211 = vector.shape_cast %210 : vector<16xf32> to vector<16x1xf32>
    %212 = vector.broadcast %211 : vector<16x1xf32> to vector<16x16xf32>
    %213 = arith.subf %209, %212 : vector<16x16xf32>
    %214 = math.exp %213 : vector<16x16xf32>
    %cst_99 = arith.constant dense<0.000000e+00> : vector<16xf32>
    %215 = vector.multi_reduction <add>, %214, %cst_99 [1] : vector<16x16xf32> to vector<16xf32>
    %216 = vector.shape_cast %215 : vector<16xf32> to vector<16x1xf32>
    %217 = tpu.reciprocal %216 {approx = true} : vector<16x1xf32> -> vector<16x1xf32>
    %218 = vector.broadcast %217 : vector<16x1xf32> to vector<16x16xf32>
    %219 = arith.mulf %214, %218 : vector<16x16xf32>
    %cst_100 = arith.constant dense<0.000000e+00> : vector<16x16xf32>
    %220 = tpu.matmul %219, %205, %cst_100 {dimension_numbers = #tpu.dot_dimension_numbers<[1], [0], [0], [1], [0, 0, 1, 1], [], []>} : vector<16x16xf32>, vector<16x16xf32>, vector<16x16xf32> -> vector<16x16xf32>
    %221 = vector.extract_strided_slice %202 {offsets = [0, 16], sizes = [16, 16], strides = [1, 1]} : vector<16x192xf32> to vector<16x16xf32>
    %222 = vector.extract_strided_slice %202 {offsets = [0, 80], sizes = [16, 16], strides = [1, 1]} : vector<16x192xf32> to vector<16x16xf32>
    %223 = vector.extract_strided_slice %202 {offsets = [0, 144], sizes = [16, 16], strides = [1, 1]} : vector<16x192xf32> to vector<16x16xf32>
    %224 = tpu.transpose %222, [1, 0] : vector<16x16xf32> -> vector<16x16xf32>
    %cst_101 = arith.constant dense<0.000000e+00> : vector<16x16xf32>
    %225 = tpu.matmul %221, %224, %cst_101 {dimension_numbers = #tpu.dot_dimension_numbers<[1], [0], [0], [1], [0, 0, 1, 1], [], []>} : vector<16x16xf32>, vector<16x16xf32>, vector<16x16xf32> -> vector<16x16xf32>
    %cst_102 = arith.constant 2.500000e-01 : f32
    %226 = vector.broadcast %cst_102 : f32 to vector<16x16xf32>
    %227 = arith.mulf %225, %226 : vector<16x16xf32>
    %cst_103 = arith.constant dense<0xFF800000> : vector<16xf32>
    %228 = vector.multi_reduction <maximumf>, %227, %cst_103 [1] : vector<16x16xf32> to vector<16xf32>
    %229 = vector.shape_cast %228 : vector<16xf32> to vector<16x1xf32>
    %230 = vector.broadcast %229 : vector<16x1xf32> to vector<16x16xf32>
    %231 = arith.subf %227, %230 : vector<16x16xf32>
    %232 = math.exp %231 : vector<16x16xf32>
    %cst_104 = arith.constant dense<0.000000e+00> : vector<16xf32>
    %233 = vector.multi_reduction <add>, %232, %cst_104 [1] : vector<16x16xf32> to vector<16xf32>
    %234 = vector.shape_cast %233 : vector<16xf32> to vector<16x1xf32>
    %235 = tpu.reciprocal %234 {approx = true} : vector<16x1xf32> -> vector<16x1xf32>
    %236 = vector.broadcast %235 : vector<16x1xf32> to vector<16x16xf32>
    %237 = arith.mulf %232, %236 : vector<16x16xf32>
    %cst_105 = arith.constant dense<0.000000e+00> : vector<16x16xf32>
    %238 = tpu.matmul %237, %223, %cst_105 {dimension_numbers = #tpu.dot_dimension_numbers<[1], [0], [0], [1], [0, 0, 1, 1], [], []>} : vector<16x16xf32>, vector<16x16xf32>, vector<16x16xf32> -> vector<16x16xf32>
    %239 = vector.extract_strided_slice %202 {offsets = [0, 32], sizes = [16, 16], strides = [1, 1]} : vector<16x192xf32> to vector<16x16xf32>
    %240 = vector.extract_strided_slice %202 {offsets = [0, 96], sizes = [16, 16], strides = [1, 1]} : vector<16x192xf32> to vector<16x16xf32>
    %241 = vector.extract_strided_slice %202 {offsets = [0, 160], sizes = [16, 16], strides = [1, 1]} : vector<16x192xf32> to vector<16x16xf32>
    %242 = tpu.transpose %240, [1, 0] : vector<16x16xf32> -> vector<16x16xf32>
    %cst_106 = arith.constant dense<0.000000e+00> : vector<16x16xf32>
    %243 = tpu.matmul %239, %242, %cst_106 {dimension_numbers = #tpu.dot_dimension_numbers<[1], [0], [0], [1], [0, 0, 1, 1], [], []>} : vector<16x16xf32>, vector<16x16xf32>, vector<16x16xf32> -> vector<16x16xf32>
    %cst_107 = arith.constant 2.500000e-01 : f32
    %244 = vector.broadcast %cst_107 : f32 to vector<16x16xf32>
    %245 = arith.mulf %243, %244 : vector<16x16xf32>
    %cst_108 = arith.constant dense<0xFF800000> : vector<16xf32>
    %246 = vector.multi_reduction <maximumf>, %245, %cst_108 [1] : vector<16x16xf32> to vector<16xf32>
    %247 = vector.shape_cast %246 : vector<16xf32> to vector<16x1xf32>
    %248 = vector.broadcast %247 : vector<16x1xf32> to vector<16x16xf32>
    %249 = arith.subf %245, %248 : vector<16x16xf32>
    %250 = math.exp %249 : vector<16x16xf32>
    %cst_109 = arith.constant dense<0.000000e+00> : vector<16xf32>
    %251 = vector.multi_reduction <add>, %250, %cst_109 [1] : vector<16x16xf32> to vector<16xf32>
    %252 = vector.shape_cast %251 : vector<16xf32> to vector<16x1xf32>
    %253 = tpu.reciprocal %252 {approx = true} : vector<16x1xf32> -> vector<16x1xf32>
    %254 = vector.broadcast %253 : vector<16x1xf32> to vector<16x16xf32>
    %255 = arith.mulf %250, %254 : vector<16x16xf32>
    %cst_110 = arith.constant dense<0.000000e+00> : vector<16x16xf32>
    %256 = tpu.matmul %255, %241, %cst_110 {dimension_numbers = #tpu.dot_dimension_numbers<[1], [0], [0], [1], [0, 0, 1, 1], [], []>} : vector<16x16xf32>, vector<16x16xf32>, vector<16x16xf32> -> vector<16x16xf32>
    %257 = vector.extract_strided_slice %202 {offsets = [0, 48], sizes = [16, 16], strides = [1, 1]} : vector<16x192xf32> to vector<16x16xf32>
    %258 = vector.extract_strided_slice %202 {offsets = [0, 112], sizes = [16, 16], strides = [1, 1]} : vector<16x192xf32> to vector<16x16xf32>
    %259 = vector.extract_strided_slice %202 {offsets = [0, 176], sizes = [16, 16], strides = [1, 1]} : vector<16x192xf32> to vector<16x16xf32>
    %260 = tpu.transpose %258, [1, 0] : vector<16x16xf32> -> vector<16x16xf32>
    %cst_111 = arith.constant dense<0.000000e+00> : vector<16x16xf32>
    %261 = tpu.matmul %257, %260, %cst_111 {dimension_numbers = #tpu.dot_dimension_numbers<[1], [0], [0], [1], [0, 0, 1, 1], [], []>} : vector<16x16xf32>, vector<16x16xf32>, vector<16x16xf32> -> vector<16x16xf32>
    %cst_112 = arith.constant 2.500000e-01 : f32
    %262 = vector.broadcast %cst_112 : f32 to vector<16x16xf32>
    %263 = arith.mulf %261, %262 : vector<16x16xf32>
    %cst_113 = arith.constant dense<0xFF800000> : vector<16xf32>
    %264 = vector.multi_reduction <maximumf>, %263, %cst_113 [1] : vector<16x16xf32> to vector<16xf32>
    %265 = vector.shape_cast %264 : vector<16xf32> to vector<16x1xf32>
    %266 = vector.broadcast %265 : vector<16x1xf32> to vector<16x16xf32>
    %267 = arith.subf %263, %266 : vector<16x16xf32>
    %268 = math.exp %267 : vector<16x16xf32>
    %cst_114 = arith.constant dense<0.000000e+00> : vector<16xf32>
    %269 = vector.multi_reduction <add>, %268, %cst_114 [1] : vector<16x16xf32> to vector<16xf32>
    %270 = vector.shape_cast %269 : vector<16xf32> to vector<16x1xf32>
    %271 = tpu.reciprocal %270 {approx = true} : vector<16x1xf32> -> vector<16x1xf32>
    %272 = vector.broadcast %271 : vector<16x1xf32> to vector<16x16xf32>
    %273 = arith.mulf %268, %272 : vector<16x16xf32>
    %cst_115 = arith.constant dense<0.000000e+00> : vector<16x16xf32>
    %274 = tpu.matmul %273, %259, %cst_115 {dimension_numbers = #tpu.dot_dimension_numbers<[1], [0], [0], [1], [0, 0, 1, 1], [], []>} : vector<16x16xf32>, vector<16x16xf32>, vector<16x16xf32> -> vector<16x16xf32>
    %275 = tpu.concatenate %220, %238, %256, %274 in 1 : vector<16x16xf32>, vector<16x16xf32>, vector<16x16xf32>, vector<16x16xf32> -> vector<16x64xf32>
    %c1_116 = arith.constant 1 : index
    %c0_117 = arith.constant 0 : index
    %c0_118 = arith.constant 0 : index
    %276 = vector.load %arg9[%c1_116, %c0_117, %c0_118] : memref<2x64x64xf32, #tpu.memory_space<vmem>>, vector<1x64x64xf32>
    %277 = vector.shape_cast %276 : vector<1x64x64xf32> to vector<64x64xf32>
    %cst_119 = arith.constant dense<0.000000e+00> : vector<16x64xf32>
    %278 = tpu.matmul %275, %277, %cst_119 {dimension_numbers = #tpu.dot_dimension_numbers<[1], [0], [0], [1], [0, 0, 1, 1], [], []>} : vector<16x64xf32>, vector<64x64xf32>, vector<16x64xf32> -> vector<16x64xf32>
    %c1_120 = arith.constant 1 : index
    %c0_121 = arith.constant 0 : index
    %c0_122 = arith.constant 0 : index
    %279 = vector.load %arg10[%c1_120, %c0_121, %c0_122] : memref<2x1x64xf32, #tpu.memory_space<vmem>>, vector<1x1x64xf32>
    %280 = vector.shape_cast %279 : vector<1x1x64xf32> to vector<1x64xf32>
    %281 = vector.broadcast %280 : vector<1x64xf32> to vector<16x64xf32>
    %282 = arith.addf %278, %281 : vector<16x64xf32>
    %283 = arith.addf %282, %195 : vector<16x64xf32>
    %c1_123 = arith.constant 1 : index
    %c0_124 = arith.constant 0 : index
    %c0_125 = arith.constant 0 : index
    %284 = vector.load %arg11[%c1_123, %c0_124, %c0_125] : memref<2x1x64xf32, #tpu.memory_space<vmem>>, vector<1x1x64xf32>
    %285 = vector.shape_cast %284 : vector<1x1x64xf32> to vector<1x64xf32>
    %c1_126 = arith.constant 1 : index
    %c0_127 = arith.constant 0 : index
    %c0_128 = arith.constant 0 : index
    %286 = vector.load %arg12[%c1_126, %c0_127, %c0_128] : memref<2x1x64xf32, #tpu.memory_space<vmem>>, vector<1x1x64xf32>
    %287 = vector.shape_cast %286 : vector<1x1x64xf32> to vector<1x64xf32>
    %cst_129 = arith.constant dense<0.000000e+00> : vector<16xf32>
    %288 = vector.multi_reduction <add>, %283, %cst_129 [1] : vector<16x64xf32> to vector<16xf32>
    %289 = vector.shape_cast %288 : vector<16xf32> to vector<16x1xf32>
    %cst_130 = arith.constant 6.400000e+01 : f32
    %290 = vector.broadcast %cst_130 : f32 to vector<16x1xf32>
    %291 = arith.divf %289, %290 : vector<16x1xf32>
    %292 = vector.broadcast %291 : vector<16x1xf32> to vector<16x64xf32>
    %293 = arith.subf %283, %292 : vector<16x64xf32>
    %294 = arith.mulf %293, %293 : vector<16x64xf32>
    %cst_131 = arith.constant dense<0.000000e+00> : vector<16xf32>
    %295 = vector.multi_reduction <add>, %294, %cst_131 [1] : vector<16x64xf32> to vector<16xf32>
    %296 = vector.shape_cast %295 : vector<16xf32> to vector<16x1xf32>
    %cst_132 = arith.constant 6.400000e+01 : f32
    %297 = vector.broadcast %cst_132 : f32 to vector<16x1xf32>
    %298 = arith.divf %296, %297 : vector<16x1xf32>
    %299 = vector.broadcast %291 : vector<16x1xf32> to vector<16x64xf32>
    %300 = arith.subf %283, %299 : vector<16x64xf32>
    %cst_133 = arith.constant 9.99999996E-13 : f32
    %301 = vector.broadcast %cst_133 : f32 to vector<16x1xf32>
    %302 = arith.addf %298, %301 : vector<16x1xf32>
    %303 = math.rsqrt %302 : vector<16x1xf32>
    %304 = vector.broadcast %303 : vector<16x1xf32> to vector<16x64xf32>
    %305 = arith.mulf %300, %304 : vector<16x64xf32>
    %306 = vector.broadcast %285 : vector<1x64xf32> to vector<16x64xf32>
    %307 = arith.mulf %305, %306 : vector<16x64xf32>
    %308 = vector.broadcast %287 : vector<1x64xf32> to vector<16x64xf32>
    %309 = arith.addf %307, %308 : vector<16x64xf32>
    %c1_134 = arith.constant 1 : index
    %c0_135 = arith.constant 0 : index
    %c0_136 = arith.constant 0 : index
    %310 = vector.load %arg13[%c1_134, %c0_135, %c0_136] : memref<2x64x256xf32, #tpu.memory_space<vmem>>, vector<1x64x256xf32>
    %311 = vector.shape_cast %310 : vector<1x64x256xf32> to vector<64x256xf32>
    %cst_137 = arith.constant dense<0.000000e+00> : vector<16x256xf32>
    %312 = tpu.matmul %309, %311, %cst_137 {dimension_numbers = #tpu.dot_dimension_numbers<[1], [0], [0], [1], [0, 0, 1, 1], [], []>} : vector<16x64xf32>, vector<64x256xf32>, vector<16x256xf32> -> vector<16x256xf32>
    %c1_138 = arith.constant 1 : index
    %c0_139 = arith.constant 0 : index
    %c0_140 = arith.constant 0 : index
    %313 = vector.load %arg14[%c1_138, %c0_139, %c0_140] : memref<2x1x256xf32, #tpu.memory_space<vmem>>, vector<1x1x256xf32>
    %314 = vector.shape_cast %313 : vector<1x1x256xf32> to vector<1x256xf32>
    %315 = vector.broadcast %314 : vector<1x256xf32> to vector<16x256xf32>
    %316 = arith.addf %312, %315 : vector<16x256xf32>
    %cst_141 = arith.constant 5.000000e-01 : f32
    %317 = vector.broadcast %cst_141 : f32 to vector<16x256xf32>
    %318 = arith.mulf %317, %316 : vector<16x256xf32>
    %cst_142 = arith.constant 0.707106769 : f32
    %319 = vector.broadcast %cst_142 : f32 to vector<16x256xf32>
    %320 = arith.mulf %316, %319 : vector<16x256xf32>
    %321 = math.erf %320 : vector<16x256xf32>
    %cst_143 = arith.constant 1.000000e+00 : f32
    %322 = vector.broadcast %cst_143 : f32 to vector<16x256xf32>
    %323 = arith.addf %322, %321 : vector<16x256xf32>
    %324 = arith.mulf %318, %323 : vector<16x256xf32>
    %c1_144 = arith.constant 1 : index
    %c0_145 = arith.constant 0 : index
    %c0_146 = arith.constant 0 : index
    %325 = vector.load %arg15[%c1_144, %c0_145, %c0_146] : memref<2x256x64xf32, #tpu.memory_space<vmem>>, vector<1x256x64xf32>
    %326 = vector.shape_cast %325 : vector<1x256x64xf32> to vector<256x64xf32>
    %cst_147 = arith.constant dense<0.000000e+00> : vector<16x64xf32>
    %327 = tpu.matmul %324, %326, %cst_147 {dimension_numbers = #tpu.dot_dimension_numbers<[1], [0], [0], [1], [0, 0, 1, 1], [], []>} : vector<16x256xf32>, vector<256x64xf32>, vector<16x64xf32> -> vector<16x64xf32>
    %c1_148 = arith.constant 1 : index
    %c0_149 = arith.constant 0 : index
    %c0_150 = arith.constant 0 : index
    %328 = vector.load %arg16[%c1_148, %c0_149, %c0_150] : memref<2x1x64xf32, #tpu.memory_space<vmem>>, vector<1x1x64xf32>
    %329 = vector.shape_cast %328 : vector<1x1x64xf32> to vector<1x64xf32>
    %330 = vector.broadcast %329 : vector<1x64xf32> to vector<16x64xf32>
    %331 = arith.addf %327, %330 : vector<16x64xf32>
    %332 = arith.addf %331, %309 : vector<16x64xf32>
    %c1_151 = arith.constant 1 : index
    %c0_152 = arith.constant 0 : index
    %c0_153 = arith.constant 0 : index
    %333 = vector.load %arg17[%c1_151, %c0_152, %c0_153] : memref<2x1x64xf32, #tpu.memory_space<vmem>>, vector<1x1x64xf32>
    %334 = vector.shape_cast %333 : vector<1x1x64xf32> to vector<1x64xf32>
    %c1_154 = arith.constant 1 : index
    %c0_155 = arith.constant 0 : index
    %c0_156 = arith.constant 0 : index
    %335 = vector.load %arg18[%c1_154, %c0_155, %c0_156] : memref<2x1x64xf32, #tpu.memory_space<vmem>>, vector<1x1x64xf32>
    %336 = vector.shape_cast %335 : vector<1x1x64xf32> to vector<1x64xf32>
    %cst_157 = arith.constant dense<0.000000e+00> : vector<16xf32>
    %337 = vector.multi_reduction <add>, %332, %cst_157 [1] : vector<16x64xf32> to vector<16xf32>
    %338 = vector.shape_cast %337 : vector<16xf32> to vector<16x1xf32>
    %cst_158 = arith.constant 6.400000e+01 : f32
    %339 = vector.broadcast %cst_158 : f32 to vector<16x1xf32>
    %340 = arith.divf %338, %339 : vector<16x1xf32>
    %341 = vector.broadcast %340 : vector<16x1xf32> to vector<16x64xf32>
    %342 = arith.subf %332, %341 : vector<16x64xf32>
    %343 = arith.mulf %342, %342 : vector<16x64xf32>
    %cst_159 = arith.constant dense<0.000000e+00> : vector<16xf32>
    %344 = vector.multi_reduction <add>, %343, %cst_159 [1] : vector<16x64xf32> to vector<16xf32>
    %345 = vector.shape_cast %344 : vector<16xf32> to vector<16x1xf32>
    %cst_160 = arith.constant 6.400000e+01 : f32
    %346 = vector.broadcast %cst_160 : f32 to vector<16x1xf32>
    %347 = arith.divf %345, %346 : vector<16x1xf32>
    %348 = vector.broadcast %340 : vector<16x1xf32> to vector<16x64xf32>
    %349 = arith.subf %332, %348 : vector<16x64xf32>
    %cst_161 = arith.constant 9.99999996E-13 : f32
    %350 = vector.broadcast %cst_161 : f32 to vector<16x1xf32>
    %351 = arith.addf %347, %350 : vector<16x1xf32>
    %352 = math.rsqrt %351 : vector<16x1xf32>
    %353 = vector.broadcast %352 : vector<16x1xf32> to vector<16x64xf32>
    %354 = arith.mulf %349, %353 : vector<16x64xf32>
    %355 = vector.broadcast %334 : vector<1x64xf32> to vector<16x64xf32>
    %356 = arith.mulf %354, %355 : vector<16x64xf32>
    %357 = vector.broadcast %336 : vector<1x64xf32> to vector<16x64xf32>
    %358 = arith.addf %356, %357 : vector<16x64xf32>
    %c0_162 = arith.constant 0 : index
    %c0_163 = arith.constant 0 : index
    %359 = vector.load %arg19[%c0_162, %c0_163] : memref<64x128xf32, #tpu.memory_space<vmem>>, vector<64x128xf32>
    %cst_164 = arith.constant dense<0.000000e+00> : vector<16x128xf32>
    %360 = tpu.matmul %358, %359, %cst_164 {dimension_numbers = #tpu.dot_dimension_numbers<[1], [0], [0], [1], [0, 0, 1, 1], [], []>} : vector<16x64xf32>, vector<64x128xf32>, vector<16x128xf32> -> vector<16x128xf32>
    %c0_165 = arith.constant 0 : index
    %c0_166 = arith.constant 0 : index
    %361 = vector.load %arg20[%c0_165, %c0_166] : memref<1x128xf32, #tpu.memory_space<vmem>>, vector<1x128xf32>
    %362 = vector.broadcast %361 : vector<1x128xf32> to vector<16x128xf32>
    %363 = arith.addf %360, %362 : vector<16x128xf32>
    %cst_167 = arith.constant dense<0xFF800000> : vector<16xf32>
    %364 = vector.multi_reduction <maximumf>, %363, %cst_167 [1] : vector<16x128xf32> to vector<16xf32>
    %365 = vector.shape_cast %364 : vector<16xf32> to vector<16x1xf32>
    %366 = vector.broadcast %365 : vector<16x1xf32> to vector<16x128xf32>
    %367 = arith.subf %363, %366 : vector<16x128xf32>
    %368 = math.exp %367 : vector<16x128xf32>
    %cst_168 = arith.constant dense<0.000000e+00> : vector<16xf32>
    %369 = vector.multi_reduction <add>, %368, %cst_168 [1] : vector<16x128xf32> to vector<16xf32>
    %370 = vector.shape_cast %369 : vector<16xf32> to vector<16x1xf32>
    %371 = math.log %370 : vector<16x1xf32>
    %372 = vector.broadcast %371 : vector<16x1xf32> to vector<16x128xf32>
    %373 = arith.subf %367, %372 : vector<16x128xf32>
    %c0_169 = arith.constant 0 : index
    %c0_170 = arith.constant 0 : index
    %c0_171 = arith.constant 0 : index
    %374 = vector.load %arg39[%c0_169, %c0_170, %c0_171] : memref<1x16x128xf32, #tpu.memory_space<vmem>>, vector<1x16x128xf32>
    %375 = vector.shape_cast %374 : vector<1x16x128xf32> to vector<16x128xf32>
    %376 = vector.shape_cast %373 : vector<16x128xf32> to vector<1x16x128xf32>
    tpu.vector_store %arg39[%c0_169, %c0_170, %c0_171], %376 {strides = array<i32>} : memref<1x16x128xf32, #tpu.memory_space<vmem>>, vector<1x16x128xf32>,
    %c0_172 = arith.constant 0 : index
    %c0_173 = arith.constant 0 : index
    %c0_174 = arith.constant 0 : index
    %377 = vector.load %arg21[%c0_172, %c0_173, %c0_174] : memref<1x8x64xf32, #tpu.memory_space<vmem>>, vector<1x8x64xf32>
    %378 = vector.shape_cast %377 : vector<1x8x64xf32> to vector<8x64xf32>
    %c0_175 = arith.constant 0 : index
    %c0_176 = arith.constant 0 : index
    %c0_177 = arith.constant 0 : index
    %379 = vector.load %arg22[%c0_175, %c0_176, %c0_177] : memref<1x1x8xf32, #tpu.memory_space<vmem>>, vector<1x1x8xf32>
    %380 = vector.shape_cast %379 : vector<1x1x8xf32> to vector<1x8xf32>
    %cst_178 = arith.constant 0.000000e+00 : f32
    %381 = vector.broadcast %cst_178 : f32 to vector<1x8xf32>
    %382 = arith.cmpf ogt, %380, %381 : vector<1x8xf32>
    %383 = tpu.iota {dimensions = array<i32: 0>} : vector<8x8xi32>
    %384 = tpu.iota {dimensions = array<i32: 1>} : vector<8x8xi32>
    %385 = arith.cmpi sle, %384, %383 : vector<8x8xi32>
    %386 = vector.broadcast %382 : vector<1x8xi1> to vector<8x8xi1>
    %387 = arith.andi %385, %386 : vector<8x8xi1>
    %cst_179 = arith.constant 0.000000e+00 : f32
    %cst_180 = arith.constant -1.000000e+09 : f32
    %388 = vector.broadcast %cst_179 : f32 to vector<8x8xf32>
    %389 = vector.broadcast %cst_180 : f32 to vector<8x8xf32>
    %390 = arith.select %387, %388, %389 : vector<8x8xi1>, vector<8x8xf32>
    %c0_181 = arith.constant 0 : index
    %c0_182 = arith.constant 0 : index
    %c0_183 = arith.constant 0 : index
    %391 = vector.load %arg27[%c0_181, %c0_182, %c0_183] : memref<2x1x64xf32, #tpu.memory_space<vmem>>, vector<1x1x64xf32>
    %392 = vector.shape_cast %391 : vector<1x1x64xf32> to vector<1x64xf32>
    %c0_184 = arith.constant 0 : index
    %c0_185 = arith.constant 0 : index
    %c0_186 = arith.constant 0 : index
    %393 = vector.load %arg28[%c0_184, %c0_185, %c0_186] : memref<2x1x64xf32, #tpu.memory_space<vmem>>, vector<1x1x64xf32>
    %394 = vector.shape_cast %393 : vector<1x1x64xf32> to vector<1x64xf32>
    %cst_187 = arith.constant dense<0.000000e+00> : vector<8xf32>
    %395 = vector.multi_reduction <add>, %378, %cst_187 [1] : vector<8x64xf32> to vector<8xf32>
    %396 = vector.shape_cast %395 : vector<8xf32> to vector<8x1xf32>
    %cst_188 = arith.constant 6.400000e+01 : f32
    %397 = vector.broadcast %cst_188 : f32 to vector<8x1xf32>
    %398 = arith.divf %396, %397 : vector<8x1xf32>
    %399 = vector.broadcast %398 : vector<8x1xf32> to vector<8x64xf32>
    %400 = arith.subf %378, %399 : vector<8x64xf32>
    %401 = arith.mulf %400, %400 : vector<8x64xf32>
    %cst_189 = arith.constant dense<0.000000e+00> : vector<8xf32>
    %402 = vector.multi_reduction <add>, %401, %cst_189 [1] : vector<8x64xf32> to vector<8xf32>
    %403 = vector.shape_cast %402 : vector<8xf32> to vector<8x1xf32>
    %cst_190 = arith.constant 6.400000e+01 : f32
    %404 = vector.broadcast %cst_190 : f32 to vector<8x1xf32>
    %405 = arith.divf %403, %404 : vector<8x1xf32>
    %406 = vector.broadcast %398 : vector<8x1xf32> to vector<8x64xf32>
    %407 = arith.subf %378, %406 : vector<8x64xf32>
    %cst_191 = arith.constant 9.99999974E-6 : f32
    %408 = vector.broadcast %cst_191 : f32 to vector<8x1xf32>
    %409 = arith.addf %405, %408 : vector<8x1xf32>
    %410 = math.rsqrt %409 : vector<8x1xf32>
    %411 = vector.broadcast %410 : vector<8x1xf32> to vector<8x64xf32>
    %412 = arith.mulf %407, %411 : vector<8x64xf32>
    %413 = vector.broadcast %392 : vector<1x64xf32> to vector<8x64xf32>
    %414 = arith.mulf %412, %413 : vector<8x64xf32>
    %415 = vector.broadcast %394 : vector<1x64xf32> to vector<8x64xf32>
    %416 = arith.addf %414, %415 : vector<8x64xf32>
    %c0_192 = arith.constant 0 : index
    %c0_193 = arith.constant 0 : index
    %c0_194 = arith.constant 0 : index
    %417 = vector.load %arg23[%c0_192, %c0_193, %c0_194] : memref<2x64x192xf32, #tpu.memory_space<vmem>>, vector<1x64x192xf32>
    %418 = vector.shape_cast %417 : vector<1x64x192xf32> to vector<64x192xf32>
    %cst_195 = arith.constant dense<0.000000e+00> : vector<8x192xf32>
    %419 = tpu.matmul %416, %418, %cst_195 {dimension_numbers = #tpu.dot_dimension_numbers<[1], [0], [0], [1], [0, 0, 1, 1], [], []>} : vector<8x64xf32>, vector<64x192xf32>, vector<8x192xf32> -> vector<8x192xf32>
    %c0_196 = arith.constant 0 : index
    %c0_197 = arith.constant 0 : index
    %c0_198 = arith.constant 0 : index
    %420 = vector.load %arg24[%c0_196, %c0_197, %c0_198] : memref<2x1x192xf32, #tpu.memory_space<vmem>>, vector<1x1x192xf32>
    %421 = vector.shape_cast %420 : vector<1x1x192xf32> to vector<1x192xf32>
    %422 = vector.broadcast %421 : vector<1x192xf32> to vector<8x192xf32>
    %423 = arith.addf %419, %422 : vector<8x192xf32>
    %424 = vector.extract_strided_slice %423 {offsets = [0, 0], sizes = [8, 16], strides = [1, 1]} : vector<8x192xf32> to vector<8x16xf32>
    %425 = vector.extract_strided_slice %423 {offsets = [0, 64], sizes = [8, 16], strides = [1, 1]} : vector<8x192xf32> to vector<8x16xf32>
    %426 = vector.extract_strided_slice %423 {offsets = [0, 128], sizes = [8, 16], strides = [1, 1]} : vector<8x192xf32> to vector<8x16xf32>
    %427 = tpu.transpose %425, [1, 0] : vector<8x16xf32> -> vector<16x8xf32>
    %cst_199 = arith.constant dense<0.000000e+00> : vector<8x8xf32>
    %428 = tpu.matmul %424, %427, %cst_199 {dimension_numbers = #tpu.dot_dimension_numbers<[1], [0], [0], [1], [0, 0, 1, 1], [], []>} : vector<8x16xf32>, vector<16x8xf32>, vector<8x8xf32> -> vector<8x8xf32>
    %cst_200 = arith.constant 2.500000e-01 : f32
    %429 = vector.broadcast %cst_200 : f32 to vector<8x8xf32>
    %430 = arith.mulf %428, %429 : vector<8x8xf32>
    %431 = arith.addf %430, %390 : vector<8x8xf32>
    %cst_201 = arith.constant dense<0xFF800000> : vector<8xf32>
    %432 = vector.multi_reduction <maximumf>, %431, %cst_201 [1] : vector<8x8xf32> to vector<8xf32>
    %433 = vector.shape_cast %432 : vector<8xf32> to vector<8x1xf32>
    %434 = vector.broadcast %433 : vector<8x1xf32> to vector<8x8xf32>
    %435 = arith.subf %431, %434 : vector<8x8xf32>
    %436 = math.exp %435 : vector<8x8xf32>
    %cst_202 = arith.constant dense<0.000000e+00> : vector<8xf32>
    %437 = vector.multi_reduction <add>, %436, %cst_202 [1] : vector<8x8xf32> to vector<8xf32>
    %438 = vector.shape_cast %437 : vector<8xf32> to vector<8x1xf32>
    %439 = tpu.reciprocal %438 {approx = true} : vector<8x1xf32> -> vector<8x1xf32>
    %440 = vector.broadcast %439 : vector<8x1xf32> to vector<8x8xf32>
    %441 = arith.mulf %436, %440 : vector<8x8xf32>
    %cst_203 = arith.constant dense<0.000000e+00> : vector<8x16xf32>
    %442 = tpu.matmul %441, %426, %cst_203 {dimension_numbers = #tpu.dot_dimension_numbers<[1], [0], [0], [1], [0, 0, 1, 1], [], []>} : vector<8x8xf32>, vector<8x16xf32>, vector<8x16xf32> -> vector<8x16xf32>
    %443 = vector.extract_strided_slice %423 {offsets = [0, 16], sizes = [8, 16], strides = [1, 1]} : vector<8x192xf32> to vector<8x16xf32>
    %444 = vector.extract_strided_slice %423 {offsets = [0, 80], sizes = [8, 16], strides = [1, 1]} : vector<8x192xf32> to vector<8x16xf32>
    %445 = vector.extract_strided_slice %423 {offsets = [0, 144], sizes = [8, 16], strides = [1, 1]} : vector<8x192xf32> to vector<8x16xf32>
    %446 = tpu.transpose %444, [1, 0] : vector<8x16xf32> -> vector<16x8xf32>
    %cst_204 = arith.constant dense<0.000000e+00> : vector<8x8xf32>
    %447 = tpu.matmul %443, %446, %cst_204 {dimension_numbers = #tpu.dot_dimension_numbers<[1], [0], [0], [1], [0, 0, 1, 1], [], []>} : vector<8x16xf32>, vector<16x8xf32>, vector<8x8xf32> -> vector<8x8xf32>
    %cst_205 = arith.constant 2.500000e-01 : f32
    %448 = vector.broadcast %cst_205 : f32 to vector<8x8xf32>
    %449 = arith.mulf %447, %448 : vector<8x8xf32>
    %450 = arith.addf %449, %390 : vector<8x8xf32>
    %cst_206 = arith.constant dense<0xFF800000> : vector<8xf32>
    %451 = vector.multi_reduction <maximumf>, %450, %cst_206 [1] : vector<8x8xf32> to vector<8xf32>
    %452 = vector.shape_cast %451 : vector<8xf32> to vector<8x1xf32>
    %453 = vector.broadcast %452 : vector<8x1xf32> to vector<8x8xf32>
    %454 = arith.subf %450, %453 : vector<8x8xf32>
    %455 = math.exp %454 : vector<8x8xf32>
    %cst_207 = arith.constant dense<0.000000e+00> : vector<8xf32>
    %456 = vector.multi_reduction <add>, %455, %cst_207 [1] : vector<8x8xf32> to vector<8xf32>
    %457 = vector.shape_cast %456 : vector<8xf32> to vector<8x1xf32>
    %458 = tpu.reciprocal %457 {approx = true} : vector<8x1xf32> -> vector<8x1xf32>
    %459 = vector.broadcast %458 : vector<8x1xf32> to vector<8x8xf32>
    %460 = arith.mulf %455, %459 : vector<8x8xf32>
    %cst_208 = arith.constant dense<0.000000e+00> : vector<8x16xf32>
    %461 = tpu.matmul %460, %445, %cst_208 {dimension_numbers = #tpu.dot_dimension_numbers<[1], [0], [0], [1], [0, 0, 1, 1], [], []>} : vector<8x8xf32>, vector<8x16xf32>, vector<8x16xf32> -> vector<8x16xf32>
    %462 = vector.extract_strided_slice %423 {offsets = [0, 32], sizes = [8, 16], strides = [1, 1]} : vector<8x192xf32> to vector<8x16xf32>
    %463 = vector.extract_strided_slice %423 {offsets = [0, 96], sizes = [8, 16], strides = [1, 1]} : vector<8x192xf32> to vector<8x16xf32>
    %464 = vector.extract_strided_slice %423 {offsets = [0, 160], sizes = [8, 16], strides = [1, 1]} : vector<8x192xf32> to vector<8x16xf32>
    %465 = tpu.transpose %463, [1, 0] : vector<8x16xf32> -> vector<16x8xf32>
    %cst_209 = arith.constant dense<0.000000e+00> : vector<8x8xf32>
    %466 = tpu.matmul %462, %465, %cst_209 {dimension_numbers = #tpu.dot_dimension_numbers<[1], [0], [0], [1], [0, 0, 1, 1], [], []>} : vector<8x16xf32>, vector<16x8xf32>, vector<8x8xf32> -> vector<8x8xf32>
    %cst_210 = arith.constant 2.500000e-01 : f32
    %467 = vector.broadcast %cst_210 : f32 to vector<8x8xf32>
    %468 = arith.mulf %466, %467 : vector<8x8xf32>
    %469 = arith.addf %468, %390 : vector<8x8xf32>
    %cst_211 = arith.constant dense<0xFF800000> : vector<8xf32>
    %470 = vector.multi_reduction <maximumf>, %469, %cst_211 [1] : vector<8x8xf32> to vector<8xf32>
    %471 = vector.shape_cast %470 : vector<8xf32> to vector<8x1xf32>
    %472 = vector.broadcast %471 : vector<8x1xf32> to vector<8x8xf32>
    %473 = arith.subf %469, %472 : vector<8x8xf32>
    %474 = math.exp %473 : vector<8x8xf32>
    %cst_212 = arith.constant dense<0.000000e+00> : vector<8xf32>
    %475 = vector.multi_reduction <add>, %474, %cst_212 [1] : vector<8x8xf32> to vector<8xf32>
    %476 = vector.shape_cast %475 : vector<8xf32> to vector<8x1xf32>
    %477 = tpu.reciprocal %476 {approx = true} : vector<8x1xf32> -> vector<8x1xf32>
    %478 = vector.broadcast %477 : vector<8x1xf32> to vector<8x8xf32>
    %479 = arith.mulf %474, %478 : vector<8x8xf32>
    %cst_213 = arith.constant dense<0.000000e+00> : vector<8x16xf32>
    %480 = tpu.matmul %479, %464, %cst_213 {dimension_numbers = #tpu.dot_dimension_numbers<[1], [0], [0], [1], [0, 0, 1, 1], [], []>} : vector<8x8xf32>, vector<8x16xf32>, vector<8x16xf32> -> vector<8x16xf32>
    %481 = vector.extract_strided_slice %423 {offsets = [0, 48], sizes = [8, 16], strides = [1, 1]} : vector<8x192xf32> to vector<8x16xf32>
    %482 = vector.extract_strided_slice %423 {offsets = [0, 112], sizes = [8, 16], strides = [1, 1]} : vector<8x192xf32> to vector<8x16xf32>
    %483 = vector.extract_strided_slice %423 {offsets = [0, 176], sizes = [8, 16], strides = [1, 1]} : vector<8x192xf32> to vector<8x16xf32>
    %484 = tpu.transpose %482, [1, 0] : vector<8x16xf32> -> vector<16x8xf32>
    %cst_214 = arith.constant dense<0.000000e+00> : vector<8x8xf32>
    %485 = tpu.matmul %481, %484, %cst_214 {dimension_numbers = #tpu.dot_dimension_numbers<[1], [0], [0], [1], [0, 0, 1, 1], [], []>} : vector<8x16xf32>, vector<16x8xf32>, vector<8x8xf32> -> vector<8x8xf32>
    %cst_215 = arith.constant 2.500000e-01 : f32
    %486 = vector.broadcast %cst_215 : f32 to vector<8x8xf32>
    %487 = arith.mulf %485, %486 : vector<8x8xf32>
    %488 = arith.addf %487, %390 : vector<8x8xf32>
    %cst_216 = arith.constant dense<0xFF800000> : vector<8xf32>
    %489 = vector.multi_reduction <maximumf>, %488, %cst_216 [1] : vector<8x8xf32> to vector<8xf32>
    %490 = vector.shape_cast %489 : vector<8xf32> to vector<8x1xf32>
    %491 = vector.broadcast %490 : vector<8x1xf32> to vector<8x8xf32>
    %492 = arith.subf %488, %491 : vector<8x8xf32>
    %493 = math.exp %492 : vector<8x8xf32>
    %cst_217 = arith.constant dense<0.000000e+00> : vector<8xf32>
    %494 = vector.multi_reduction <add>, %493, %cst_217 [1] : vector<8x8xf32> to vector<8xf32>
    %495 = vector.shape_cast %494 : vector<8xf32> to vector<8x1xf32>
    %496 = tpu.reciprocal %495 {approx = true} : vector<8x1xf32> -> vector<8x1xf32>
    %497 = vector.broadcast %496 : vector<8x1xf32> to vector<8x8xf32>
    %498 = arith.mulf %493, %497 : vector<8x8xf32>
    %cst_218 = arith.constant dense<0.000000e+00> : vector<8x16xf32>
    %499 = tpu.matmul %498, %483, %cst_218 {dimension_numbers = #tpu.dot_dimension_numbers<[1], [0], [0], [1], [0, 0, 1, 1], [], []>} : vector<8x8xf32>, vector<8x16xf32>, vector<8x16xf32> -> vector<8x16xf32>
    %500 = tpu.concatenate %442, %461, %480, %499 in 1 : vector<8x16xf32>, vector<8x16xf32>, vector<8x16xf32>, vector<8x16xf32> -> vector<8x64xf32>
    %c0_219 = arith.constant 0 : index
    %c0_220 = arith.constant 0 : index
    %c0_221 = arith.constant 0 : index
    %501 = vector.load %arg25[%c0_219, %c0_220, %c0_221] : memref<2x64x64xf32, #tpu.memory_space<vmem>>, vector<1x64x64xf32>
    %502 = vector.shape_cast %501 : vector<1x64x64xf32> to vector<64x64xf32>
    %cst_222 = arith.constant dense<0.000000e+00> : vector<8x64xf32>
    %503 = tpu.matmul %500, %502, %cst_222 {dimension_numbers = #tpu.dot_dimension_numbers<[1], [0], [0], [1], [0, 0, 1, 1], [], []>} : vector<8x64xf32>, vector<64x64xf32>, vector<8x64xf32> -> vector<8x64xf32>
    %c0_223 = arith.constant 0 : index
    %c0_224 = arith.constant 0 : index
    %c0_225 = arith.constant 0 : index
    %504 = vector.load %arg26[%c0_223, %c0_224, %c0_225] : memref<2x1x64xf32, #tpu.memory_space<vmem>>, vector<1x1x64xf32>
    %505 = vector.shape_cast %504 : vector<1x1x64xf32> to vector<1x64xf32>
    %506 = vector.broadcast %505 : vector<1x64xf32> to vector<8x64xf32>
    %507 = arith.addf %503, %506 : vector<8x64xf32>
    %508 = arith.addf %378, %507 : vector<8x64xf32>
    %c0_226 = arith.constant 0 : index
    %c0_227 = arith.constant 0 : index
    %c0_228 = arith.constant 0 : index
    %509 = vector.load %arg33[%c0_226, %c0_227, %c0_228] : memref<2x1x64xf32, #tpu.memory_space<vmem>>, vector<1x1x64xf32>
    %510 = vector.shape_cast %509 : vector<1x1x64xf32> to vector<1x64xf32>
    %c0_229 = arith.constant 0 : index
    %c0_230 = arith.constant 0 : index
    %c0_231 = arith.constant 0 : index
    %511 = vector.load %arg34[%c0_229, %c0_230, %c0_231] : memref<2x1x64xf32, #tpu.memory_space<vmem>>, vector<1x1x64xf32>
    %512 = vector.shape_cast %511 : vector<1x1x64xf32> to vector<1x64xf32>
    %cst_232 = arith.constant dense<0.000000e+00> : vector<8xf32>
    %513 = vector.multi_reduction <add>, %508, %cst_232 [1] : vector<8x64xf32> to vector<8xf32>
    %514 = vector.shape_cast %513 : vector<8xf32> to vector<8x1xf32>
    %cst_233 = arith.constant 6.400000e+01 : f32
    %515 = vector.broadcast %cst_233 : f32 to vector<8x1xf32>
    %516 = arith.divf %514, %515 : vector<8x1xf32>
    %517 = vector.broadcast %516 : vector<8x1xf32> to vector<8x64xf32>
    %518 = arith.subf %508, %517 : vector<8x64xf32>
    %519 = arith.mulf %518, %518 : vector<8x64xf32>
    %cst_234 = arith.constant dense<0.000000e+00> : vector<8xf32>
    %520 = vector.multi_reduction <add>, %519, %cst_234 [1] : vector<8x64xf32> to vector<8xf32>
    %521 = vector.shape_cast %520 : vector<8xf32> to vector<8x1xf32>
    %cst_235 = arith.constant 6.400000e+01 : f32
    %522 = vector.broadcast %cst_235 : f32 to vector<8x1xf32>
    %523 = arith.divf %521, %522 : vector<8x1xf32>
    %524 = vector.broadcast %516 : vector<8x1xf32> to vector<8x64xf32>
    %525 = arith.subf %508, %524 : vector<8x64xf32>
    %cst_236 = arith.constant 9.99999974E-6 : f32
    %526 = vector.broadcast %cst_236 : f32 to vector<8x1xf32>
    %527 = arith.addf %523, %526 : vector<8x1xf32>
    %528 = math.rsqrt %527 : vector<8x1xf32>
    %529 = vector.broadcast %528 : vector<8x1xf32> to vector<8x64xf32>
    %530 = arith.mulf %525, %529 : vector<8x64xf32>
    %531 = vector.broadcast %510 : vector<1x64xf32> to vector<8x64xf32>
    %532 = arith.mulf %530, %531 : vector<8x64xf32>
    %533 = vector.broadcast %512 : vector<1x64xf32> to vector<8x64xf32>
    %534 = arith.addf %532, %533 : vector<8x64xf32>
    %c0_237 = arith.constant 0 : index
    %c0_238 = arith.constant 0 : index
    %c0_239 = arith.constant 0 : index
    %535 = vector.load %arg29[%c0_237, %c0_238, %c0_239] : memref<2x64x256xf32, #tpu.memory_space<vmem>>, vector<1x64x256xf32>
    %536 = vector.shape_cast %535 : vector<1x64x256xf32> to vector<64x256xf32>
    %cst_240 = arith.constant dense<0.000000e+00> : vector<8x256xf32>
    %537 = tpu.matmul %534, %536, %cst_240 {dimension_numbers = #tpu.dot_dimension_numbers<[1], [0], [0], [1], [0, 0, 1, 1], [], []>} : vector<8x64xf32>, vector<64x256xf32>, vector<8x256xf32> -> vector<8x256xf32>
    %c0_241 = arith.constant 0 : index
    %c0_242 = arith.constant 0 : index
    %c0_243 = arith.constant 0 : index
    %538 = vector.load %arg30[%c0_241, %c0_242, %c0_243] : memref<2x1x256xf32, #tpu.memory_space<vmem>>, vector<1x1x256xf32>
    %539 = vector.shape_cast %538 : vector<1x1x256xf32> to vector<1x256xf32>
    %540 = vector.broadcast %539 : vector<1x256xf32> to vector<8x256xf32>
    %541 = arith.addf %537, %540 : vector<8x256xf32>
    %cst_244 = arith.constant 5.000000e-01 : f32
    %542 = vector.broadcast %cst_244 : f32 to vector<8x256xf32>
    %543 = arith.mulf %542, %541 : vector<8x256xf32>
    %cst_245 = arith.constant 4.471500e-02 : f32
    %544 = vector.broadcast %cst_245 : f32 to vector<8x256xf32>
    %545 = arith.mulf %544, %541 : vector<8x256xf32>
    %546 = arith.mulf %545, %541 : vector<8x256xf32>
    %547 = arith.mulf %546, %541 : vector<8x256xf32>
    %548 = arith.addf %541, %547 : vector<8x256xf32>
    %cst_246 = arith.constant 0.797884583 : f32
    %549 = vector.broadcast %cst_246 : f32 to vector<8x256xf32>
    %550 = arith.mulf %549, %548 : vector<8x256xf32>
    %551 = math.tanh %550 : vector<8x256xf32>
    %cst_247 = arith.constant 1.000000e+00 : f32
    %552 = vector.broadcast %cst_247 : f32 to vector<8x256xf32>
    %553 = arith.addf %552, %551 : vector<8x256xf32>
    %554 = arith.mulf %543, %553 : vector<8x256xf32>
    %c0_248 = arith.constant 0 : index
    %c0_249 = arith.constant 0 : index
    %c0_250 = arith.constant 0 : index
    %555 = vector.load %arg31[%c0_248, %c0_249, %c0_250] : memref<2x256x64xf32, #tpu.memory_space<vmem>>, vector<1x256x64xf32>
    %556 = vector.shape_cast %555 : vector<1x256x64xf32> to vector<256x64xf32>
    %cst_251 = arith.constant dense<0.000000e+00> : vector<8x64xf32>
    %557 = tpu.matmul %554, %556, %cst_251 {dimension_numbers = #tpu.dot_dimension_numbers<[1], [0], [0], [1], [0, 0, 1, 1], [], []>} : vector<8x256xf32>, vector<256x64xf32>, vector<8x64xf32> -> vector<8x64xf32>
    %c0_252 = arith.constant 0 : index
    %c0_253 = arith.constant 0 : index
    %c0_254 = arith.constant 0 : index
    %558 = vector.load %arg32[%c0_252, %c0_253, %c0_254] : memref<2x1x64xf32, #tpu.memory_space<vmem>>, vector<1x1x64xf32>
    %559 = vector.shape_cast %558 : vector<1x1x64xf32> to vector<1x64xf32>
    %560 = vector.broadcast %559 : vector<1x64xf32> to vector<8x64xf32>
    %561 = arith.addf %557, %560 : vector<8x64xf32>
    %562 = arith.addf %508, %561 : vector<8x64xf32>
    %c1_255 = arith.constant 1 : index
    %c0_256 = arith.constant 0 : index
    %c0_257 = arith.constant 0 : index
    %563 = vector.load %arg27[%c1_255, %c0_256, %c0_257] : memref<2x1x64xf32, #tpu.memory_space<vmem>>, vector<1x1x64xf32>
    %564 = vector.shape_cast %563 : vector<1x1x64xf32> to vector<1x64xf32>
    %c1_258 = arith.constant 1 : index
    %c0_259 = arith.constant 0 : index
    %c0_260 = arith.constant 0 : index
    %565 = vector.load %arg28[%c1_258, %c0_259, %c0_260] : memref<2x1x64xf32, #tpu.memory_space<vmem>>, vector<1x1x64xf32>
    %566 = vector.shape_cast %565 : vector<1x1x64xf32> to vector<1x64xf32>
    %cst_261 = arith.constant dense<0.000000e+00> : vector<8xf32>
    %567 = vector.multi_reduction <add>, %562, %cst_261 [1] : vector<8x64xf32> to vector<8xf32>
    %568 = vector.shape_cast %567 : vector<8xf32> to vector<8x1xf32>
    %cst_262 = arith.constant 6.400000e+01 : f32
    %569 = vector.broadcast %cst_262 : f32 to vector<8x1xf32>
    %570 = arith.divf %568, %569 : vector<8x1xf32>
    %571 = vector.broadcast %570 : vector<8x1xf32> to vector<8x64xf32>
    %572 = arith.subf %562, %571 : vector<8x64xf32>
    %573 = arith.mulf %572, %572 : vector<8x64xf32>
    %cst_263 = arith.constant dense<0.000000e+00> : vector<8xf32>
    %574 = vector.multi_reduction <add>, %573, %cst_263 [1] : vector<8x64xf32> to vector<8xf32>
    %575 = vector.shape_cast %574 : vector<8xf32> to vector<8x1xf32>
    %cst_264 = arith.constant 6.400000e+01 : f32
    %576 = vector.broadcast %cst_264 : f32 to vector<8x1xf32>
    %577 = arith.divf %575, %576 : vector<8x1xf32>
    %578 = vector.broadcast %570 : vector<8x1xf32> to vector<8x64xf32>
    %579 = arith.subf %562, %578 : vector<8x64xf32>
    %cst_265 = arith.constant 9.99999974E-6 : f32
    %580 = vector.broadcast %cst_265 : f32 to vector<8x1xf32>
    %581 = arith.addf %577, %580 : vector<8x1xf32>
    %582 = math.rsqrt %581 : vector<8x1xf32>
    %583 = vector.broadcast %582 : vector<8x1xf32> to vector<8x64xf32>
    %584 = arith.mulf %579, %583 : vector<8x64xf32>
    %585 = vector.broadcast %564 : vector<1x64xf32> to vector<8x64xf32>
    %586 = arith.mulf %584, %585 : vector<8x64xf32>
    %587 = vector.broadcast %566 : vector<1x64xf32> to vector<8x64xf32>
    %588 = arith.addf %586, %587 : vector<8x64xf32>
    %c1_266 = arith.constant 1 : index
    %c0_267 = arith.constant 0 : index
    %c0_268 = arith.constant 0 : index
    %589 = vector.load %arg23[%c1_266, %c0_267, %c0_268] : memref<2x64x192xf32, #tpu.memory_space<vmem>>, vector<1x64x192xf32>
    %590 = vector.shape_cast %589 : vector<1x64x192xf32> to vector<64x192xf32>
    %cst_269 = arith.constant dense<0.000000e+00> : vector<8x192xf32>
    %591 = tpu.matmul %588, %590, %cst_269 {dimension_numbers = #tpu.dot_dimension_numbers<[1], [0], [0], [1], [0, 0, 1, 1], [], []>} : vector<8x64xf32>, vector<64x192xf32>, vector<8x192xf32> -> vector<8x192xf32>
    %c1_270 = arith.constant 1 : index
    %c0_271 = arith.constant 0 : index
    %c0_272 = arith.constant 0 : index
    %592 = vector.load %arg24[%c1_270, %c0_271, %c0_272] : memref<2x1x192xf32, #tpu.memory_space<vmem>>, vector<1x1x192xf32>
    %593 = vector.shape_cast %592 : vector<1x1x192xf32> to vector<1x192xf32>
    %594 = vector.broadcast %593 : vector<1x192xf32> to vector<8x192xf32>
    %595 = arith.addf %591, %594 : vector<8x192xf32>
    %596 = vector.extract_strided_slice %595 {offsets = [0, 0], sizes = [8, 16], strides = [1, 1]} : vector<8x192xf32> to vector<8x16xf32>
    %597 = vector.extract_strided_slice %595 {offsets = [0, 64], sizes = [8, 16], strides = [1, 1]} : vector<8x192xf32> to vector<8x16xf32>
    %598 = vector.extract_strided_slice %595 {offsets = [0, 128], sizes = [8, 16], strides = [1, 1]} : vector<8x192xf32> to vector<8x16xf32>
    %599 = tpu.transpose %597, [1, 0] : vector<8x16xf32> -> vector<16x8xf32>
    %cst_273 = arith.constant dense<0.000000e+00> : vector<8x8xf32>
    %600 = tpu.matmul %596, %599, %cst_273 {dimension_numbers = #tpu.dot_dimension_numbers<[1], [0], [0], [1], [0, 0, 1, 1], [], []>} : vector<8x16xf32>, vector<16x8xf32>, vector<8x8xf32> -> vector<8x8xf32>
    %cst_274 = arith.constant 2.500000e-01 : f32
    %601 = vector.broadcast %cst_274 : f32 to vector<8x8xf32>
    %602 = arith.mulf %600, %601 : vector<8x8xf32>
    %603 = arith.addf %602, %390 : vector<8x8xf32>
    %cst_275 = arith.constant dense<0xFF800000> : vector<8xf32>
    %604 = vector.multi_reduction <maximumf>, %603, %cst_275 [1] : vector<8x8xf32> to vector<8xf32>
    %605 = vector.shape_cast %604 : vector<8xf32> to vector<8x1xf32>
    %606 = vector.broadcast %605 : vector<8x1xf32> to vector<8x8xf32>
    %607 = arith.subf %603, %606 : vector<8x8xf32>
    %608 = math.exp %607 : vector<8x8xf32>
    %cst_276 = arith.constant dense<0.000000e+00> : vector<8xf32>
    %609 = vector.multi_reduction <add>, %608, %cst_276 [1] : vector<8x8xf32> to vector<8xf32>
    %610 = vector.shape_cast %609 : vector<8xf32> to vector<8x1xf32>
    %611 = tpu.reciprocal %610 {approx = true} : vector<8x1xf32> -> vector<8x1xf32>
    %612 = vector.broadcast %611 : vector<8x1xf32> to vector<8x8xf32>
    %613 = arith.mulf %608, %612 : vector<8x8xf32>
    %cst_277 = arith.constant dense<0.000000e+00> : vector<8x16xf32>
    %614 = tpu.matmul %613, %598, %cst_277 {dimension_numbers = #tpu.dot_dimension_numbers<[1], [0], [0], [1], [0, 0, 1, 1], [], []>} : vector<8x8xf32>, vector<8x16xf32>, vector<8x16xf32> -> vector<8x16xf32>
    %615 = vector.extract_strided_slice %595 {offsets = [0, 16], sizes = [8, 16], strides = [1, 1]} : vector<8x192xf32> to vector<8x16xf32>
    %616 = vector.extract_strided_slice %595 {offsets = [0, 80], sizes = [8, 16], strides = [1, 1]} : vector<8x192xf32> to vector<8x16xf32>
    %617 = vector.extract_strided_slice %595 {offsets = [0, 144], sizes = [8, 16], strides = [1, 1]} : vector<8x192xf32> to vector<8x16xf32>
    %618 = tpu.transpose %616, [1, 0] : vector<8x16xf32> -> vector<16x8xf32>
    %cst_278 = arith.constant dense<0.000000e+00> : vector<8x8xf32>
    %619 = tpu.matmul %615, %618, %cst_278 {dimension_numbers = #tpu.dot_dimension_numbers<[1], [0], [0], [1], [0, 0, 1, 1], [], []>} : vector<8x16xf32>, vector<16x8xf32>, vector<8x8xf32> -> vector<8x8xf32>
    %cst_279 = arith.constant 2.500000e-01 : f32
    %620 = vector.broadcast %cst_279 : f32 to vector<8x8xf32>
    %621 = arith.mulf %619, %620 : vector<8x8xf32>
    %622 = arith.addf %621, %390 : vector<8x8xf32>
    %cst_280 = arith.constant dense<0xFF800000> : vector<8xf32>
    %623 = vector.multi_reduction <maximumf>, %622, %cst_280 [1] : vector<8x8xf32> to vector<8xf32>
    %624 = vector.shape_cast %623 : vector<8xf32> to vector<8x1xf32>
    %625 = vector.broadcast %624 : vector<8x1xf32> to vector<8x8xf32>
    %626 = arith.subf %622, %625 : vector<8x8xf32>
    %627 = math.exp %626 : vector<8x8xf32>
    %cst_281 = arith.constant dense<0.000000e+00> : vector<8xf32>
    %628 = vector.multi_reduction <add>, %627, %cst_281 [1] : vector<8x8xf32> to vector<8xf32>
    %629 = vector.shape_cast %628 : vector<8xf32> to vector<8x1xf32>
    %630 = tpu.reciprocal %629 {approx = true} : vector<8x1xf32> -> vector<8x1xf32>
    %631 = vector.broadcast %630 : vector<8x1xf32> to vector<8x8xf32>
    %632 = arith.mulf %627, %631 : vector<8x8xf32>
    %cst_282 = arith.constant dense<0.000000e+00> : vector<8x16xf32>
    %633 = tpu.matmul %632, %617, %cst_282 {dimension_numbers = #tpu.dot_dimension_numbers<[1], [0], [0], [1], [0, 0, 1, 1], [], []>} : vector<8x8xf32>, vector<8x16xf32>, vector<8x16xf32> -> vector<8x16xf32>
    %634 = vector.extract_strided_slice %595 {offsets = [0, 32], sizes = [8, 16], strides = [1, 1]} : vector<8x192xf32> to vector<8x16xf32>
    %635 = vector.extract_strided_slice %595 {offsets = [0, 96], sizes = [8, 16], strides = [1, 1]} : vector<8x192xf32> to vector<8x16xf32>
    %636 = vector.extract_strided_slice %595 {offsets = [0, 160], sizes = [8, 16], strides = [1, 1]} : vector<8x192xf32> to vector<8x16xf32>
    %637 = tpu.transpose %635, [1, 0] : vector<8x16xf32> -> vector<16x8xf32>
    %cst_283 = arith.constant dense<0.000000e+00> : vector<8x8xf32>
    %638 = tpu.matmul %634, %637, %cst_283 {dimension_numbers = #tpu.dot_dimension_numbers<[1], [0], [0], [1], [0, 0, 1, 1], [], []>} : vector<8x16xf32>, vector<16x8xf32>, vector<8x8xf32> -> vector<8x8xf32>
    %cst_284 = arith.constant 2.500000e-01 : f32
    %639 = vector.broadcast %cst_284 : f32 to vector<8x8xf32>
    %640 = arith.mulf %638, %639 : vector<8x8xf32>
    %641 = arith.addf %640, %390 : vector<8x8xf32>
    %cst_285 = arith.constant dense<0xFF800000> : vector<8xf32>
    %642 = vector.multi_reduction <maximumf>, %641, %cst_285 [1] : vector<8x8xf32> to vector<8xf32>
    %643 = vector.shape_cast %642 : vector<8xf32> to vector<8x1xf32>
    %644 = vector.broadcast %643 : vector<8x1xf32> to vector<8x8xf32>
    %645 = arith.subf %641, %644 : vector<8x8xf32>
    %646 = math.exp %645 : vector<8x8xf32>
    %cst_286 = arith.constant dense<0.000000e+00> : vector<8xf32>
    %647 = vector.multi_reduction <add>, %646, %cst_286 [1] : vector<8x8xf32> to vector<8xf32>
    %648 = vector.shape_cast %647 : vector<8xf32> to vector<8x1xf32>
    %649 = tpu.reciprocal %648 {approx = true} : vector<8x1xf32> -> vector<8x1xf32>
    %650 = vector.broadcast %649 : vector<8x1xf32> to vector<8x8xf32>
    %651 = arith.mulf %646, %650 : vector<8x8xf32>
    %cst_287 = arith.constant dense<0.000000e+00> : vector<8x16xf32>
    %652 = tpu.matmul %651, %636, %cst_287 {dimension_numbers = #tpu.dot_dimension_numbers<[1], [0], [0], [1], [0, 0, 1, 1], [], []>} : vector<8x8xf32>, vector<8x16xf32>, vector<8x16xf32> -> vector<8x16xf32>
    %653 = vector.extract_strided_slice %595 {offsets = [0, 48], sizes = [8, 16], strides = [1, 1]} : vector<8x192xf32> to vector<8x16xf32>
    %654 = vector.extract_strided_slice %595 {offsets = [0, 112], sizes = [8, 16], strides = [1, 1]} : vector<8x192xf32> to vector<8x16xf32>
    %655 = vector.extract_strided_slice %595 {offsets = [0, 176], sizes = [8, 16], strides = [1, 1]} : vector<8x192xf32> to vector<8x16xf32>
    %656 = tpu.transpose %654, [1, 0] : vector<8x16xf32> -> vector<16x8xf32>
    %cst_288 = arith.constant dense<0.000000e+00> : vector<8x8xf32>
    %657 = tpu.matmul %653, %656, %cst_288 {dimension_numbers = #tpu.dot_dimension_numbers<[1], [0], [0], [1], [0, 0, 1, 1], [], []>} : vector<8x16xf32>, vector<16x8xf32>, vector<8x8xf32> -> vector<8x8xf32>
    %cst_289 = arith.constant 2.500000e-01 : f32
    %658 = vector.broadcast %cst_289 : f32 to vector<8x8xf32>
    %659 = arith.mulf %657, %658 : vector<8x8xf32>
    %660 = arith.addf %659, %390 : vector<8x8xf32>
    %cst_290 = arith.constant dense<0xFF800000> : vector<8xf32>
    %661 = vector.multi_reduction <maximumf>, %660, %cst_290 [1] : vector<8x8xf32> to vector<8xf32>
    %662 = vector.shape_cast %661 : vector<8xf32> to vector<8x1xf32>
    %663 = vector.broadcast %662 : vector<8x1xf32> to vector<8x8xf32>
    %664 = arith.subf %660, %663 : vector<8x8xf32>
    %665 = math.exp %664 : vector<8x8xf32>
    %cst_291 = arith.constant dense<0.000000e+00> : vector<8xf32>
    %666 = vector.multi_reduction <add>, %665, %cst_291 [1] : vector<8x8xf32> to vector<8xf32>
    %667 = vector.shape_cast %666 : vector<8xf32> to vector<8x1xf32>
    %668 = tpu.reciprocal %667 {approx = true} : vector<8x1xf32> -> vector<8x1xf32>
    %669 = vector.broadcast %668 : vector<8x1xf32> to vector<8x8xf32>
    %670 = arith.mulf %665, %669 : vector<8x8xf32>
    %cst_292 = arith.constant dense<0.000000e+00> : vector<8x16xf32>
    %671 = tpu.matmul %670, %655, %cst_292 {dimension_numbers = #tpu.dot_dimension_numbers<[1], [0], [0], [1], [0, 0, 1, 1], [], []>} : vector<8x8xf32>, vector<8x16xf32>, vector<8x16xf32> -> vector<8x16xf32>
    %672 = tpu.concatenate %614, %633, %652, %671 in 1 : vector<8x16xf32>, vector<8x16xf32>, vector<8x16xf32>, vector<8x16xf32> -> vector<8x64xf32>
    %c1_293 = arith.constant 1 : index
    %c0_294 = arith.constant 0 : index
    %c0_295 = arith.constant 0 : index
    %673 = vector.load %arg25[%c1_293, %c0_294, %c0_295] : memref<2x64x64xf32, #tpu.memory_space<vmem>>, vector<1x64x64xf32>
    %674 = vector.shape_cast %673 : vector<1x64x64xf32> to vector<64x64xf32>
    %cst_296 = arith.constant dense<0.000000e+00> : vector<8x64xf32>
    %675 = tpu.matmul %672, %674, %cst_296 {dimension_numbers = #tpu.dot_dimension_numbers<[1], [0], [0], [1], [0, 0, 1, 1], [], []>} : vector<8x64xf32>, vector<64x64xf32>, vector<8x64xf32> -> vector<8x64xf32>
    %c1_297 = arith.constant 1 : index
    %c0_298 = arith.constant 0 : index
    %c0_299 = arith.constant 0 : index
    %676 = vector.load %arg26[%c1_297, %c0_298, %c0_299] : memref<2x1x64xf32, #tpu.memory_space<vmem>>, vector<1x1x64xf32>
    %677 = vector.shape_cast %676 : vector<1x1x64xf32> to vector<1x64xf32>
    %678 = vector.broadcast %677 : vector<1x64xf32> to vector<8x64xf32>
    %679 = arith.addf %675, %678 : vector<8x64xf32>
    %680 = arith.addf %562, %679 : vector<8x64xf32>
    %c1_300 = arith.constant 1 : index
    %c0_301 = arith.constant 0 : index
    %c0_302 = arith.constant 0 : index
    %681 = vector.load %arg33[%c1_300, %c0_301, %c0_302] : memref<2x1x64xf32, #tpu.memory_space<vmem>>, vector<1x1x64xf32>
    %682 = vector.shape_cast %681 : vector<1x1x64xf32> to vector<1x64xf32>
    %c1_303 = arith.constant 1 : index
    %c0_304 = arith.constant 0 : index
    %c0_305 = arith.constant 0 : index
    %683 = vector.load %arg34[%c1_303, %c0_304, %c0_305] : memref<2x1x64xf32, #tpu.memory_space<vmem>>, vector<1x1x64xf32>
    %684 = vector.shape_cast %683 : vector<1x1x64xf32> to vector<1x64xf32>
    %cst_306 = arith.constant dense<0.000000e+00> : vector<8xf32>
    %685 = vector.multi_reduction <add>, %680, %cst_306 [1] : vector<8x64xf32> to vector<8xf32>
    %686 = vector.shape_cast %685 : vector<8xf32> to vector<8x1xf32>
    %cst_307 = arith.constant 6.400000e+01 : f32
    %687 = vector.broadcast %cst_307 : f32 to vector<8x1xf32>
    %688 = arith.divf %686, %687 : vector<8x1xf32>
    %689 = vector.broadcast %688 : vector<8x1xf32> to vector<8x64xf32>
    %690 = arith.subf %680, %689 : vector<8x64xf32>
    %691 = arith.mulf %690, %690 : vector<8x64xf32>
    %cst_308 = arith.constant dense<0.000000e+00> : vector<8xf32>
    %692 = vector.multi_reduction <add>, %691, %cst_308 [1] : vector<8x64xf32> to vector<8xf32>
    %693 = vector.shape_cast %692 : vector<8xf32> to vector<8x1xf32>
    %cst_309 = arith.constant 6.400000e+01 : f32
    %694 = vector.broadcast %cst_309 : f32 to vector<8x1xf32>
    %695 = arith.divf %693, %694 : vector<8x1xf32>
    %696 = vector.broadcast %688 : vector<8x1xf32> to vector<8x64xf32>
    %697 = arith.subf %680, %696 : vector<8x64xf32>
    %cst_310 = arith.constant 9.99999974E-6 : f32
    %698 = vector.broadcast %cst_310 : f32 to vector<8x1xf32>
    %699 = arith.addf %695, %698 : vector<8x1xf32>
    %700 = math.rsqrt %699 : vector<8x1xf32>
    %701 = vector.broadcast %700 : vector<8x1xf32> to vector<8x64xf32>
    %702 = arith.mulf %697, %701 : vector<8x64xf32>
    %703 = vector.broadcast %682 : vector<1x64xf32> to vector<8x64xf32>
    %704 = arith.mulf %702, %703 : vector<8x64xf32>
    %705 = vector.broadcast %684 : vector<1x64xf32> to vector<8x64xf32>
    %706 = arith.addf %704, %705 : vector<8x64xf32>
    %c1_311 = arith.constant 1 : index
    %c0_312 = arith.constant 0 : index
    %c0_313 = arith.constant 0 : index
    %707 = vector.load %arg29[%c1_311, %c0_312, %c0_313] : memref<2x64x256xf32, #tpu.memory_space<vmem>>, vector<1x64x256xf32>
    %708 = vector.shape_cast %707 : vector<1x64x256xf32> to vector<64x256xf32>
    %cst_314 = arith.constant dense<0.000000e+00> : vector<8x256xf32>
    %709 = tpu.matmul %706, %708, %cst_314 {dimension_numbers = #tpu.dot_dimension_numbers<[1], [0], [0], [1], [0, 0, 1, 1], [], []>} : vector<8x64xf32>, vector<64x256xf32>, vector<8x256xf32> -> vector<8x256xf32>
    %c1_315 = arith.constant 1 : index
    %c0_316 = arith.constant 0 : index
    %c0_317 = arith.constant 0 : index
    %710 = vector.load %arg30[%c1_315, %c0_316, %c0_317] : memref<2x1x256xf32, #tpu.memory_space<vmem>>, vector<1x1x256xf32>
    %711 = vector.shape_cast %710 : vector<1x1x256xf32> to vector<1x256xf32>
    %712 = vector.broadcast %711 : vector<1x256xf32> to vector<8x256xf32>
    %713 = arith.addf %709, %712 : vector<8x256xf32>
    %cst_318 = arith.constant 5.000000e-01 : f32
    %714 = vector.broadcast %cst_318 : f32 to vector<8x256xf32>
    %715 = arith.mulf %714, %713 : vector<8x256xf32>
    %cst_319 = arith.constant 4.471500e-02 : f32
    %716 = vector.broadcast %cst_319 : f32 to vector<8x256xf32>
    %717 = arith.mulf %716, %713 : vector<8x256xf32>
    %718 = arith.mulf %717, %713 : vector<8x256xf32>
    %719 = arith.mulf %718, %713 : vector<8x256xf32>
    %720 = arith.addf %713, %719 : vector<8x256xf32>
    %cst_320 = arith.constant 0.797884583 : f32
    %721 = vector.broadcast %cst_320 : f32 to vector<8x256xf32>
    %722 = arith.mulf %721, %720 : vector<8x256xf32>
    %723 = math.tanh %722 : vector<8x256xf32>
    %cst_321 = arith.constant 1.000000e+00 : f32
    %724 = vector.broadcast %cst_321 : f32 to vector<8x256xf32>
    %725 = arith.addf %724, %723 : vector<8x256xf32>
    %726 = arith.mulf %715, %725 : vector<8x256xf32>
    %c1_322 = arith.constant 1 : index
    %c0_323 = arith.constant 0 : index
    %c0_324 = arith.constant 0 : index
    %727 = vector.load %arg31[%c1_322, %c0_323, %c0_324] : memref<2x256x64xf32, #tpu.memory_space<vmem>>, vector<1x256x64xf32>
    %728 = vector.shape_cast %727 : vector<1x256x64xf32> to vector<256x64xf32>
    %cst_325 = arith.constant dense<0.000000e+00> : vector<8x64xf32>
    %729 = tpu.matmul %726, %728, %cst_325 {dimension_numbers = #tpu.dot_dimension_numbers<[1], [0], [0], [1], [0, 0, 1, 1], [], []>} : vector<8x256xf32>, vector<256x64xf32>, vector<8x64xf32> -> vector<8x64xf32>
    %c1_326 = arith.constant 1 : index
    %c0_327 = arith.constant 0 : index
    %c0_328 = arith.constant 0 : index
    %730 = vector.load %arg32[%c1_326, %c0_327, %c0_328] : memref<2x1x64xf32, #tpu.memory_space<vmem>>, vector<1x1x64xf32>
    %731 = vector.shape_cast %730 : vector<1x1x64xf32> to vector<1x64xf32>
    %732 = vector.broadcast %731 : vector<1x64xf32> to vector<8x64xf32>
    %733 = arith.addf %729, %732 : vector<8x64xf32>
    %734 = arith.addf %680, %733 : vector<8x64xf32>
    %c0_329 = arith.constant 0 : index
    %c0_330 = arith.constant 0 : index
    %735 = vector.load %arg35[%c0_329, %c0_330] : memref<1x64xf32, #tpu.memory_space<vmem>>, vector<1x64xf32>
    %c0_331 = arith.constant 0 : index
    %c0_332 = arith.constant 0 : index
    %736 = vector.load %arg36[%c0_331, %c0_332] : memref<1x64xf32, #tpu.memory_space<vmem>>, vector<1x64xf32>
    %cst_333 = arith.constant dense<0.000000e+00> : vector<8xf32>
    %737 = vector.multi_reduction <add>, %734, %cst_333 [1] : vector<8x64xf32> to vector<8xf32>
    %738 = vector.shape_cast %737 : vector<8xf32> to vector<8x1xf32>
    %cst_334 = arith.constant 6.400000e+01 : f32
    %739 = vector.broadcast %cst_334 : f32 to vector<8x1xf32>
    %740 = arith.divf %738, %739 : vector<8x1xf32>
    %741 = vector.broadcast %740 : vector<8x1xf32> to vector<8x64xf32>
    %742 = arith.subf %734, %741 : vector<8x64xf32>
    %743 = arith.mulf %742, %742 : vector<8x64xf32>
    %cst_335 = arith.constant dense<0.000000e+00> : vector<8xf32>
    %744 = vector.multi_reduction <add>, %743, %cst_335 [1] : vector<8x64xf32> to vector<8xf32>
    %745 = vector.shape_cast %744 : vector<8xf32> to vector<8x1xf32>
    %cst_336 = arith.constant 6.400000e+01 : f32
    %746 = vector.broadcast %cst_336 : f32 to vector<8x1xf32>
    %747 = arith.divf %745, %746 : vector<8x1xf32>
    %748 = vector.broadcast %740 : vector<8x1xf32> to vector<8x64xf32>
    %749 = arith.subf %734, %748 : vector<8x64xf32>
    %cst_337 = arith.constant 9.99999974E-6 : f32
    %750 = vector.broadcast %cst_337 : f32 to vector<8x1xf32>
    %751 = arith.addf %747, %750 : vector<8x1xf32>
    %752 = math.rsqrt %751 : vector<8x1xf32>
    %753 = vector.broadcast %752 : vector<8x1xf32> to vector<8x64xf32>
    %754 = arith.mulf %749, %753 : vector<8x64xf32>
    %755 = vector.broadcast %735 : vector<1x64xf32> to vector<8x64xf32>
    %756 = arith.mulf %754, %755 : vector<8x64xf32>
    %757 = vector.broadcast %736 : vector<1x64xf32> to vector<8x64xf32>
    %758 = arith.addf %756, %757 : vector<8x64xf32>
    %c0_338 = arith.constant 0 : index
    %c0_339 = arith.constant 0 : index
    %759 = vector.load %arg37[%c0_338, %c0_339] : memref<64x128xf32, #tpu.memory_space<vmem>>, vector<64x128xf32>
    %cst_340 = arith.constant dense<0.000000e+00> : vector<8x128xf32>
    %760 = tpu.matmul %758, %759, %cst_340 {dimension_numbers = #tpu.dot_dimension_numbers<[1], [0], [0], [1], [0, 0, 1, 1], [], []>} : vector<8x64xf32>, vector<64x128xf32>, vector<8x128xf32> -> vector<8x128xf32>
    %c0_341 = arith.constant 0 : index
    %c0_342 = arith.constant 0 : index
    %761 = vector.load %arg38[%c0_341, %c0_342] : memref<1x128xf32, #tpu.memory_space<vmem>>, vector<1x128xf32>
    %762 = vector.broadcast %761 : vector<1x128xf32> to vector<8x128xf32>
    %763 = arith.addf %760, %762 : vector<8x128xf32>
    %c0_343 = arith.constant 0 : index
    %c0_344 = arith.constant 0 : index
    %c0_345 = arith.constant 0 : index
    %764 = vector.load %arg40[%c0_343, %c0_344, %c0_345] : memref<1x8x128xf32, #tpu.memory_space<vmem>>, vector<1x8x128xf32>
    %765 = vector.shape_cast %764 : vector<1x8x128xf32> to vector<8x128xf32>
    %766 = vector.shape_cast %763 : vector<8x128xf32> to vector<1x8x128xf32>
    tpu.vector_store %arg40[%c0_343, %c0_344, %c0_345], %766 {strides = array<i32>} : memref<1x8x128xf32, #tpu.memory_space<vmem>>, vector<1x8x128xf32>,
    %cst_346 = arith.constant dense<0xFF800000> : vector<8xf32>
    %767 = vector.multi_reduction <maximumf>, %763, %cst_346 [1] : vector<8x128xf32> to vector<8xf32>
    %768 = vector.shape_cast %767 : vector<8xf32> to vector<8x1xf32>
    %769 = vector.broadcast %768 : vector<8x1xf32> to vector<8x128xf32>
    %770 = arith.subf %763, %769 : vector<8x128xf32>
    %771 = math.exp %770 : vector<8x128xf32>
    %cst_347 = arith.constant dense<0.000000e+00> : vector<8xf32>
    %772 = vector.multi_reduction <add>, %771, %cst_347 [1] : vector<8x128xf32> to vector<8xf32>
    %773 = vector.shape_cast %772 : vector<8xf32> to vector<8x1xf32>
    %774 = math.log %773 : vector<8x1xf32>
    %775 = vector.broadcast %774 : vector<8x1xf32> to vector<8x128xf32>
    %776 = arith.subf %770, %775 : vector<8x128xf32>
    %c0_348 = arith.constant 0 : index
    %c0_349 = arith.constant 0 : index
    %c0_350 = arith.constant 0 : index
    %777 = vector.load %arg41[%c0_348, %c0_349, %c0_350] : memref<1x8x128xf32, #tpu.memory_space<vmem>>, vector<1x8x128xf32>
    %778 = vector.shape_cast %777 : vector<1x8x128xf32> to vector<8x128xf32>
    %779 = vector.shape_cast %776 : vector<8x128xf32> to vector<1x8x128xf32>
    tpu.vector_store %arg41[%c0_348, %c0_349, %c0_350], %779 {strides = array<i32>} : memref<1x8x128xf32, #tpu.memory_space<vmem>>, vector<1x8x128xf32>,
    return
  }
  func.func @transform_0(%arg0: i32) -> (i32, i32, i32) {
    %c0_i32 = arith.constant 0 : i32
    %c0_i32_0 = arith.constant 0 : i32
    %c0_i32_1 = arith.constant 0 : i32
    return %arg0, %c0_i32, %c0_i32_0 : i32, i32, i32
  }
  func.func @transform_1(%arg0: i32) -> (i32, i32) {
    %c0_i32 = arith.constant 0 : i32
    %c0_i32_0 = arith.constant 0 : i32
    %c0_i32_1 = arith.constant 0 : i32
    return %c0_i32, %c0_i32_0 : i32, i32
  }
  func.func @transform_2(%arg0: i32) -> (i32, i32) {
    %c0_i32 = arith.constant 0 : i32
    %c0_i32_0 = arith.constant 0 : i32
    %c0_i32_1 = arith.constant 0 : i32
    return %c0_i32, %c0_i32_0 : i32, i32
  }
  func.func @transform_3(%arg0: i32) -> (i32, i32) {
    %c0_i32 = arith.constant 0 : i32
    %c0_i32_0 = arith.constant 0 : i32
    %c0_i32_1 = arith.constant 0 : i32
    return %c0_i32, %c0_i32_0 : i32, i32
  }
  func.func @transform_4(%arg0: i32) -> (i32, i32) {
    %c0_i32 = arith.constant 0 : i32
    %c0_i32_0 = arith.constant 0 : i32
    %c0_i32_1 = arith.constant 0 : i32
    return %c0_i32, %c0_i32_0 : i32, i32
  }
  func.func @transform_5(%arg0: i32) -> (i32, i32) {
    %c0_i32 = arith.constant 0 : i32
    %c0_i32_0 = arith.constant 0 : i32
    %c0_i32_1 = arith.constant 0 : i32
    return %c0_i32, %c0_i32_0 : i32, i32
  }
  func.func @transform_6(%arg0: i32) -> (i32, i32, i32) {
    %c0_i32 = arith.constant 0 : i32
    %c0_i32_0 = arith.constant 0 : i32
    %c0_i32_1 = arith.constant 0 : i32
    %c0_i32_2 = arith.constant 0 : i32
    return %c0_i32, %c0_i32_0, %c0_i32_1 : i32, i32, i32
  }
  func.func @transform_7(%arg0: i32) -> (i32, i32, i32) {
    %c0_i32 = arith.constant 0 : i32
    %c0_i32_0 = arith.constant 0 : i32
    %c0_i32_1 = arith.constant 0 : i32
    %c0_i32_2 = arith.constant 0 : i32
    return %c0_i32, %c0_i32_0, %c0_i32_1 : i32, i32, i32
  }
  func.func @transform_8(%arg0: i32) -> (i32, i32, i32) {
    %c0_i32 = arith.constant 0 : i32
    %c0_i32_0 = arith.constant 0 : i32
    %c0_i32_1 = arith.constant 0 : i32
    %c0_i32_2 = arith.constant 0 : i32
    return %c0_i32, %c0_i32_0, %c0_i32_1 : i32, i32, i32
  }
  func.func @transform_9(%arg0: i32) -> (i32, i32, i32) {
    %c0_i32 = arith.constant 0 : i32
    %c0_i32_0 = arith.constant 0 : i32
    %c0_i32_1 = arith.constant 0 : i32
    %c0_i32_2 = arith.constant 0 : i32
    return %c0_i32, %c0_i32_0, %c0_i32_1 : i32, i32, i32
  }
  func.func @transform_10(%arg0: i32) -> (i32, i32, i32) {
    %c0_i32 = arith.constant 0 : i32
    %c0_i32_0 = arith.constant 0 : i32
    %c0_i32_1 = arith.constant 0 : i32
    %c0_i32_2 = arith.constant 0 : i32
    return %c0_i32, %c0_i32_0, %c0_i32_1 : i32, i32, i32
  }
  func.func @transform_11(%arg0: i32) -> (i32, i32, i32) {
    %c0_i32 = arith.constant 0 : i32
    %c0_i32_0 = arith.constant 0 : i32
    %c0_i32_1 = arith.constant 0 : i32
    %c0_i32_2 = arith.constant 0 : i32
    return %c0_i32, %c0_i32_0, %c0_i32_1 : i32, i32, i32
  }
  func.func @transform_12(%arg0: i32) -> (i32, i32, i32) {
    %c0_i32 = arith.constant 0 : i32
    %c0_i32_0 = arith.constant 0 : i32
    %c0_i32_1 = arith.constant 0 : i32
    %c0_i32_2 = arith.constant 0 : i32
    return %c0_i32, %c0_i32_0, %c0_i32_1 : i32, i32, i32
  }
  func.func @transform_13(%arg0: i32) -> (i32, i32, i32) {
    %c0_i32 = arith.constant 0 : i32
    %c0_i32_0 = arith.constant 0 : i32
    %c0_i32_1 = arith.constant 0 : i32
    %c0_i32_2 = arith.constant 0 : i32
    return %c0_i32, %c0_i32_0, %c0_i32_1 : i32, i32, i32
  }
  func.func @transform_14(%arg0: i32) -> (i32, i32, i32) {
    %c0_i32 = arith.constant 0 : i32
    %c0_i32_0 = arith.constant 0 : i32
    %c0_i32_1 = arith.constant 0 : i32
    %c0_i32_2 = arith.constant 0 : i32
    return %c0_i32, %c0_i32_0, %c0_i32_1 : i32, i32, i32
  }
  func.func @transform_15(%arg0: i32) -> (i32, i32, i32) {
    %c0_i32 = arith.constant 0 : i32
    %c0_i32_0 = arith.constant 0 : i32
    %c0_i32_1 = arith.constant 0 : i32
    %c0_i32_2 = arith.constant 0 : i32
    return %c0_i32, %c0_i32_0, %c0_i32_1 : i32, i32, i32
  }
  func.func @transform_16(%arg0: i32) -> (i32, i32, i32) {
    %c0_i32 = arith.constant 0 : i32
    %c0_i32_0 = arith.constant 0 : i32
    %c0_i32_1 = arith.constant 0 : i32
    %c0_i32_2 = arith.constant 0 : i32
    return %c0_i32, %c0_i32_0, %c0_i32_1 : i32, i32, i32
  }
  func.func @transform_17(%arg0: i32) -> (i32, i32, i32) {
    %c0_i32 = arith.constant 0 : i32
    %c0_i32_0 = arith.constant 0 : i32
    %c0_i32_1 = arith.constant 0 : i32
    %c0_i32_2 = arith.constant 0 : i32
    return %c0_i32, %c0_i32_0, %c0_i32_1 : i32, i32, i32
  }
  func.func @transform_18(%arg0: i32) -> (i32, i32) {
    %c0_i32 = arith.constant 0 : i32
    %c0_i32_0 = arith.constant 0 : i32
    %c0_i32_1 = arith.constant 0 : i32
    return %c0_i32, %c0_i32_0 : i32, i32
  }
  func.func @transform_19(%arg0: i32) -> (i32, i32) {
    %c0_i32 = arith.constant 0 : i32
    %c0_i32_0 = arith.constant 0 : i32
    %c0_i32_1 = arith.constant 0 : i32
    return %c0_i32, %c0_i32_0 : i32, i32
  }
  func.func @transform_20(%arg0: i32) -> (i32, i32, i32) {
    %c0_i32 = arith.constant 0 : i32
    %c0_i32_0 = arith.constant 0 : i32
    %c0_i32_1 = arith.constant 0 : i32
    return %arg0, %c0_i32, %c0_i32_0 : i32, i32, i32
  }
  func.func @transform_21(%arg0: i32) -> (i32, i32, i32) {
    %c0_i32 = arith.constant 0 : i32
    %c0_i32_0 = arith.constant 0 : i32
    %c0_i32_1 = arith.constant 0 : i32
    return %arg0, %c0_i32, %c0_i32_0 : i32, i32, i32
  }
  func.func @transform_22(%arg0: i32) -> (i32, i32, i32) {
    %c0_i32 = arith.constant 0 : i32
    %c0_i32_0 = arith.constant 0 : i32
    %c0_i32_1 = arith.constant 0 : i32
    %c0_i32_2 = arith.constant 0 : i32
    return %c0_i32, %c0_i32_0, %c0_i32_1 : i32, i32, i32
  }
  func.func @transform_23(%arg0: i32) -> (i32, i32, i32) {
    %c0_i32 = arith.constant 0 : i32
    %c0_i32_0 = arith.constant 0 : i32
    %c0_i32_1 = arith.constant 0 : i32
    %c0_i32_2 = arith.constant 0 : i32
    return %c0_i32, %c0_i32_0, %c0_i32_1 : i32, i32, i32
  }
  func.func @transform_24(%arg0: i32) -> (i32, i32, i32) {
    %c0_i32 = arith.constant 0 : i32
    %c0_i32_0 = arith.constant 0 : i32
    %c0_i32_1 = arith.constant 0 : i32
    %c0_i32_2 = arith.constant 0 : i32
    return %c0_i32, %c0_i32_0, %c0_i32_1 : i32, i32, i32
  }
  func.func @transform_25(%arg0: i32) -> (i32, i32, i32) {
    %c0_i32 = arith.constant 0 : i32
    %c0_i32_0 = arith.constant 0 : i32
    %c0_i32_1 = arith.constant 0 : i32
    %c0_i32_2 = arith.constant 0 : i32
    return %c0_i32, %c0_i32_0, %c0_i32_1 : i32, i32, i32
  }
  func.func @transform_26(%arg0: i32) -> (i32, i32, i32) {
    %c0_i32 = arith.constant 0 : i32
    %c0_i32_0 = arith.constant 0 : i32
    %c0_i32_1 = arith.constant 0 : i32
    %c0_i32_2 = arith.constant 0 : i32
    return %c0_i32, %c0_i32_0, %c0_i32_1 : i32, i32, i32
  }
  func.func @transform_27(%arg0: i32) -> (i32, i32, i32) {
    %c0_i32 = arith.constant 0 : i32
    %c0_i32_0 = arith.constant 0 : i32
    %c0_i32_1 = arith.constant 0 : i32
    %c0_i32_2 = arith.constant 0 : i32
    return %c0_i32, %c0_i32_0, %c0_i32_1 : i32, i32, i32
  }
  func.func @transform_28(%arg0: i32) -> (i32, i32, i32) {
    %c0_i32 = arith.constant 0 : i32
    %c0_i32_0 = arith.constant 0 : i32
    %c0_i32_1 = arith.constant 0 : i32
    %c0_i32_2 = arith.constant 0 : i32
    return %c0_i32, %c0_i32_0, %c0_i32_1 : i32, i32, i32
  }
  func.func @transform_29(%arg0: i32) -> (i32, i32, i32) {
    %c0_i32 = arith.constant 0 : i32
    %c0_i32_0 = arith.constant 0 : i32
    %c0_i32_1 = arith.constant 0 : i32
    %c0_i32_2 = arith.constant 0 : i32
    return %c0_i32, %c0_i32_0, %c0_i32_1 : i32, i32, i32
  }
  func.func @transform_30(%arg0: i32) -> (i32, i32, i32) {
    %c0_i32 = arith.constant 0 : i32
    %c0_i32_0 = arith.constant 0 : i32
    %c0_i32_1 = arith.constant 0 : i32
    %c0_i32_2 = arith.constant 0 : i32
    return %c0_i32, %c0_i32_0, %c0_i32_1 : i32, i32, i32
  }
  func.func @transform_31(%arg0: i32) -> (i32, i32, i32) {
    %c0_i32 = arith.constant 0 : i32
    %c0_i32_0 = arith.constant 0 : i32
    %c0_i32_1 = arith.constant 0 : i32
    %c0_i32_2 = arith.constant 0 : i32
    return %c0_i32, %c0_i32_0, %c0_i32_1 : i32, i32, i32
  }
  func.func @transform_32(%arg0: i32) -> (i32, i32, i32) {
    %c0_i32 = arith.constant 0 : i32
    %c0_i32_0 = arith.constant 0 : i32
    %c0_i32_1 = arith.constant 0 : i32
    %c0_i32_2 = arith.constant 0 : i32
    return %c0_i32, %c0_i32_0, %c0_i32_1 : i32, i32, i32
  }
  func.func @transform_33(%arg0: i32) -> (i32, i32, i32) {
    %c0_i32 = arith.constant 0 : i32
    %c0_i32_0 = arith.constant 0 : i32
    %c0_i32_1 = arith.constant 0 : i32
    %c0_i32_2 = arith.constant 0 : i32
    return %c0_i32, %c0_i32_0, %c0_i32_1 : i32, i32, i32
  }
  func.func @transform_34(%arg0: i32) -> (i32, i32) {
    %c0_i32 = arith.constant 0 : i32
    %c0_i32_0 = arith.constant 0 : i32
    %c0_i32_1 = arith.constant 0 : i32
    return %c0_i32, %c0_i32_0 : i32, i32
  }
  func.func @transform_35(%arg0: i32) -> (i32, i32) {
    %c0_i32 = arith.constant 0 : i32
    %c0_i32_0 = arith.constant 0 : i32
    %c0_i32_1 = arith.constant 0 : i32
    return %c0_i32, %c0_i32_0 : i32, i32
  }
  func.func @transform_36(%arg0: i32) -> (i32, i32) {
    %c0_i32 = arith.constant 0 : i32
    %c0_i32_0 = arith.constant 0 : i32
    %c0_i32_1 = arith.constant 0 : i32
    return %c0_i32, %c0_i32_0 : i32, i32
  }
  func.func @transform_37(%arg0: i32) -> (i32, i32) {
    %c0_i32 = arith.constant 0 : i32
    %c0_i32_0 = arith.constant 0 : i32
    %c0_i32_1 = arith.constant 0 : i32
    return %c0_i32, %c0_i32_0 : i32, i32
  }
  func.func @transform_38(%arg0: i32) -> (i32, i32, i32) {
    %c0_i32 = arith.constant 0 : i32
    %c0_i32_0 = arith.constant 0 : i32
    %c0_i32_1 = arith.constant 0 : i32
    return %arg0, %c0_i32, %c0_i32_0 : i32, i32, i32
  }
  func.func @transform_39(%arg0: i32) -> (i32, i32, i32) {
    %c0_i32 = arith.constant 0 : i32
    %c0_i32_0 = arith.constant 0 : i32
    %c0_i32_1 = arith.constant 0 : i32
    return %arg0, %c0_i32, %c0_i32_0 : i32, i32, i32
  }
  func.func @transform_40(%arg0: i32) -> (i32, i32, i32) {
    %c0_i32 = arith.constant 0 : i32
    %c0_i32_0 = arith.constant 0 : i32
    %c0_i32_1 = arith.constant 0 : i32
    return %arg0, %c0_i32, %c0_i32_0 : i32, i32, i32
  }
}

</mosaic_0001>

<bundles_post_ra>
// kernel: seq2seq_forward.1
= control target key start
LH: loop header
LB: loop body
LE: loop exit
PB: predicated region body
PF: predicated region fallthrough
CT: control target
= control target key end

     0   :  { %s5596_s6 = smov 1   ;;  %s5597_s10 = smov 2   ;;  %s7006_s0 = inlined_call_operand.smem [shape: u32[41], index: -1, kind: input, shape index: {}] }
   0x1   :  { %s5654_s5 = sld [smem:[%s7006_s0]]   ;;  %s5598_s14 = smov 3  }
   0x2   :  { %s5659_s9 = sld [smem:[%s7006_s0 + %s5596_s6]]   ;;  %s5599_s18 = smov 4  }
   0x3   :  { %s5664_s13 = sld [smem:[%s7006_s0 + %s5597_s10]]   ;;  %s5600_s22 = smov 5  }
   0x4   :  { %s5669_s17 = sld [smem:[%s7006_s0 + %s5598_s14]]   ;;  %s5601_s26 = smov 6  }
   0x5   :  { %s5674_s21 = sld [smem:[%s7006_s0 + %s5599_s18]]   ;;  %s5602_s30 = smov 7  }
   0x6   :  { %s5679_s25 = sld [smem:[%s7006_s0 + %s5600_s22]]   ;;  %s5603_s4 = smov 8  }
   0x7   :  { %7061 = sst [smem:[#allocation5_spill]] %s5654_s5  ;;  %s5604_s10 = smov 9  }
   0x8   :  { %7062 = sst [smem:[#allocation6_spill]] %s5659_s9  ;;  %s5605_s15 = smov 10  }
   0x9   :  { %7063 = sst [smem:[#allocation7_spill]] %s5664_s13  ;;  %s5606_s20 = smov 11  }
   0xa   :  { %7064 = sst [smem:[#allocation8_spill]] %s5669_s17  ;;  %s5608_s1 = smov 13  }
   0xb   :  { %7065 = sst [smem:[#allocation9_spill]] %s5674_s21  ;;  %s5609_s7 = smov 14  }
   0xc   :  { %7066 = sst [smem:[#allocation10_spill]] %s5679_s25  ;;  %s5611_s22 = smov 16  }
   0xd   :  { %s5684_s29 = sld [smem:[%s7006_s0 + %s5601_s26]]   ;;  %s5607_s26 = smov 12  }
   0xe   :  { %s5689_s3 = sld [smem:[%s7006_s0 + %s5602_s30]]   ;;  %s5612_s28 = smov 17  }
   0xf   :  { %s5694_s8 = sld [smem:[%s7006_s0 + %s5603_s4]]  }
  0x10   :  { %s5699_s14 = sld [smem:[%s7006_s0 + %s5604_s10]]  }
  0x11   :  { %s5704_s19 = sld [smem:[%s7006_s0 + %s5605_s15]]   ;;  %s5610_s15 = smov 15  }
  0x12   :  { %s5709_s24 = sld [smem:[%s7006_s0 + %s5606_s20]]  }
  0x13   :  { %7067 = sst [smem:[#allocation11_spill]] %s5684_s29 }
  0x14   :  { %7068 = sst [smem:[#allocation12_spill]] %s5689_s3 }
  0x15   :  { %7069 = sst [smem:[#allocation13_spill]] %s5694_s8 }
  0x16   :  { %7070 = sst [smem:[#allocation14_spill]] %s5699_s14 }
  0x17   :  { %7071 = sst [smem:[#allocation15_spill]] %s5704_s19 }
  0x18   :  { %7072 = sst [smem:[#allocation16_spill]] %s5709_s24 }
  0x19   :  { %s5714_s30 = sld [smem:[%s7006_s0 + %s5607_s26]]  }
  0x1a   :  { %s5719_s6 = sld [smem:[%s7006_s0 + %s5608_s1]]  }
  0x1b   :  { %s5724_s12 = sld [smem:[%s7006_s0 + %s5609_s7]]   ;;  %s5613_s7 = smov 18  }
  0x1c   :  { %s5729_s20 = sld [smem:[%s7006_s0 + %s5610_s15]]   ;;  %s5614_s15 = smov 19  }
  0x1d   :  { %s5734_s27 = sld [smem:[%s7006_s0 + %s5611_s22]]   ;;  %s5615_s22 = smov 20  }
  0x1e   :  { %s5739_s4 = sld [smem:[%s7006_s0 + %s5612_s28]]   ;;  %s5616_s28 = smov 21  }
  0x1f   :  { %7073 = sst [smem:[#allocation17_spill]] %s5714_s30 }
  0x20   :  { %7074 = sst [smem:[#allocation18_spill]] %s5719_s6 }
  0x21   :  { %7075 = sst [smem:[#allocation19_spill]] %s5724_s12 }
  0x22   :  { %7076 = sst [smem:[#allocation20_spill]] %s5729_s20 }
  0x23   :  { %7077 = sst [smem:[#allocation21_spill]] %s5734_s27 }
  0x24   :  { %7078 = sst [smem:[#allocation22_spill]] %s5739_s4 }
  0x25   :  { %s5744_s12 = sld [smem:[%s7006_s0 + %s5613_s7]]   ;;  %s5617_s7 = smov 22  }
  0x26   :  { %s5749_s20 = sld [smem:[%s7006_s0 + %s5614_s15]]   ;;  %s5618_s15 = smov 23  }
  0x27   :  { %s5754_s27 = sld [smem:[%s7006_s0 + %s5615_s22]]   ;;  %s5619_s22 = smov 24  }
  0x28   :  { %s5759_s4 = sld [smem:[%s7006_s0 + %s5616_s28]]   ;;  %s5620_s28 = smov 25  }
  0x2b   :  { %7079 = sst [smem:[#allocation23_spill]] %s5744_s12 }
  0x2c   :  { %7080 = sst [smem:[#allocation24_spill]] %s5749_s20 }
  0x2d   :  { %7081 = sst [smem:[#allocation25_spill]] %s5754_s27 }
  0x2e   :  { %7082 = sst [smem:[#allocation26_spill]] %s5759_s4 }
  0x2f   :  { %s5764_s12 = sld [smem:[%s7006_s0 + %s5617_s7]]   ;;  %s5621_s7 = smov 26  }
  0x30   :  { %s5769_s20 = sld [smem:[%s7006_s0 + %s5618_s15]]   ;;  %s5622_s15 = smov 27  }
  0x31   :  { %s5774_s27 = sld [smem:[%s7006_s0 + %s5619_s22]]   ;;  %s5623_s22 = smov 28  }
  0x32   :  { %s5779_s4 = sld [smem:[%s7006_s0 + %s5620_s28]]   ;;  %s5624_s28 = smov 29  }
  0x35   :  { %7083 = sst [smem:[#allocation27_spill]] %s5764_s12 }
  0x36   :  { %7084 = sst [smem:[#allocation28_spill]] %s5769_s20 }
  0x37   :  { %7085 = sst [smem:[#allocation29_spill]] %s5774_s27 }
  0x38   :  { %7086 = sst [smem:[#allocation30_spill]] %s5779_s4 }
  0x39   :  { %s5784_s12 = sld [smem:[%s7006_s0 + %s5621_s7]]   ;;  %s5625_s7 = smov 30  }
  0x3a   :  { %s5789_s20 = sld [smem:[%s7006_s0 + %s5622_s15]]   ;;  %s5626_s15 = smov 31  }
  0x3b   :  { %s5794_s27 = sld [smem:[%s7006_s0 + %s5623_s22]]   ;;  %s5627_s22 = smov 32  }
  0x3c   :  { %s5799_s4 = sld [smem:[%s7006_s0 + %s5624_s28]]   ;;  %s5628_s28 = smov 33  }
  0x3f   :  { %7087 = sst [smem:[#allocation31_spill]] %s5784_s12 }
  0x40   :  { %7088 = sst [smem:[#allocation32_spill]] %s5789_s20 }
  0x41   :  { %7089 = sst [smem:[#allocation33_spill]] %s5794_s27 }
  0x42   :  { %7090 = sst [smem:[#allocation34_spill]] %s5799_s4 }
  0x43   :  { %s5804_s12 = sld [smem:[%s7006_s0 + %s5625_s7]]   ;;  %s5629_s7 = smov 34  }
  0x44   :  { %s5809_s20 = sld [smem:[%s7006_s0 + %s5626_s15]]   ;;  %s5630_s15 = smov 35  }
  0x45   :  { %s5814_s27 = sld [smem:[%s7006_s0 + %s5627_s22]]   ;;  %s5631_s22 = smov 36  }
  0x46   :  { %s5819_s4 = sld [smem:[%s7006_s0 + %s5628_s28]]   ;;  %s5632_s28 = smov 37  }
  0x49   :  { %7091 = sst [smem:[#allocation35_spill]] %s5804_s12 }
  0x4a   :  { %7092 = sst [smem:[#allocation36_spill]] %s5809_s20 }
  0x4b   :  { %7093 = sst [smem:[#allocation37_spill]] %s5814_s27 }
  0x4c   :  { %7094 = sst [smem:[#allocation38_spill]] %s5819_s4 }
  0x4d   :  { %s5824_s12 = sld [smem:[%s7006_s0 + %s5629_s7]]   ;;  %s5633_s7 = smov 38  }
  0x4e   :  { %s5829_s20 = sld [smem:[%s7006_s0 + %s5630_s15]]   ;;  %s5634_s15 = smov 39  }
  0x4f   :  { %s5834_s27 = sld [smem:[%s7006_s0 + %s5631_s22]]   ;;  %s5635_s22 = smov 40  }
  0x50   :  { %s5839_s4 = sld [smem:[%s7006_s0 + %s5632_s28]]  }
  0x53   :  { %7095 = sst [smem:[#allocation39_spill]] %s5824_s12 }
  0x54   :  { %7096 = sst [smem:[#allocation40_spill]] %s5829_s20 }
  0x55   :  { %7097 = sst [smem:[#allocation41_spill]] %s5834_s27 }
  0x56   :  { %7098 = sst [smem:[#allocation42_spill]] %s5839_s4 }
  0x57   :  { %s5844_s12 = sld [smem:[%s7006_s0 + %s5633_s7]]  }
  0x58   :  { %s5849_s20 = sld [smem:[%s7006_s0 + %s5634_s15]]  }
  0x59   :  { %s5854_s27 = sld [smem:[%s7006_s0 + %s5635_s22]]  }
  0x5a   :  { %87 = vsyncpa [#allocation3], 0 }
  0x5b   :  { %89 = vsyncpa [#allocation3 + $0x1], 0  ;;  %s5856_s28 = smov 0   ;;  %s5858_s1 = smov 0  }
  0x5c   :  { %s5860_s2 = smov 0   ;;  %s5862_s7 = smov 0  }
  0x5d LB: > { %s7099_s30 = sld [smem:[#allocation17_spill]]  ;;  %s5877_s0 = sadd.s32 4294967295, %s5594_s7   ;;  %s5586_s1 = sphi %s5858_s1, %s7157_s1   ;;  %s5582_s28 = sphi %s5856_s28, %s7156_s28   ;;  %s5594_s7 = sphi %s5862_s7, %s7153_s7   ;;  %s5590_s2 = sphi %s5860_s2, %s7155_s2  }
  0x5e   : > { %s7100_s24 = sld [smem:[#allocation16_spill]]  ;;  %s4921_s10 = sadd.s32 4294967294, %s5594_s7  }
  0x5f   : > { %s7101_s19 = sld [smem:[#allocation15_spill]]  ;;  %s5881_s11 = sadd.s32 1, %s5594_s7  }
  0x60   : > { %s7102_s6 = sld [smem:[#allocation18_spill]]  ;;  %s941_s15 = sadd.s32 1, %s5590_s2 }
  0x61   : > { %s7103_s14 = sld [smem:[#allocation14_spill]]  ;;  %s938_s16 = ssub.s32 %s5594_s7, %s5881_s11 }
  0x62   : > { %s7104_s8 = sld [smem:[#allocation13_spill]]  ;;  %p951_p0 = scmp.ne.s32.totalorder %s5590_s2, %s5586_s1 }
  0x63   : > { %s7105_s29 = sld [smem:[#allocation11_spill]]  ;;  %p939_p1 = scmp.eq.s32.totalorder %s938_s16, 0 }
  0x64   : > { %s7106_s3 = sld [smem:[#allocation12_spill]]  ;;  %p952_p2 = scmp.eq.s32.totalorder %s5877_s0, 1 }
  0x65   : > { %s7107_s17 = sld [smem:[#allocation8_spill]]  ;;  %p957_p3 = scmp.ne.s32.totalorder %s5586_s1, %s5582_s28 }
  0x66   : > { %s7108_s9 = sld [smem:[#allocation6_spill]]  ;;  %p958_p4 = scmp.eq.s32.totalorder %s4921_s10, 1 }
  0x67   : > { %7109 = sst [smem:[#allocation43_spill]] %s5590_s2  ;;  %p5894_p5 = por %p952_p2, %p951_p0 }
  0x68   : > { %7110 = sst [smem:[#allocation44_spill]] %s5881_s11  ;;  %p5898_p6 = por %p958_p4, %p957_p3 }
  0x69   : > { %s5892_s18 = scalar_select %p939_p1, %s5590_s2, %s941_s15  }
  0x6a   : > { %p4924_p7 = scmp.ge.s32.totalorder %s5594_s7, 1  ;;  %p1128_p8 = scmp.lt.s32.totalorder %s5594_s7, 3 }
  0x6b   : > { %7111 = sst [smem:[#allocation45_spill]] %s5892_s18 }
  0x6c   : > { %p1129_p9 = pnand %p4924_p7, %p1128_p8 }
  0x6d   : > { %s7114_s5 = sld [smem:[#allocation5_spill]] (!%p1129_p9)  ;;  %p1242_p10 = scmp.lt.s32.totalorder (!%p1129_p9), %s5877_s0, 1 }
  0x6e   : > { %1132 = sbr.rel (%p1129_p9) target bundleno = 8846 (0x228e), region = 172  ;;  %s7115_s13 = sld [smem:[#allocation7_spill]] (!%p1129_p9) }
  0x6f   : > { %s7116_s21 = sld [smem:[#allocation9_spill]] (!%p1129_p9)  ;;  %s7028_s16 = smov (!%p1129_p9), 48  }
  0x70   : > { %s7117_s25 = sld [smem:[#allocation10_spill]] (!%p1129_p9) }
  0x71   : > { %s7129_s18 = sld [smem:[#allocation25_spill]] (!%p1129_p9) }
  0x72   : > { %s7146_s11 = sld [smem:[#allocation36_spill]] (!%p1129_p9) }
  0x73   : > { %v1268_v0 = vld [vmem:[%s7108_s9 + $0x18] sm:$0xff]  ;;  %v1267_v1 = vld [vmem:[%s7108_s9 + $0x10] sm:$0xff]  ;;  %v1266_v2 = vld [vmem:[%s7108_s9 + $0x8] sm:$0xff]  ;;  %s5909_s26 = scalar_select %p1242_p10, %s5877_s0, 1  ;;  %vm1273_vm0 = vcmask 261120   ;;  %vm1309_vm1 = vcmask 523264  }
  0x74   : > { %1292 = vmatpush.msra.mxu0 %v1268_v0  ;;  %v1265_v3 = vld [vmem:[%s7108_s9] sm:$0xff]  ;;  %v1304_v13 = vld [vmem:[%s7107_s17 + $0x8] sm:$0xff]  ;;  %v5636_v17 = vmov 64.0   ;;  %v1385_v34 = vld [vmem:[%s7105_s29 + $0x70] sm:$0xff]  ;;  %vm1451_vm9 = vcmask 130048   ;;  %s7031_s9 = smov 80  }
  0x75   : > { %s7025_s10 = sshll.u32 %s5909_s26, 4  ;;  %v5336_v6 = vld [vmem:[%s7115_s13] ss:$0 sm:$0xff]  ;;  %5367 = vrcp.f32 %v5636_v17  ;;  %v1386_v35 = vld [vmem:[%s7105_s29 + $0x78] sm:$0xff]  ;;  %1407 = vmatpush.msra.mxu1 %v1385_v34  ;;  %v1384_v37 = vld [vmem:[%s7105_s29 + $0x68] sm:$0xff]  ;;  %vm1860_vm10 = vcmask 392192  }
  0x76   : > { %1293 = vmatpush.msra.mxu0 %v1267_v1  ;;  %s1246_s15 = scalar_lea.vmem %s7114_s5, %s7025_s10  ;;  %v1303_v8 = vld [vmem:[%s7107_s17] sm:$0xff]  ;;  %v1381_v38 = vld [vmem:[%s7105_s29 + $0x50] sm:$0xff]  ;;  %v1382_v39 = vld [vmem:[%s7105_s29 + $0x58] sm:$0xff]  ;;  %s7026_s10 = smov 64  }
  0x77   : > { %v1263_v4 = vld [vmem:[%s1246_s15] sm:$0xff]  ;;  %v1264_v5 = vld [vmem:[%s1246_s15 + $0x8] sm:$0xff]  ;;  %v1377_v42 = vld [vmem:[%s7105_s29 + $0x30] sm:$0xff]  ;;  %s7037_s15 = smov 16   ;;  %s7035_s5 = smov 112  }
  0x78   : > { %1294 = vmatpush.msra.mxu0 %v1266_v2  ;;  %v1383_v36 = vld [vmem:[%s7105_s29 + $0x60] sm:$0xff]  ;;  %v1380_v41 = vld [vmem:[%s7105_s29 + $0x48] sm:$0xff]  ;;  %v1378_v43 = vld [vmem:[%s7105_s29 + $0x38] sm:$0xff]  ;;  %s7123_s13 = smov 64   ;;  %s7124_s17 = smov 32  }
  0x79   : > { %1408 = vmatpush.msra.mxu1 %v1383_v36  ;;  %v1379_v40 = vld [vmem:[%s7105_s29 + $0x40] sm:$0xff]  ;;  %v1376_v45 = vld [vmem:[%s7105_s29 + $0x28] sm:$0xff]  ;;  %v1373_v46 = vld [vmem:[%s7105_s29 + $0x10] sm:$0xff]  ;;  %s7151_s4 = sld [smem:[#allocation42_spill]] }
  0x7a   : > { %1295 = vmatpush.msra.mxu0 %v1265_v3  ;;  %v1375_v44 = vld [vmem:[%s7105_s29 + $0x20] sm:$0xff]  ;;  %v1374_v47 = vld [vmem:[%s7105_s29 + $0x18] sm:$0xff]  ;;  %v1372_v49 = vld [vmem:[%s7105_s29 + $0x8] sm:$0xff] }
  0x7b   : > { %4932 = vmatmul.msk.f32.vlgmr.msra.gmra.mxu0 %vm1273_vm0, %v1263_v4  ;;  %v5368_v18 = vpop.eup %5367  ;;  %1409 = vmatpush.msra.mxu1 %v1381_v38  ;;  %v1371_v48 = vld [vmem:[%s7105_s29] sm:$0xff] }
  0x7c   : > { %v1317_v19 = vmul.f32 64.0, %v5368_v18  ;;  %vm1321_vm2 = vweird.f32 %v5368_v18  ;;  %1430 = vmatpush.msrb.mxu0 %v1386_v35  ;;  %v5337_v0 = vld [vmem:[%s7116_s21] ss:$0 sm:$0xff]  ;;  %s7126_s21 = smov 112  }
  0x7d   : > { %1410 = vmatpush.msra.mxu1 %v1379_v40  ;;  %v5338_v4 = vld [vmem:[%s7117_s25] ss:$0 sm:$0xff]  ;;  %s7127_s25 = smov 96  }
  0x7e   : > { %v1318_v20 = vsub.f32 1.0, %v1317_v19  ;;  %1431 = vmatpush.msrb.mxu0 %v1384_v37 }
  0x7f   : > { %1411 = vmatpush.msra.mxu1 %v1377_v42 }
  0x80   : > { %v1319_v21 = vmul.f32 %v5368_v18, %v1318_v20  ;;  %1432 = vmatpush.msrb.mxu0 %v1382_v39 }
  0x81   : > { %1412 = vmatpush.msra.mxu1 %v1375_v44 }
  0x82   : > { %v1320_v22 = vadd.f32 %v5368_v18, %v1319_v21  ;;  %1433 = vmatpush.msrb.mxu0 %v1380_v41 }
  0x83   : > { %4933 = vmatmul.msk.f32.gmra.mxu0 %vm1273_vm0, %v1264_v5  ;;  %1413 = vmatpush.msra.mxu1 %v1373_v46 }
  0x84   : > { %v5923_v23 = vsel %vm1321_vm2, %v5368_v18, %v1320_v22  ;;  %1434 = vmatpush.msrb.mxu0 %v1378_v43 }
  0x85   : > { %1414 = vmatpush.msra.mxu1 %v1371_v48 }
  0x86   : > { %1435 = vmatpush.msrb.mxu0 %v1376_v45 }
  0x88   : > { %1436 = vmatpush.msrb.mxu0 %v1374_v47 }
  0x8a   : > { %1437 = vmatpush.msrb.mxu0 %v1372_v49 }
  0xf8   : > { %v1297_v7 = vpop.f32.mrf.mxu0 }
  0xf9   : > { %v1298_v9 = vadd.f32 %v5336_v6, %v1297_v7 }
  0xfb   : > { %v1305_v10 = vadd.f32 %v1303_v8, %v1298_v9 }
  0xfd   : > { %v1310_v11 = vsel %vm1309_vm1, %v1305_v10, 0.0 }
  0xfe   : > { %1311 = vadd.xlane.f32.xlu0 %v1310_v11 }
 0x100   : > { %v1300_v12 = vpop.f32.mrf.mxu0 }
 0x101   : > { %v1301_v14 = vadd.f32 %v5336_v6, %v1300_v12 }
 0x103   : > { %v1306_v15 = vadd.f32 %v1304_v13, %v1301_v14  ;;  %v1387_v14 = vld [vmem:[%s7106_s3] sm:$0x3] }
 0x104   : > { %v1390_v19 = vperm.slane %v1387_v14, 1 }
 0x105   : > { %v1313_v16 = vsel %vm1309_vm1, %v1306_v15, 0.0 }
 0x106   : > { %1314 = vadd.xlane.f32.xlu0 %v1313_v16 }
 0x171   : > { %v1312_v24 = vpop.xlane.xlu0 %1311 }
 0x172   : > { %v1323_v25 = vmul.f32 %v5923_v23, %v1312_v24 }
 0x174   : > { %v5926_v26 = vsub.f32 %v1305_v10, %v1323_v25 }
 0x176   : > { %v1327_v27 = vmul.f32 %v5926_v26, %v5926_v26 }
 0x178   : > { %v1329_v28 = vsel %vm1309_vm1, %v1327_v27, 0.0 }
 0x179   : > { %1330 = vadd.xlane.f32.xlu1 %v1329_v28  ;;  %v1315_v29 = vpop.xlane.xlu0 %1314 }
 0x17a   : > { %v1324_v30 = vmul.f32 %v5923_v23, %v1315_v29 }
 0x17c   : > { %v5932_v31 = vsub.f32 %v1306_v15, %v1324_v30  ;;  %v1389_v15 = vperm.slane %v1387_v14, 0 }
 0x17e   : > { %v1328_v32 = vmul.f32 %v5932_v31, %v5932_v31 }
 0x180   : > { %v1332_v33 = vsel %vm1309_vm1, %v1328_v32, 0.0 }
 0x181   : > { %1333 = vadd.xlane.f32.xlu1 %v1332_v33 }
 0x1ec   : > { %v1331_v50 = vpop.xlane.xlu1 %1330 }
 0x1ed   : > { %v1335_v51 = vmul.f32 %v1331_v50, %v5923_v23 }
 0x1ef   : > { %v1337_v52 = vadd.f32 1e-12, %v1335_v51 }
 0x1f1   : > { %5369 = vrsqrt.f32 %v1337_v52  ;;  %vm1345_vm4 = vweird.f32 %v1337_v52 }
 0x1f4   : > { %v1334_v53 = vpop.xlane.xlu1 %1333 }
 0x1f5   : > { %v1336_v54 = vmul.f32 %v1334_v53, %v5923_v23 }
 0x1f7   : > { %v5370_v55 = vpop.eup %5369  ;;  %v1338_v56 = vadd.f32 1e-12, %v1336_v54 }
 0x1f8   : > { %v1340_v57 = vmul.f32 %v5370_v55, %v1337_v52  ;;  %vm1346_vm3 = vweird.f32 %v5370_v55 }
 0x1f9   : > { %5371 = vrsqrt.f32 %v1338_v56  ;;  %vm1347_vm5 = vmor %vm1345_vm4, %vm1346_vm3  ;;  %vm1355_vm7 = vweird.f32 %v1338_v56 }
 0x1fa   : > { %v1341_v58 = vmul.f32 %v5370_v55, %v1340_v57 }
 0x1fc   : > { %v1342_v59 = vmul.f32 0.5, %v1341_v58 }
 0x1fe   : > { %v1343_v60 = vsub.f32 1.5, %v1342_v59 }
 0x1ff   : > { %v5372_v61 = vpop.eup %5371 }
 0x200   : > { %v1344_v62 = vmul.f32 %v5370_v55, %v1343_v60  ;;  %v1350_v63 = vmul.f32 %v5372_v61, %v1338_v56  ;;  %vm1356_vm6 = vweird.f32 %v5372_v61 }
 0x201   : > { %vm1357_vm8 = vmor %vm1355_vm7, %vm1356_vm6 }
 0x202   : > { %v1348_v1 = vsel %vm1347_vm5, %v5370_v55, %v1344_v62  ;;  %v1351_v2 = vmul.f32 %v5372_v61, %v1350_v63 }
 0x203   : > { %v1359_v3 = vmul.f32 %v1348_v1, %v5926_v26 }
 0x204   : > { %v1352_v5 = vmul.f32 0.5, %v1351_v2 }
 0x205   : > { %v1364_v6 = vmul.f32 %v5337_v0, %v1359_v3 }
 0x206   : > { %v1353_v7 = vsub.f32 1.5, %v1352_v5 }
 0x207   : > { %v5958_v8 = vadd.f32 %v5338_v4, %v1364_v6 }
 0x208   : > { %v1354_v9 = vmul.f32 %v5372_v61, %v1353_v7 }
 0x209   : > { %4934 = vmatmul.msk.f32.vlgmr.msra.gmra.mxu1 %vm1309_vm1, %v5958_v8  ;;  %4936 = vmatmul.msk.f32.vlgmr.msrb.gmra.mxu0 %vm1309_vm1, %v5958_v8 }
 0x20a   : > { %v1358_v10 = vsel %vm1357_vm8, %v5372_v61, %v1354_v9 }
 0x20b   : > { %v1360_v11 = vmul.f32 %v1358_v10, %v5932_v31 }
 0x20d   : > { %v1365_v12 = vmul.f32 %v5337_v0, %v1360_v11 }
 0x20f   : > { %v5965_v13 = vadd.f32 %v5338_v4, %v1365_v12 }
 0x211   : > { %4935 = vmatmul.msk.f32.gmra.mxu1 %vm1309_vm1, %v5965_v13  ;;  %4937 = vmatmul.msk.f32.gmra.mxu0 %vm1309_vm1, %v5965_v13 }
 0x286   : > { %v1416_v16 = vpop.f32.mrf.mxu1  ;;  %v1439_v17 = vpop.f32.mrf.mxu0 }
 0x287   : > { %v5972_v18 = vadd.f32 %v1416_v16, %v1389_v15  ;;  %v1440_v22 = vadd.f32 %v1439_v17, %v1390_v19 }
 0x289   : > { %1540 = vrot.lane.b32.xlu1 %v5972_v18, %s7028_s16 }
 0x28e   : > { %v1419_v20 = vpop.f32.mrf.mxu1  ;;  %v1442_v21 = vpop.f32.mrf.mxu0 }
 0x28f   : > { %v5976_v24 = vadd.f32 %v1419_v20, %v1389_v15  ;;  %v1443_v25 = vadd.f32 %v1442_v21, %v1390_v19 }
 0x291   : > { %1527 = vmatpush.msra.mxu0 %v1443_v25  ;;  %5213 = vmatpush.msra.mxu2 %v1443_v25  ;;  %v5978_v26 = vpack.i.bf16 %v1440_v22, %v1443_v25 }
 0x292   : > { %1740 = vrot.lane.b32.xlu1 %v5976_v24, %s7037_s15  ;;  %1542 = vrot.lane.b32.xlu0 %v5976_v24, %s7028_s16  ;;  %s7033_s16 = smov 96  }
 0x293   : > { %1449 = vrot.lane.b32.xlu2 %v5976_v24, %s7026_s10  ;;  %1528 = vmatpush.msra.mxu0 %v1440_v22 }
 0x294   : > { %5214 = vmatpush.msra.mxu2 %v1440_v22 }
 0x29b   : > { %1447 = vrot.lane.b32.xlu2 %v5972_v18, %s7026_s10  ;;  %s7039_s10 = smov 32  }
 0x2a3   : > { %1536 = vrot.lane.b32.xlu2 %v5972_v18, %s7035_s5 }
 0x2ab   : > { %1538 = vrot.lane.b32.xlu2 %v5976_v24, %s7035_s5 }
 0x2ed   : > { %v1450_v27 = vpop.permute.xlu2 %1449 }
 0x2ee   : > { %4938 = vmatpush.xpose.msk.msra.mxu3 %vm1451_vm9, %v1450_v27 }
 0x2f5   : > { %v1448_v28 = vpop.permute.xlu2 %1447 }
 0x2f6   : > { %4939 = vmatpush.xpose.msk.msra.mxu3 %vm1451_vm9, %v1448_v28 }
 0x2f9   : > { %4940 = vmatmul.msk.f32.vlgmr.msra.gmra.mxu3 %vm1451_vm9, %v5972_v18 }
 0x2fb   : > { %v1541_v29 = vpop.permute.xlu1 %1540 }
 0x2fd   : > { %v1537_v31 = vpop.permute.xlu2 %1536 }
 0x301   : > { %4941 = vmatmul.msk.f32.gmra.mxu3 %vm1451_vm9, %v5976_v24 }
 0x304   : > { %v1543_v30 = vpop.permute.xlu0 %1542  ;;  %v1741_v32 = vpop.permute.xlu1 %1740 }
 0x305   : > { %4944 = vmatpush.xpose.msk.msrb.mxu3 %vm1451_vm9, %v1543_v30  ;;  %v1539_v33 = vpop.permute.xlu2 %1538 }
 0x309   : > { %4945 = vmatpush.xpose.msk.msrb.mxu3 %vm1451_vm9, %v1541_v29 }
 0x30c   : > { %4946 = vmatmul.msk.f32.vlgmr.msrb.gmra.mxu3 %vm1451_vm9, %v1537_v31 }
 0x30d   : > { %4956 = vmatpush.xpose.msk.msra.mxu3 %vm1451_vm9, %v1741_v32 }
 0x314   : > { %4947 = vmatmul.msk.f32.gmra.mxu3 %vm1451_vm9, %v1539_v33 }
 0x37c   : > { %v1477_v34 = vpop.f32.mrf.mxu3 }
 0x37d   : > { %v1483_v57 = vmul.f32 0.25, %v1477_v34 }
 0x37f   : > { %v1485_v58 = vsel %vm1451_vm9, %v1483_v57, -inf }
 0x384   : > { %v1480_v35 = vpop.f32.mrf.mxu3 }
 0x385   : > { %v1484_v36 = vmul.f32 0.25, %v1480_v35 }
 0x387   : > { %v1488_v37 = vsel %vm1451_vm9, %v1484_v36, -inf }
 0x388   : > { %1489 = vmax.xlane.f32.xlu2 %v1488_v37 }
 0x38f   : > { %v1569_v38 = vpop.f32.mrf.mxu3 }
 0x390   : > { %v1575_v59 = vmul.f32 0.25, %v1569_v38 }
 0x392   : > { %v1577_v60 = vsel %vm1451_vm9, %v1575_v59, -inf }
 0x397   : > { %v1572_v39 = vpop.f32.mrf.mxu3 }
 0x398   : > { %v1576_v40 = vmul.f32 0.25, %v1572_v39 }
 0x39a   : > { %v1580_v41 = vsel %vm1451_vm9, %v1576_v40, -inf }
 0x39b   : > { %1581 = vmax.xlane.f32.xlu0 %v1580_v41 }
 0x3a0   : > { %1642 = vrot.lane.b32.xlu2 %v5976_v24, %s7039_s10 }
 0x3a8   : > { %1738 = vrot.lane.b32.xlu2 %v5972_v18, %s7037_s15 }
 0x3af   : > { %5307 = vrot.lane.b32.xlu0 %v5978_v26, %s7035_s5  ;;  %s7120_s5 = sld [smem:[#allocation20_spill]] }
 0x3b7   : > { %1640 = vrot.lane.b32.xlu0 %v5972_v18, %s7039_s10 }
 0x3bf   : > { %1636 = vrot.lane.b32.xlu0 %v5972_v18, %s7033_s16 }
 0x3c7   : > { %1736 = vrot.lane.b32.xlu0 %v5976_v24, %s7031_s9 }
 0x3fb   : > { %v1490_v42 = vpop.xlane.xlu2 %1489 }
 0x3fc   : > { %v1492_v43 = vsub.f32 %v1484_v36, %v1490_v42 }
 0x3fe   : > { %v1495_v44 = vmul.f32 1.442695, %v1492_v43 }
 0x400   : > { %5373 = vpow2.f32 %v1495_v44 }
 0x403   : > { %v1643_v45 = vpop.permute.xlu2 %1642 }
 0x406   : > { %v5374_v46 = vpop.eup %5373 }
 0x407   : > { %v1500_v47 = vsel %vm1451_vm9, %v5374_v46, 0.0 }
 0x408   : > { %1501 = vadd.xlane.f32.xlu1 %v1500_v47 }
 0x40b   : > { %v1739_v48 = vpop.permute.xlu2 %1738 }
 0x40c   : > { %4957 = vmatpush.xpose.msk.msra.mxu3 %vm1451_vm9, %v1739_v48 }
 0x40e   : > { %v1582_v49 = vpop.xlane.xlu0 %1581 }
 0x40f   : > { %v1584_v50 = vsub.f32 %v1576_v40, %v1582_v49 }
 0x411   : > { %v1587_v51 = vmul.f32 1.442695, %v1584_v50 }
 0x413   : > { %5375 = vpow2.f32 %v1587_v51 }
 0x419   : > { %v5376_v52 = vpop.eup %5375 }
 0x41a   : > { %v1592_v53 = vsel %vm1451_vm9, %v5376_v52, 0.0 }
 0x41b   : > { %1593 = vadd.xlane.f32.xlu2 %v1592_v53 }
 0x421   : > { %1734 = vrot.lane.b32.xlu1 %v5972_v18, %s7031_s9  ;;  %v5308_v54 = vpop.permute.xlu0 %5307 }
 0x422   : > { %v5309_v55 = vunpack.i.l.bf16 %v5308_v54  ;;  %v5310_v56 = vunpack.i.h.bf16 %v5308_v54 }
 0x424   : > { %1627 = vmatpush.msrb.mxu1 %v5309_v55  ;;  %5215 = vmatpush.msrb.mxu2 %v5309_v55 }
 0x426   : > { %1628 = vmatpush.msrb.mxu1 %v5310_v56  ;;  %5216 = vmatpush.msrb.mxu2 %v5310_v56 }
 0x429   : > { %v1641_v0 = vpop.permute.xlu0 %1640 }
 0x431   : > { %v1637_v2 = vpop.permute.xlu0 %1636 }
 0x433   : > { %1638 = vrot.lane.b32.xlu2 %v5976_v24, %s7033_s16 }
 0x439   : > { %v1737_v6 = vpop.permute.xlu0 %1736 }
 0x44b   : > { %1486 = vmax.xlane.f32.xlu1 %v1485_v58 }
 0x45c   : > { %1578 = vmax.xlane.f32.xlu2 %v1577_v60 }
 0x47b   : > { %v1502_v61 = vpop.xlane.xlu1 %1501 }
 0x47c   : > { %5377 = vrcp.f32 %v1502_v61 }
 0x482   : > { %v5378_v62 = vpop.eup %5377 }
 0x483   : > { %v1506_v63 = vmul.f32 %v5378_v62, %v5374_v46 }
 0x485   : > { %4943 = vmatmul.msk.f32.vlgmr.msra.gmra.mxu2 %vm1451_vm9, %v1506_v63 }
 0x486   : > { %4950 = vmatpush.xpose.msk.msra.mxu2 %vm1451_vm9, %v1643_v45 }
 0x48a   : > { %4951 = vmatpush.xpose.msk.msra.mxu2 %vm1451_vm9, %v1641_v0 }
 0x48e   : > { %v1594_v1 = vpop.xlane.xlu2 %1593 }
 0x48f   : > { %5379 = vrcp.f32 %v1594_v1 }
 0x493   : > { %v1735_v3 = vpop.permute.xlu1 %1734 }
 0x494   : > { %4958 = vmatmul.msk.f32.vlgmr.msra.gmra.mxu3 %vm1451_vm9, %v1735_v3 }
 0x495   : > { %v5380_v4 = vpop.eup %5379 }
 0x496   : > { %v1598_v5 = vmul.f32 %v5380_v4, %v5376_v52  ;;  %v1639_v7 = vpop.permute.xlu2 %1638 }
 0x498   : > { %4949 = vmatmul.msk.f32.vlgmr.msrb.gmra.mxu2 %vm1451_vm9, %v1598_v5 }
 0x49c   : > { %4959 = vmatmul.msk.f32.gmra.mxu3 %vm1451_vm9, %v1737_v6 }
 0x4a0   : > { %4952 = vmatmul.msk.f32.vlgmr.msra.gmra.mxu2 %vm1451_vm9, %v1637_v2 }
 0x4a8   : > { %4953 = vmatmul.msk.f32.gmra.mxu2 %vm1451_vm9, %v1639_v7 }
 0x4be   : > { %v1487_v9 = vpop.xlane.xlu1 %1486 }
 0x4bf   : > { %v1491_v10 = vsub.f32 %v1483_v57, %v1487_v9 }
 0x4c1   : > { %v1493_v12 = vmul.f32 1.442695, %v1491_v10 }
 0x4c3   : > { %5381 = vpow2.f32 %v1493_v12 }
 0x4c9   : > { %v5382_v18 = vpop.eup %5381 }
 0x4ca   : > { %v1497_v20 = vsel %vm1451_vm9, %v5382_v18, 0.0 }
 0x4cf   : > { %v1579_v19 = vpop.xlane.xlu2 %1578 }
 0x4d0   : > { %v1583_v24 = vsub.f32 %v1575_v59, %v1579_v19 }
 0x4d2   : > { %v1585_v28 = vmul.f32 1.442695, %v1583_v24 }
 0x4d4   : > { %5383 = vpow2.f32 %v1585_v28  ;;  %v1869_v28 = vld [vmem:[%s7104_s8 + $0x30] sm:$0xff] }
 0x4da   : > { %v5384_v34 = vpop.eup %5383 }
 0x4db   : > { %v1589_v35 = vsel %vm1451_vm9, %v5384_v34, 0.0 }
 0x508   : > { %v6034_v11 = vpop.f32.mrf.mxu2 }
 0x517   : > { %v1767_v14 = vpop.f32.mrf.mxu3 }
 0x518   : > { %v1773_v15 = vmul.f32 0.25, %v1767_v14 }
 0x51a   : > { %v1775_v16 = vsel %vm1451_vm9, %v1773_v15, -inf }
 0x51b   : > { %1776 = vmax.xlane.f32.xlu1 %v1775_v16  ;;  %v6037_v17 = vpop.f32.mrf.mxu2 }
 0x51f   : > { %v1770_v27 = vpop.f32.mrf.mxu3 }
 0x520   : > { %v1774_v29 = vmul.f32 0.25, %v1770_v27  ;;  %v1870_v27 = vld [vmem:[%s7104_s8 + $0x38] sm:$0xff] }
 0x521   : > { %1889 = vmatpush.msrb.mxu2 %v1870_v27 }
 0x522   : > { %v1778_v33 = vsel %vm1451_vm9, %v1774_v29, -inf }
 0x523   : > { %1498 = vadd.xlane.f32.xlu1 %v1497_v20  ;;  %v1669_v21 = vpop.f32.mrf.mxu2  ;;  %1890 = vmatpush.msrb.mxu2 %v1869_v28 }
 0x524   : > { %v1675_v22 = vmul.f32 0.25, %v1669_v21 }
 0x526   : > { %v1677_v25 = vsel %vm1451_vm9, %v1675_v22, -inf }
 0x527   : > { %1678 = vmax.xlane.f32.xlu0 %v1677_v25 }
 0x52b   : > { %v1672_v30 = vpop.f32.mrf.mxu2 }
 0x52c   : > { %v1676_v31 = vmul.f32 0.25, %v1672_v30  ;;  %v1867_v30 = vld [vmem:[%s7104_s8 + $0x20] sm:$0xff] }
 0x52e   : > { %v1680_v32 = vsel %vm1451_vm9, %v1676_v31, -inf }
 0x52f   : > { %1681 = vmax.xlane.f32.xlu2 %v1680_v32  ;;  %1779 = vmax.xlane.f32.xlu0 %v1778_v33  ;;  %v1865_v32 = vld [vmem:[%s7104_s8 + $0x10] sm:$0xff]  ;;  %v1863_v33 = vld [vmem:[%s7104_s8] sm:$0xff] }
 0x537   : > { %1590 = vadd.xlane.f32.xlu2 %v1589_v35 }
 0x54f   : > { %5312 = vrot.lane.b32.xlu2 %v5978_v26, %s7033_s16  ;;  %s7119_s16 = sld [smem:[#allocation19_spill]] }
 0x58e   : > { %v1777_v36 = vpop.xlane.xlu1 %1776 }
 0x58f   : > { %v1781_v37 = vsub.f32 %v1773_v15, %v1777_v36 }
 0x591   : > { %v1783_v38 = vmul.f32 1.442695, %v1781_v37 }
 0x593   : > { %5385 = vpow2.f32 %v1783_v38 }
 0x596   : > { %v1499_v39 = vpop.xlane.xlu1 %1498 }
 0x597   : > { %5387 = vrcp.f32 %v1499_v39 }
 0x599   : > { %v5386_v40 = vpop.eup %5385 }
 0x59a   : > { %v1679_v41 = vpop.xlane.xlu0 %1678  ;;  %v1787_v42 = vsel %vm1451_vm9, %v5386_v40, 0.0 }
 0x59b   : > { %v1683_v43 = vsub.f32 %v1675_v22, %v1679_v41  ;;  %1788 = vadd.xlane.f32.xlu1 %v1787_v42 }
 0x59d   : > { %v5388_v44 = vpop.eup %5387  ;;  %v1685_v45 = vmul.f32 1.442695, %v1683_v43 }
 0x59e   : > { %v1505_v46 = vmul.f32 %v5388_v44, %v5382_v18 }
 0x59f   : > { %5389 = vpow2.f32 %v1685_v45 }
 0x5a0   : > { %4942 = vmatmul.msk.f32.vlgmr.msra.gmra.mxu0 %vm1451_vm9, %v1505_v46  ;;  %v5339_v46 = vld [vmem:[%s7103_s14] ss:$0 sm:$0xff] }
 0x5a2   : > { %v1682_v47 = vpop.xlane.xlu2 %1681  ;;  %v1780_v48 = vpop.xlane.xlu0 %1779 }
 0x5a3   : > { %v1684_v49 = vsub.f32 %v1676_v31, %v1682_v47  ;;  %v1782_v52 = vsub.f32 %v1774_v29, %v1780_v48  ;;  %v1868_v29 = vld [vmem:[%s7104_s8 + $0x28] sm:$0xff]  ;;  %v1866_v31 = vld [vmem:[%s7104_s8 + $0x18] sm:$0xff] }
 0x5a4   : > { %1891 = vmatpush.msrb.mxu2 %v1868_v29 }
 0x5a5   : > { %v5390_v50 = vpop.eup %5389  ;;  %v1687_v51 = vmul.f32 1.442695, %v1684_v49  ;;  %v1785_v54 = vmul.f32 1.442695, %v1782_v52 }
 0x5a6   : > { %v1689_v53 = vsel %vm1451_vm9, %v5390_v50, 0.0  ;;  %1892 = vmatpush.msrb.mxu2 %v1867_v30 }
 0x5a7   : > { %5391 = vpow2.f32 %v1687_v51  ;;  %1690 = vadd.xlane.f32.xlu0 %v1689_v53 }
 0x5a8   : > { %1893 = vmatpush.msrb.mxu2 %v1866_v31 }
 0x5aa   : > { %v1591_v55 = vpop.xlane.xlu2 %1590  ;;  %1894 = vmatpush.msrb.mxu2 %v1865_v32  ;;  %v5340_v32 = vld [vmem:[%s7101_s19] ss:$0 sm:$0xff] }
 0x5ab   : > { %5393 = vrcp.f32 %v1591_v55 }
 0x5ac   : > { %5395 = vpow2.f32 %v1785_v54 }
 0x5ad   : > { %v5392_v56 = vpop.eup %5391 }
 0x5ae   : > { %v1692_v57 = vsel %vm1451_vm9, %v5392_v56, 0.0 }
 0x5af   : > { %1693 = vadd.xlane.f32.xlu0 %v1692_v57 }
 0x5b1   : > { %v5394_v58 = vpop.eup %5393 }
 0x5b2   : > { %v5313_v59 = vpop.permute.xlu2 %5312  ;;  %v1597_v60 = vmul.f32 %v5394_v58, %v5384_v34  ;;  %v5396_v61 = vpop.eup %5395 }
 0x5b3   : > { %v5314_v62 = vunpack.i.l.bf16 %v5313_v59  ;;  %v5315_v63 = vunpack.i.h.bf16 %v5313_v59  ;;  %v1790_v0 = vsel %vm1451_vm9, %v5396_v61, 0.0 }
 0x5b4   : > { %5317 = vrot.lane.b32.xlu1 %v5978_v26, %s7031_s9  ;;  %4948 = vmatmul.msk.f32.vlgmr.msrb.gmra.mxu1 %vm1451_vm9, %v1597_v60  ;;  %s7118_s9 = smov 48  }
 0x5b5   : > { %1725 = vmatpush.msrb.mxu0 %v5314_v62  ;;  %v1976_v62 = vld [vmem:[%s7099_s30 + $0x70] sm:$0xff] }
 0x5b7   : > { %1726 = vmatpush.msrb.mxu0 %v5315_v63  ;;  %1791 = vadd.xlane.f32.xlu0 %v1790_v0  ;;  %v1977_v63 = vld [vmem:[%s7099_s30 + $0x78] sm:$0xff]  ;;  %v1974_v0 = vld [vmem:[%s7099_s30 + $0x60] sm:$0xff] }
 0x5b8   : > { %2021 = vmatpush.msrb.mxu3 %v1977_v63 }
 0x5b9   : > { %1998 = vmatpush.msra.mxu0 %v1976_v62 }
 0x5bb   : > { %1999 = vmatpush.msra.mxu0 %v1974_v0  ;;  %v2220_v0 = vld [vmem:[%s7119_s16 + $0x40] sm:$0xff] }
 0x60e   : > { %v1789_v2 = vpop.xlane.xlu1 %1788 }
 0x61a   : > { %v1691_v1 = vpop.xlane.xlu0 %1690 }
 0x61b   : > { %5397 = vrcp.f32 %v1691_v1  ;;  %v1975_v1 = vld [vmem:[%s7099_s30 + $0x68] sm:$0xff] }
 0x61c   : > { %5399 = vrcp.f32 %v1789_v2  ;;  %2022 = vmatpush.msrb.mxu3 %v1975_v1  ;;  %v1972_v2 = vld [vmem:[%s7099_s30 + $0x50] sm:$0xff]  ;;  %v2239_v1 = vld [vmem:[%s7119_s16 + $0xd8] sm:$0xff] }
 0x61d   : > { %v1530_v20 = vpop.f32.mrf.mxu0  ;;  %2000 = vmatpush.msra.mxu0 %v1972_v2 }
 0x621   : > { %v5398_v3 = vpop.eup %5397 }
 0x622   : > { %v1697_v4 = vmul.f32 %v5398_v3, %v5390_v50  ;;  %v1694_v5 = vpop.xlane.xlu0 %1693  ;;  %v5400_v26 = vpop.eup %5399  ;;  %v1973_v3 = vld [vmem:[%s7099_s30 + $0x58] sm:$0xff] }
 0x623   : > { %5401 = vrcp.f32 %v1694_v5  ;;  %v1795_v12 = vmul.f32 %v5400_v26, %v5386_v40  ;;  %2023 = vmatpush.msrb.mxu3 %v1973_v3  ;;  %v1971_v5 = vld [vmem:[%s7099_s30 + $0x48] sm:$0xff]  ;;  %v1969_v26 = vld [vmem:[%s7099_s30 + $0x38] sm:$0xff] }
 0x624   : > { %4954 = vmatmul.msk.f32.vlgmr.msrb.gmra.mxu0 %vm1451_vm9, %v1697_v4  ;;  %v1970_v4 = vld [vmem:[%s7099_s30 + $0x40] sm:$0xff] }
 0x625   : > { %2001 = vmatpush.msra.mxu0 %v1970_v4  ;;  %2024 = vmatpush.msrb.mxu3 %v1971_v5 }
 0x626   : > { %v5318_v6 = vpop.permute.xlu1 %5317 }
 0x627   : > { %v5319_v7 = vunpack.i.l.bf16 %v5318_v6  ;;  %v5320_v10 = vunpack.i.h.bf16 %v5318_v6  ;;  %v1968_v6 = vld [vmem:[%s7099_s30 + $0x30] sm:$0xff]  ;;  %2025 = vmatpush.msrb.mxu3 %v1969_v26  ;;  %v2219_v26 = vld [vmem:[%s7119_s16 + $0x38] sm:$0xff] }
 0x628   : > { %2002 = vmatpush.msra.mxu0 %v1968_v6 }
 0x629   : > { %v5402_v9 = vpop.eup %5401  ;;  %1823 = vmatpush.msra.mxu1 %v5319_v7  ;;  %v1966_v7 = vld [vmem:[%s7099_s30 + $0x20] sm:$0xff] }
 0x62a   : > { %v1792_v14 = vpop.xlane.xlu0 %1791  ;;  %v1698_v15 = vmul.f32 %v5402_v9, %v5392_v56  ;;  %v1967_v9 = vld [vmem:[%s7099_s30 + $0x28] sm:$0xff]  ;;  %2003 = vmatpush.msra.mxu0 %v1966_v7  ;;  %v2238_v7 = vld [vmem:[%s7119_s16 + $0xd0] sm:$0xff] }
 0x62b   : > { %5403 = vrcp.f32 %v1792_v14  ;;  %1824 = vmatpush.msra.mxu1 %v5320_v10  ;;  %2026 = vmatpush.msrb.mxu3 %v1967_v9  ;;  %v1964_v10 = vld [vmem:[%s7099_s30 + $0x10] sm:$0xff]  ;;  %v1962_v14 = vld [vmem:[%s7099_s30] sm:$0xff] }
 0x62c   : > { %4960 = vmatmul.msk.f32.vlgmr.msra.gmra.mxu1 %vm1451_vm9, %v1795_v12  ;;  %4955 = vmatmul.msk.f32.gmra.mxu0 %vm1451_vm9, %v1698_v15  ;;  %v1965_v12 = vld [vmem:[%s7099_s30 + $0x18] sm:$0xff]  ;;  %v1963_v15 = vld [vmem:[%s7099_s30 + $0x8] sm:$0xff] }
 0x62d   : > { %2004 = vmatpush.msra.mxu0 %v1964_v10  ;;  %2027 = vmatpush.msrb.mxu3 %v1965_v12 }
 0x62f   : > { %2005 = vmatpush.msra.mxu0 %v1962_v14  ;;  %2028 = vmatpush.msrb.mxu3 %v1963_v15  ;;  %v2218_v15 = vld [vmem:[%s7119_s16 + $0x30] sm:$0xff] }
 0x631   : > { %v5404_v16 = vpop.eup %5403  ;;  %v1630_v18 = vpop.f32.mrf.mxu1 }
 0x632   : > { %1834 = vrot.lane.b32.xlu0 %v1630_v18, %s7037_s15  ;;  %v1796_v19 = vmul.f32 %v5404_v16, %v5396_v61 }
 0x634   : > { %4961 = vmatmul.msk.f32.gmra.mxu1 %vm1451_vm9, %v1796_v19 }
 0x6a1   : > { %v1728_v21 = vpop.f32.mrf.mxu0 }
 0x6a2   : > { %1842 = vrot.lane.b32.xlu2 %v1728_v21, %s7039_s10 }
 0x6a4   : > { %v1835_v35 = vpop.permute.xlu0 %1834 }
 0x6a5   : > { %v1856_v36 = vsel %vm1451_vm9, %v1530_v20, %v1835_v35 }
 0x6a9   : > { %v1826_v22 = vpop.f32.mrf.mxu1  ;;  %v1731_v24 = vpop.f32.mrf.mxu0 }
 0x6aa   : > { %1850 = vrot.lane.b32.xlu1 %v1826_v22, %s7118_s9  ;;  %1836 = vrot.lane.b32.xlu2 %v6037_v17, %s7037_s15  ;;  %v1864_v17 = vld [vmem:[%s7104_s8 + $0x8] sm:$0xff]  ;;  %s7121_s15 = sld [smem:[#allocation21_spill]] }
 0x6ab   : > { %1895 = vmatpush.msrb.mxu2 %v1864_v17 }
 0x6ad   : > { %1896 = vmatpush.msrb.mxu2 %v1863_v33 }
 0x6b1   : > { %v1829_v25 = vpop.f32.mrf.mxu1 }
 0x6b2   : > { %1844 = vrot.lane.b32.xlu1 %v1731_v24, %s7039_s10  ;;  %1852 = vrot.lane.b32.xlu0 %v1829_v25, %s7118_s9  ;;  %s7122_s10 = sld [smem:[#allocation22_spill]] }
 0x6fc   : > { %v1843_v34 = vpop.permute.xlu2 %1842 }
 0x6fd   : > { %v1858_v37 = vsel %vm1273_vm0, %v1856_v36, %v1843_v34  ;;  %v5341_v36 = vld [vmem:[%s7100_s24] ss:$0 sm:$0xff] }
 0x704   : > { %v1837_v40 = vpop.permute.xlu2 %1836 }
 0x705   : > { %v1857_v41 = vsel %vm1451_vm9, %v6034_v11, %v1837_v40 }
 0x71c   : > { %v1851_v38 = vpop.permute.xlu1 %1850 }
 0x71d   : > { %v1861_v39 = vsel %vm1860_vm10, %v1858_v37, %v1851_v38 }
 0x71e   : > { %4962 = vmatmul.msk.f32.vlgmr.msrb.gmra.mxu2 %vm1309_vm1, %v1861_v39 }
 0x724   : > { %v1845_v42 = vpop.permute.xlu1 %1844  ;;  %v1853_v43 = vpop.permute.xlu0 %1852 }
 0x725   : > { %v1859_v44 = vsel %vm1273_vm0, %v1857_v41, %v1845_v42 }
 0x726   : > { %v1862_v45 = vsel %vm1860_vm10, %v1859_v44, %v1853_v43 }
 0x727   : > { %4963 = vmatmul.msk.f32.gmra.mxu2 %vm1309_vm1, %v1862_v45 }
 0x7a1   : > { %v1898_v47 = vpop.f32.mrf.mxu2 }
 0x7a2   : > { %v1899_v48 = vadd.f32 %v5339_v46, %v1898_v47  ;;  %v2227_v47 = vld [vmem:[%s7119_s16 + $0x78] sm:$0xff] }
 0x7a3   : > { %2248 = vmatpush.msrb.mxu1 %v2227_v47  ;;  %v2234_v47 = vld [vmem:[%s7119_s16 + $0xb0] sm:$0xff] }
 0x7a4   : > { %v1904_v49 = vadd.f32 %v1899_v48, %v5958_v8  ;;  %v2226_v48 = vld [vmem:[%s7119_s16 + $0x70] sm:$0xff] }
 0x7a5   : > { %2249 = vmatpush.msrb.mxu1 %v2226_v48  ;;  %v2214_v48 = vld [vmem:[%s7119_s16 + $0x10] sm:$0xff] }
 0x7a6   : > { %v1908_v50 = vsel %vm1309_vm1, %v1904_v49, 0.0 }
 0x7a7   : > { %1909 = vadd.xlane.f32.xlu2 %v1908_v50  ;;  %v2225_v50 = vld [vmem:[%s7119_s16 + $0x68] sm:$0xff] }
 0x7a8   : > { %2250 = vmatpush.msrb.mxu1 %v2225_v50 }
 0x7aa   : > { %v1901_v51 = vpop.f32.mrf.mxu2 }
 0x7ab   : > { %v1902_v52 = vadd.f32 %v5339_v46, %v1901_v51  ;;  %v6134_v46 = vld [vmem:[%s7102_s6] sm:$0x3] }
 0x7ad   : > { %v1905_v11 = vadd.f32 %v1902_v52, %v5965_v13  ;;  %v2224_v52 = vld [vmem:[%s7119_s16 + $0x60] sm:$0xff] }
 0x7ae   : > { %2251 = vmatpush.msrb.mxu1 %v2224_v52 }
 0x7af   : > { %v1911_v53 = vsel %vm1309_vm1, %v1905_v11, 0.0 }
 0x7b0   : > { %1912 = vadd.xlane.f32.xlu1 %v1911_v53 }
 0x81a   : > { %v1910_v54 = vpop.xlane.xlu2 %1909 }
 0x81b   : > { %v1914_v55 = vmul.f32 %v1910_v54, %v5923_v23  ;;  %v2223_v54 = vld [vmem:[%s7119_s16 + $0x58] sm:$0xff] }
 0x81c   : > { %2252 = vmatpush.msrb.mxu1 %v2223_v54 }
 0x81d   : > { %v6088_v56 = vsub.f32 %v1904_v49, %v1914_v55  ;;  %v1980_v49 = vperm.slane %v6134_v46, 0  ;;  %v2242_v55 = vld [vmem:[%s7119_s16 + $0xf0] sm:$0xff] }
 0x81f   : > { %v1918_v8 = vmul.f32 %v6088_v56, %v6088_v56 }
 0x821   : > { %v1920_v57 = vsel %vm1309_vm1, %v1918_v8, 0.0  ;;  %v1981_v8 = vperm.slane %v6134_v46, 1 }
 0x822   : > { %1921 = vadd.xlane.f32.xlu0 %v1920_v57  ;;  %v2222_v57 = vld [vmem:[%s7119_s16 + $0x50] sm:$0xff] }
 0x823   : > { %v1913_v13 = vpop.xlane.xlu1 %1912  ;;  %2253 = vmatpush.msrb.mxu1 %v2222_v57  ;;  %v2232_v57 = vld [vmem:[%s7119_s16 + $0xa0] sm:$0xff] }
 0x824   : > { %v1915_v58 = vmul.f32 %v1913_v13, %v5923_v23  ;;  %v2241_v13 = vld [vmem:[%s7119_s16 + $0xe8] sm:$0xff] }
 0x826   : > { %v6094_v59 = vsub.f32 %v1905_v11, %v1915_v58  ;;  %v2243_v11 = vld [vmem:[%s7119_s16 + $0xf8] sm:$0xff] }
 0x827   : > { %2271 = vmatpush.msra.mxu2 %v2243_v11 }
 0x828   : > { %v1919_v60 = vmul.f32 %v6094_v59, %v6094_v59 }
 0x829   : > { %2272 = vmatpush.msra.mxu2 %v2242_v55 }
 0x82a   : > { %v1923_v61 = vsel %vm1309_vm1, %v1919_v60, 0.0  ;;  %v2221_v60 = vld [vmem:[%s7119_s16 + $0x48] sm:$0xff] }
 0x82b   : > { %1924 = vadd.xlane.f32.xlu2 %v1923_v61  ;;  %2273 = vmatpush.msra.mxu2 %v2241_v13  ;;  %v2240_v61 = vld [vmem:[%s7119_s16 + $0xe0] sm:$0xff] }
 0x82c   : > { %2254 = vmatpush.msrb.mxu1 %v2221_v60 }
 0x82d   : > { %2274 = vmatpush.msra.mxu2 %v2240_v61  ;;  %v2212_v61 = vld [vmem:[%s7119_s16] sm:$0xff] }
 0x82e   : > { %2255 = vmatpush.msrb.mxu1 %v2220_v0  ;;  %v2231_v0 = vld [vmem:[%s7119_s16 + $0x98] sm:$0xff] }
 0x82f   : > { %2275 = vmatpush.msra.mxu2 %v2239_v1 }
 0x830   : > { %2256 = vmatpush.msrb.mxu1 %v2219_v26 }
 0x831   : > { %2276 = vmatpush.msra.mxu2 %v2238_v7 }
 0x832   : > { %2257 = vmatpush.msrb.mxu1 %v2218_v15 }
 0x895   : > { %v1922_v16 = vpop.xlane.xlu0 %1921 }
 0x896   : > { %v1926_v18 = vmul.f32 %v1922_v16, %v5923_v23  ;;  %v2237_v16 = vld [vmem:[%s7119_s16 + $0xc8] sm:$0xff] }
 0x897   : > { %2277 = vmatpush.msra.mxu2 %v2237_v16  ;;  %v2229_v16 = vld [vmem:[%s7119_s16 + $0x88] sm:$0xff] }
 0x898   : > { %v1928_v19 = vadd.f32 1e-12, %v1926_v18 }
 0x89a   : > { %5405 = vrsqrt.f32 %v1928_v19  ;;  %vm1936_vm12 = vweird.f32 %v1928_v19 }
 0x89e   : > { %v1925_v20 = vpop.xlane.xlu2 %1924 }
 0x89f   : > { %v1927_v21 = vmul.f32 %v1925_v20, %v5923_v23 }
 0x8a0   : > { %v5406_v22 = vpop.eup %5405 }
 0x8a1   : > { %v1931_v24 = vmul.f32 %v5406_v22, %v1928_v19  ;;  %v1929_v25 = vadd.f32 1e-12, %v1927_v21  ;;  %vm1937_vm11 = vweird.f32 %v5406_v22 }
 0x8a2   : > { %vm1938_vm13 = vmor %vm1936_vm12, %vm1937_vm11 }
 0x8a3   : > { %v1932_v27 = vmul.f32 %v5406_v22, %v1931_v24  ;;  %5407 = vrsqrt.f32 %v1929_v25  ;;  %vm1946_vm15 = vweird.f32 %v1929_v25  ;;  %v2236_v24 = vld [vmem:[%s7119_s16 + $0xc0] sm:$0xff] }
 0x8a4   : > { %2278 = vmatpush.msra.mxu2 %v2236_v24  ;;  %v2228_v24 = vld [vmem:[%s7119_s16 + $0x80] sm:$0xff] }
 0x8a5   : > { %v1933_v28 = vmul.f32 0.5, %v1932_v27 }
 0x8a7   : > { %v1934_v29 = vsub.f32 1.5, %v1933_v28 }
 0x8a9   : > { %v5408_v30 = vpop.eup %5407  ;;  %v1935_v31 = vmul.f32 %v5406_v22, %v1934_v29 }
 0x8aa   : > { %v1941_v17 = vmul.f32 %v5408_v30, %v1929_v25  ;;  %vm1947_vm14 = vweird.f32 %v5408_v30 }
 0x8ab   : > { %v1939_v33 = vsel %vm1938_vm13, %v5406_v22, %v1935_v31  ;;  %vm1948_vm2 = vmor %vm1946_vm15, %vm1947_vm14  ;;  %v2217_v22 = vld [vmem:[%s7119_s16 + $0x28] sm:$0xff] }
 0x8ac   : > { %v1950_v34 = vmul.f32 %v1939_v33, %v6088_v56  ;;  %v1942_v35 = vmul.f32 %v5408_v30, %v1941_v17  ;;  %2258 = vmatpush.msrb.mxu1 %v2217_v22  ;;  %v2216_v17 = vld [vmem:[%s7119_s16 + $0x20] sm:$0xff] }
 0x8ae   : > { %v1955_v37 = vmul.f32 %v5340_v32, %v1950_v34  ;;  %v1943_v38 = vmul.f32 0.5, %v1942_v35  ;;  %2259 = vmatpush.msrb.mxu1 %v2216_v17  ;;  %v2235_v35 = vld [vmem:[%s7119_s16 + $0xb8] sm:$0xff] }
 0x8af   : > { %2279 = vmatpush.msra.mxu2 %v2235_v35 }
 0x8b0   : > { %v1944_v39 = vsub.f32 1.5, %v1943_v38  ;;  %v6120_v40 = vadd.f32 %v5341_v36, %v1955_v37 }
 0x8b1   : > { %2280 = vmatpush.msra.mxu2 %v2234_v47 }
 0x8b2   : > { %v1945_v41 = vmul.f32 %v5408_v30, %v1944_v39  ;;  %4964 = vmatmul.msk.f32.vlgmr.msra.gmra.mxu0 %vm1309_vm1, %v6120_v40  ;;  %4966 = vmatmul.msk.f32.vlgmr.msrb.gmra.mxu3 %vm1309_vm1, %v6120_v40 }
 0x8b4   : > { %v1949_v42 = vsel %vm1948_vm2, %v5408_v30, %v1945_v41  ;;  %v2215_v41 = vld [vmem:[%s7119_s16 + $0x18] sm:$0xff] }
 0x8b5   : > { %v1951_v43 = vmul.f32 %v1949_v42, %v6094_v59  ;;  %2260 = vmatpush.msrb.mxu1 %v2215_v41 }
 0x8b7   : > { %v1956_v44 = vmul.f32 %v5340_v32, %v1951_v43  ;;  %2261 = vmatpush.msrb.mxu1 %v2214_v48 }
 0x8b9   : > { %v6127_v45 = vadd.f32 %v5341_v36, %v1956_v44 }
 0x8bb   : > { %4965 = vmatmul.msk.f32.gmra.mxu0 %vm1309_vm1, %v6127_v45  ;;  %4967 = vmatmul.msk.f32.gmra.mxu3 %vm1309_vm1, %v6127_v45 }
 0x92f   : > { %v2007_v51 = vpop.f32.mrf.mxu0 }
 0x930   : > { %v6142_v53 = vadd.f32 %v2007_v51, %v1980_v49  ;;  %v2233_v51 = vld [vmem:[%s7119_s16 + $0xa8] sm:$0xff] }
 0x931   : > { %2281 = vmatpush.msra.mxu2 %v2233_v51 }
 0x932   : > { %v6147_v56 = vmul.f32 0.70710677, %v6142_v53 }
 0x933   : > { %2282 = vmatpush.msra.mxu2 %v2232_v57 }
 0x934   : > { %v2044_v58 = vmul.f32 %v6147_v56, %v6147_v56 }
 0x935   : > { %v2030_v59 = vpop.f32.mrf.mxu3  ;;  %2283 = vmatpush.msra.mxu2 %v2231_v0 }
 0x936   : > { %v6156_v62 = vmin.f32 %v2044_v58, 16.0  ;;  %v6158_v63 = vadd.f32 %v2030_v59, %v1981_v8 }
 0x938   : > { %v2046_v2 = vmul.f32 2.1237322e-06, %v6156_v62  ;;  %v2057_v3 = vmul.f32 3.8918573e-05, %v6156_v62  ;;  %v2010_v4 = vpop.f32.mrf.mxu0  ;;  %v6165_v5 = vmul.f32 0.70710677, %v6158_v63 }
 0x939   : > { %v6167_v6 = vadd.f32 %v2010_v4, %v1980_v49 }
 0x93a   : > { %v2047_v9 = vadd.f32 0.00028619796, %v2046_v2  ;;  %v2058_v10 = vadd.f32 0.001143296, %v2057_v3  ;;  %v2084_v12 = vmul.f32 %v6165_v5, %v6165_v5 }
 0x93b   : > { %v6174_v14 = vmul.f32 0.70710677, %v6167_v6 }
 0x93c   : > { %v2048_v18 = vmul.f32 %v2047_v9, %v6156_v62  ;;  %v2059_v19 = vmul.f32 %v2058_v10, %v6156_v62  ;;  %v6180_v20 = vmin.f32 %v2084_v12, 16.0  ;;  %v2230_v10 = vld [vmem:[%s7119_s16 + $0x90] sm:$0xff] }
 0x93d   : > { %v2124_v21 = vmul.f32 %v6174_v14, %v6174_v14  ;;  %2284 = vmatpush.msra.mxu2 %v2230_v10 }
 0x93e   : > { %v2049_v25 = vadd.f32 0.0036580483, %v2048_v18  ;;  %v2060_v27 = vadd.f32 0.014752088, %v2059_v19  ;;  %v2033_v28 = vpop.f32.mrf.mxu3  ;;  %v2086_v29 = vmul.f32 2.1237322e-06, %v6180_v20 }
 0x93f   : > { %v2097_v30 = vmul.f32 3.8918573e-05, %v6180_v20  ;;  %v6188_v31 = vmin.f32 %v2124_v21, 16.0  ;;  %v6190_v32 = vadd.f32 %v2033_v28, %v1981_v8  ;;  %v2213_v8 = vld [vmem:[%s7119_s16 + $0x8] sm:$0xff]  ;;  %2285 = vmatpush.msra.mxu2 %v2229_v16 }
 0x940   : > { %v2050_v33 = vmul.f32 %v2049_v25, %v6156_v62  ;;  %v2061_v34 = vmul.f32 %v2060_v27, %v6156_v62  ;;  %v2087_v36 = vadd.f32 0.00028619796, %v2086_v29  ;;  %2262 = vmatpush.msrb.mxu1 %v2213_v8 }
 0x941   : > { %v2098_v37 = vadd.f32 0.001143296, %v2097_v30  ;;  %v2126_v38 = vmul.f32 2.1237322e-06, %v6188_v31  ;;  %v6201_v46 = vmul.f32 0.70710677, %v6190_v32  ;;  %2286 = vmatpush.msra.mxu2 %v2228_v24 }
 0x942   : > { %v2062_v39 = vadd.f32 0.112945676, %v2061_v34  ;;  %v2051_v42 = vadd.f32 0.05243302, %v2050_v33  ;;  %v2088_v43 = vmul.f32 %v2087_v36, %v6180_v20  ;;  %v2137_v52 = vmul.f32 3.8918573e-05, %v6188_v31  ;;  %2263 = vmatpush.msrb.mxu1 %v2212_v61 }
 0x943   : > { %v2099_v44 = vmul.f32 %v2098_v37, %v6180_v20  ;;  %v2127_v50 = vadd.f32 0.00028619796, %v2126_v38  ;;  %v2164_v55 = vmul.f32 %v6201_v46, %v6201_v46 }
 0x944   : > { %v2063_v49 = vmul.f32 %v2062_v39, %v6156_v62  ;;  %v2089_v11 = vadd.f32 0.0036580483, %v2088_v43  ;;  %v2138_v58 = vadd.f32 0.001143296, %v2137_v52  ;;  %v2052_v1 = vmul.f32 %v2051_v42, %v6156_v62 }
 0x945   : > { %v2100_v54 = vadd.f32 0.014752088, %v2099_v44  ;;  %v6213_v60 = vmin.f32 %v2164_v55, 16.0  ;;  %v2128_v3 = vmul.f32 %v2127_v50, %v6188_v31 }
 0x946   : > { %v2064_v13 = vadd.f32 0.4994258, %v2063_v49  ;;  %v2090_v4 = vmul.f32 %v2089_v11, %v6180_v20  ;;  %v2139_v12 = vmul.f32 %v2138_v58, %v6188_v31  ;;  %v2053_v18 = vadd.f32 0.18741608, %v2052_v1 }
 0x947   : > { %v2101_v59 = vmul.f32 %v2100_v54, %v6180_v20  ;;  %v2166_v9 = vmul.f32 2.1237322e-06, %v6213_v60  ;;  %v2129_v19 = vadd.f32 0.0036580483, %v2128_v3  ;;  %v2177_v28 = vmul.f32 3.8918573e-05, %v6213_v60 }
 0x948   : > { %v2065_v2 = vmul.f32 %v2064_v13, %v6156_v62  ;;  %v2091_v21 = vadd.f32 0.05243302, %v2090_v4  ;;  %v2140_v27 = vadd.f32 0.014752088, %v2139_v12  ;;  %v2054_v30 = vmul.f32 %v2053_v18, %v6156_v62 }
 0x949   : > { %v2102_v26 = vadd.f32 0.112945676, %v2101_v59  ;;  %v2167_v25 = vadd.f32 0.00028619796, %v2166_v9  ;;  %v2130_v17 = vmul.f32 %v2129_v19, %v6188_v31  ;;  %v2178_v34 = vadd.f32 0.001143296, %v2177_v28 }
 0x94a   : > { %v2066_v7 = vadd.f32 1.0, %v2065_v2  ;;  %v2141_v33 = vmul.f32 %v2140_v27, %v6188_v31  ;;  %v2092_v35 = vmul.f32 %v2091_v21, %v6180_v20  ;;  %v2055_v43 = vadd.f32 1.1283791, %v2054_v30 }
 0x94b   : > { %v2103_v15 = vmul.f32 %v2102_v26, %v6180_v20  ;;  %v2168_v38 = vmul.f32 %v2167_v25, %v6213_v60  ;;  %v2179_v41 = vmul.f32 %v2178_v34, %v6213_v60  ;;  %v2131_v44 = vadd.f32 0.05243302, %v2130_v17 }
 0x94c   : > { %5409 = vrcp.f32 %v2066_v7  ;;  %v2142_v39 = vadd.f32 0.112945676, %v2141_v33  ;;  %v2093_v47 = vadd.f32 0.18741608, %v2092_v35  ;;  %v2076_v50 = vand.u32 2147483647, %v2066_v7 }
 0x94d   : > { %v2104_v22 = vadd.f32 0.4994258, %v2103_v15  ;;  %v2180_v49 = vadd.f32 0.014752088, %v2179_v41  ;;  %v2078_v51 = vand.u32 2147483648, %v2066_v7  ;;  %v2056_v8 = vmul.f32 %v2055_v43, %v6147_v56 }
 0x94e   : > { %v2143_v48 = vmul.f32 %v2142_v39, %v6188_v31  ;;  %v2169_v52 = vadd.f32 0.0036580483, %v2168_v38  ;;  %vm2072_vm4 = vweird.f32 %v2066_v7  ;;  %v2094_v58 = vmul.f32 %v2093_v47, %v6180_v20 }
 0x94f   : > { %v2105_v29 = vmul.f32 %v2104_v22, %v6180_v20  ;;  %v2181_v55 = vmul.f32 %v2180_v49, %v6213_v60  ;;  %vm2077_vm6 = vcmp.eq.f32.partialorder %v2076_v50, 8.507059e+37  ;;  %v2079_v0 = vor.u32 1.1754944e-38, %v2078_v51 }
 0x950   : > { %v2144_v54 = vadd.f32 0.4994258, %v2143_v48  ;;  %v2132_v2 = vmul.f32 %v2131_v44, %v6188_v31  ;;  %v2170_v4 = vmul.f32 %v2169_v52, %v6213_v60  ;;  %v2095_v12 = vadd.f32 1.1283791, %v2094_v58 }
 0x951   : > { %v2106_v36 = vadd.f32 1.0, %v2105_v29  ;;  %v2182_v61 = vadd.f32 0.112945676, %v2181_v55  ;;  %v2036_v27 = vmul.f32 0.5, %v6142_v53  ;;  %v2037_v43 = vmul.f32 0.5, %v6158_v63 }
 0x952   : > { %v5410_v37 = vpop.eup %5409  ;;  %v2145_v59 = vmul.f32 %v2144_v54, %v6188_v31  ;;  %v2133_v21 = vadd.f32 0.18741608, %v2132_v2  ;;  %v2171_v22 = vadd.f32 0.05243302, %v2170_v4  ;;  %v2096_v30 = vmul.f32 %v2095_v12, %v6165_v5 }
 0x953   : > { %v2068_v42 = vmul.f32 %v5410_v37, %v2066_v7  ;;  %5411 = vrcp.f32 %v2106_v36  ;;  %vm2073_vm3 = vweird.f32 %v5410_v37  ;;  %v2183_v56 = vmul.f32 %v2182_v61, %v6213_v60 }
 0x954   : > { %vm2074_vm5 = vmor %vm2072_vm4, %vm2073_vm3  ;;  %v2146_v26 = vadd.f32 1.0, %v2145_v59  ;;  %v2118_v20 = vand.u32 2147483648, %v2106_v36  ;;  %v2116_v16 = vand.u32 2147483647, %v2106_v36  ;;  %vm2112_vm8 = vweird.f32 %v2106_v36 }
 0x955   : > { %v2069_v62 = vsub.f32 1.0, %v2068_v42  ;;  %v2184_v18 = vadd.f32 0.4994258, %v2183_v56  ;;  %v2134_v38 = vmul.f32 %v2133_v21, %v6188_v31  ;;  %v2172_v39 = vmul.f32 %v2171_v22, %v6213_v60 }
 0x956   : > { %5413 = vrcp.f32 %v2146_v26  ;;  %v2119_v29 = vor.u32 1.1754944e-38, %v2118_v20  ;;  %vm2117_vm12 = vcmp.eq.f32.partialorder %v2116_v16, 8.507059e+37  ;;  %v2156_v49 = vand.u32 2147483647, %v2146_v26  ;;  %v5342_v16 = vld [vmem:[%s7120_s5] ss:$0 sm:$0xff] }
 0x957   : > { %v2070_v11 = vmul.f32 %v5410_v37, %v2069_v62  ;;  %v2185_v25 = vmul.f32 %v2184_v18, %v6213_v60  ;;  %v2135_v44 = vadd.f32 1.1283791, %v2134_v38  ;;  %v2173_v5 = vadd.f32 0.18741608, %v2172_v39 }
 0x958   : > { %v2158_v62 = vand.u32 2147483648, %v2146_v26  ;;  %vm2152_vm14 = vweird.f32 %v2146_v26  ;;  %vm2157_vm2 = vcmp.eq.f32.partialorder %v2156_v49, 8.507059e+37  ;;  %v2039_v12 = vmul.f32 0.5, %v6190_v32 }
 0x959   : > { %v5412_v57 = vpop.eup %5411  ;;  %v2071_v13 = vadd.f32 %v5410_v37, %v2070_v11  ;;  %v2186_v33 = vadd.f32 1.0, %v2185_v25  ;;  %v2174_v52 = vmul.f32 %v2173_v5, %v6213_v60  ;;  %v2136_v55 = vmul.f32 %v2135_v44, %v6174_v14  ;;  %v4983_v44 = vld [vmem:[%s7105_s29 + $0xd8] sm:$0xff]  ;;  %v4980_v5 = vld [vmem:[%s7105_s29 + $0xc0] sm:$0xff] }
 0x95a   : > { %v2108_v1 = vmul.f32 %v5412_v57, %v2106_v36  ;;  %vm2113_vm7 = vweird.f32 %v5412_v57  ;;  %v2159_v11 = vor.u32 1.1754944e-38, %v2158_v62  ;;  %v2038_v60 = vmul.f32 0.5, %v6167_v6  ;;  %v4981_v62 = vld [vmem:[%s7105_s29 + $0xc8] sm:$0xff] }
 0x95b   : > { %v2075_v3 = vsel %vm2074_vm5, %v5410_v37, %v2071_v13  ;;  %vm2114_vm11 = vmor %vm2112_vm8, %vm2113_vm7  ;;  %5415 = vrcp.f32 %v2186_v33  ;;  %v2198_v58 = vand.u32 2147483648, %v2186_v33  ;;  %v2175_v59 = vadd.f32 1.1283791, %v2174_v52  ;;  %v4974_v52 = vld [vmem:[%s7105_s29 + $0x90] sm:$0xff] }
 0x95c   : > { %v2080_v7 = vsel %vm2077_vm6, %v2079_v0, %v2075_v3  ;;  %v2109_v9 = vsub.f32 1.0, %v2108_v1  ;;  %v5414_v34 = vpop.eup %5413  ;;  %v2196_v0 = vand.u32 2147483647, %v2186_v33  ;;  %vm2192_vm4 = vweird.f32 %v2186_v33 }
 0x95d   : > { %v2081_v10 = vmul.f32 %v2080_v7, %v2056_v8  ;;  %v2148_v41 = vmul.f32 %v5414_v34, %v2146_v26  ;;  %vm2153_vm13 = vweird.f32 %v5414_v34  ;;  %v2199_v14 = vor.u32 1.1754944e-38, %v2198_v58 }
 0x95e   : > { %v2110_v15 = vmul.f32 %v5412_v57, %v2109_v9  ;;  %vm2154_vm15 = vmor %vm2152_vm14, %vm2153_vm13  ;;  %v2176_v4 = vmul.f32 %v2175_v59, %v6201_v46  ;;  %vm2197_vm6 = vcmp.eq.f32.partialorder %v2196_v0, 8.507059e+37 }
 0x95f   : > { %v4968_v19 = vclamps-f32 %v2081_v10, 1.0  ;;  %v2149_v42 = vsub.f32 1.0, %v2148_v41  ;;  %v4987_v41 = vld [vmem:[%s7105_s29 + $0xf8] sm:$0xff] }
 0x960   : > { %v2111_v24 = vadd.f32 %v5412_v57, %v2110_v15  ;;  %2413 = vmatpush.msra.mxu3 %v4987_v41 }
 0x961   : > { %v2204_v28 = vadd.f32 1.0, %v4968_v19  ;;  %v2150_v48 = vmul.f32 %v5414_v34, %v2149_v42  ;;  %v5416_v50 = vpop.eup %5415  ;;  %v4985_v42 = vld [vmem:[%s7105_s29 + $0xe8] sm:$0xff] }
 0x962   : > { %v2115_v17 = vsel %vm2114_vm11, %v5412_v57, %v2111_v24  ;;  %v2188_v54 = vmul.f32 %v5416_v50, %v2186_v33  ;;  %vm2193_vm3 = vweird.f32 %v5416_v50  ;;  %2414 = vmatpush.msra.mxu3 %v4985_v42 }
 0x963   : > { %v2208_v35 = vmul.f32 %v2204_v28, %v2036_v27  ;;  %v2120_v37 = vsel %vm2117_vm12, %v2119_v29, %v2115_v17  ;;  %v2151_v31 = vadd.f32 %v5414_v34, %v2150_v48  ;;  %vm2194_vm5 = vmor %vm2192_vm4, %vm2193_vm3  ;;  %v4979_v48 = vld [vmem:[%s7105_s29 + $0xb8] sm:$0xff] }
 0x964   : > { %v2121_v36 = vmul.f32 %v2120_v37, %v2096_v30  ;;  %v2189_v57 = vsub.f32 1.0, %v2188_v54  ;;  %2415 = vmatpush.msra.mxu3 %v4983_v44 }
 0x965   : > { %2264 = vmatmul.f32.vlgmr.msrb.gmra.mxu1 %v2208_v35  ;;  %v2155_v63 = vsel %vm2154_vm15, %v5414_v34, %v2151_v31 }
 0x966   : > { %v4969_v53 = vclamps-f32 %v2121_v36, 1.0  ;;  %v2160_v8 = vsel %vm2157_vm2, %v2159_v11, %v2155_v63  ;;  %v2190_v61 = vmul.f32 %v5416_v50, %v2189_v57  ;;  %v4986_v36 = vld [vmem:[%s7105_s29 + $0xf0] sm:$0xff]  ;;  %2416 = vmatpush.msra.mxu3 %v4981_v62  ;;  %v4975_v11 = vld [vmem:[%s7105_s29 + $0x98] sm:$0xff]  ;;  %v4973_v63 = vld [vmem:[%s7105_s29 + $0x88] sm:$0xff] }
 0x967   : > { %v2161_v13 = vmul.f32 %v2160_v8, %v2136_v55  ;;  %2390 = vmatpush.msrb.mxu0 %v4986_v36  ;;  %v4972_v55 = vld [vmem:[%s7105_s29 + $0x80] sm:$0xff] }
 0x968   : > { %v2205_v47 = vadd.f32 1.0, %v4969_v53  ;;  %v2191_v2 = vadd.f32 %v5416_v50, %v2190_v61  ;;  %v4984_v53 = vld [vmem:[%s7105_s29 + $0xe0] sm:$0xff]  ;;  %2417 = vmatpush.msra.mxu3 %v4979_v48 }
 0x969   : > { %v4970_v1 = vclamps-f32 %v2161_v13, 1.0  ;;  %2391 = vmatpush.msrb.mxu0 %v4984_v53 }
 0x96a   : > { %v2209_v51 = vmul.f32 %v2205_v47, %v2037_v43  ;;  %v2195_v26 = vsel %vm2194_vm5, %v5416_v50, %v2191_v2  ;;  %v4982_v43 = vld [vmem:[%s7105_s29 + $0xd0] sm:$0xff]  ;;  %v4976_v50 = vld [vmem:[%s7105_s29 + $0xa0] sm:$0xff] }
 0x96b   : > { %v2206_v3 = vadd.f32 1.0, %v4970_v1  ;;  %v2200_v7 = vsel %vm2197_vm6, %v2199_v14, %v2195_v26  ;;  %2392 = vmatpush.msrb.mxu0 %v4982_v43  ;;  %v4978_v47 = vld [vmem:[%s7105_s29 + $0xb0] sm:$0xff] }
 0x96c   : > { %2287 = vmatmul.f32.vlgmr.msra.gmra.mxu2 %v2209_v51  ;;  %v2201_v9 = vmul.f32 %v2200_v7, %v2176_v4  ;;  %v4977_v51 = vld [vmem:[%s7105_s29 + $0xa8] sm:$0xff]  ;;  %v5344_v4 = vld [vmem:[%s7122_s10] ss:$0 sm:$0xff]  ;;  %s7128_s29 = smov 80  }
 0x96d   : > { %v2210_v56 = vmul.f32 %v2206_v3, %v2038_v60  ;;  %2393 = vmatpush.msrb.mxu0 %v4980_v5  ;;  %2418 = vmatpush.msra.mxu3 %v4977_v51  ;;  %v5343_v60 = vld [vmem:[%s7121_s15] ss:$0 sm:$0xff] }
 0x96e   : > { %v4971_v10 = vclamps-f32 %v2201_v9, 1.0 }
 0x96f   : > { %2267 = vmatmul.f32.gmra.mxu1 %v2210_v56  ;;  %2394 = vmatpush.msrb.mxu0 %v4978_v47 }
 0x970   : > { %v2207_v20 = vadd.f32 1.0, %v4971_v10  ;;  %2419 = vmatpush.msra.mxu3 %v4975_v11 }
 0x971   : > { %2395 = vmatpush.msrb.mxu0 %v4976_v50 }
 0x972   : > { %v2211_v15 = vmul.f32 %v2207_v20, %v2039_v12  ;;  %2420 = vmatpush.msra.mxu3 %v4973_v63 }
 0x973   : > { %2396 = vmatpush.msrb.mxu0 %v4974_v52 }
 0x974   : > { %2290 = vmatmul.f32.gmra.mxu2 %v2211_v15 }
 0x975   : > { %2397 = vmatpush.msrb.mxu0 %v4972_v55 }
 0x9e2   : > { %v2265_v6 = vpop.f32.mrf.mxu1 }
 0x9e3   : > { %v2266_v18 = vadd.f32 %v5342_v16, %v2265_v6 }
 0x9ec   : > { %v2268_v24 = vpop.f32.mrf.mxu1 }
 0x9ed   : > { %v2269_v25 = vadd.f32 %v5342_v16, %v2268_v24 }
 0x9ef   : > { %v2288_v19 = vpop.f32.mrf.mxu2 }
 0x9f0   : > { %v2289_v21 = vadd.f32 %v2288_v19, %v2266_v18 }
 0x9f2   : > { %v2294_v22 = vadd.f32 %v2289_v21, %v6120_v40  ;;  %v4988_v21 = vld [vmem:[%s7106_s3 + $0x2] sm:$0x3]  ;;  %s7125_s3 = smov 16  }
 0x9f4   : > { %v2298_v46 = vsel %vm1309_vm1, %v2294_v22, 0.0 }
 0x9f5   : > { %2299 = vadd.xlane.f32.xlu1 %v2298_v46 }
 0x9f7   : > { %v2291_v27 = vpop.f32.mrf.mxu2 }
 0x9f8   : > { %v2292_v28 = vadd.f32 %v2291_v27, %v2269_v25 }
 0x9fa   : > { %v2295_v32 = vadd.f32 %v2292_v28, %v6127_v45 }
 0x9fc   : > { %v2301_v29 = vsel %vm1309_vm1, %v2295_v32, 0.0 }
 0x9fd   : > { %2302 = vadd.xlane.f32.xlu0 %v2301_v29 }
 0xa68   : > { %v2300_v30 = vpop.xlane.xlu1 %2299 }
 0xa69   : > { %v2304_v17 = vmul.f32 %v2300_v30, %v5923_v23 }
 0xa6b   : > { %v2306_v40 = vsub.f32 %v2294_v22, %v2304_v17  ;;  %v2372_v22 = vperm.slane %v4988_v21, 0 }
 0xa6d   : > { %v2308_v33 = vmul.f32 %v2306_v40, %v2306_v40 }
 0xa6f   : > { %v2310_v34 = vsel %vm1309_vm1, %v2308_v33, 0.0 }
 0xa70   : > { %2311 = vadd.xlane.f32.xlu2 %v2310_v34  ;;  %v2303_v35 = vpop.xlane.xlu0 %2302 }
 0xa71   : > { %v2305_v37 = vmul.f32 %v2303_v35, %v5923_v23 }
 0xa73   : > { %v6262_v45 = vsub.f32 %v2295_v32, %v2305_v37  ;;  %v2373_v32 = vperm.slane %v4988_v21, 1 }
 0xa75   : > { %v2309_v38 = vmul.f32 %v6262_v45, %v6262_v45 }
 0xa77   : > { %v2313_v39 = vsel %vm1309_vm1, %v2309_v38, 0.0 }
 0xa78   : > { %2314 = vadd.xlane.f32.xlu1 %v2313_v39 }
 0xae3   : > { %v2312_v49 = vpop.xlane.xlu2 %2311 }
 0xae4   : > { %v2316_v31 = vmul.f32 %v2312_v49, %v5923_v23 }
 0xae6   : > { %v2318_v54 = vadd.f32 1e-12, %v2316_v31 }
 0xae8   : > { %5417 = vrsqrt.f32 %v2318_v54  ;;  %vm2326_vm8 = vweird.f32 %v2318_v54 }
 0xaeb   : > { %v2315_v59 = vpop.xlane.xlu1 %2314 }
 0xaec   : > { %v2317_v0 = vmul.f32 %v2315_v59, %v5923_v23 }
 0xaee   : > { %v5418_v8 = vpop.eup %5417  ;;  %v2319_v2 = vadd.f32 1e-12, %v2317_v0 }
 0xaef   : > { %v2321_v57 = vmul.f32 %v5418_v8, %v2318_v54  ;;  %vm2327_vm7 = vweird.f32 %v5418_v8 }
 0xaf0   : > { %vm2328_vm11 = vmor %vm2326_vm8, %vm2327_vm7  ;;  %5419 = vrsqrt.f32 %v2319_v2  ;;  %vm2336_vm13 = vweird.f32 %v2319_v2 }
 0xaf1   : > { %v2322_v13 = vmul.f32 %v5418_v8, %v2321_v57 }
 0xaf3   : > { %v2323_v58 = vmul.f32 0.5, %v2322_v13 }
 0xaf5   : > { %v2324_v61 = vsub.f32 1.5, %v2323_v58 }
 0xaf6   : > { %v5420_v7 = vpop.eup %5419 }
 0xaf7   : > { %v2325_v1 = vmul.f32 %v5418_v8, %v2324_v61  ;;  %v2331_v9 = vmul.f32 %v5420_v7, %v2319_v2  ;;  %vm2337_vm12 = vweird.f32 %v5420_v7 }
 0xaf8   : > { %vm2338_vm14 = vmor %vm2336_vm13, %vm2337_vm12 }
 0xaf9   : > { %v2329_v3 = vsel %vm2328_vm11, %v5418_v8, %v2325_v1  ;;  %v2332_v10 = vmul.f32 %v5420_v7, %v2331_v9 }
 0xafa   : > { %v2340_v14 = vmul.f32 %v2329_v3, %v2306_v40 }
 0xafb   : > { %v2333_v12 = vmul.f32 0.5, %v2332_v10 }
 0xafc   : > { %v2345_v26 = vmul.f32 %v5343_v60, %v2340_v14 }
 0xafd   : > { %v2334_v20 = vsub.f32 1.5, %v2333_v12 }
 0xafe   : > { %v6287_v56 = vadd.f32 %v5344_v4, %v2345_v26 }
 0xaff   : > { %v2335_v15 = vmul.f32 %v5420_v7, %v2334_v20 }
 0xb00   : > { %4989 = vmatmul.msk.f32.vlgmr.msrb.gmra.mxu0 %vm1309_vm1, %v6287_v56  ;;  %4991 = vmatmul.msk.f32.vlgmr.msra.gmra.mxu3 %vm1309_vm1, %v6287_v56 }
 0xb01   : > { %v2339_v16 = vsel %vm2338_vm14, %v5420_v7, %v2335_v15 }
 0xb02   : > { %v2341_v6 = vmul.f32 %v2339_v16, %v6262_v45 }
 0xb04   : > { %v2346_v18 = vmul.f32 %v5343_v60, %v2341_v6 }
 0xb06   : > { %v6294_v19 = vadd.f32 %v5344_v4, %v2346_v18 }
 0xb08   : > { %4990 = vmatmul.msk.f32.gmra.mxu0 %vm1309_vm1, %v6294_v19  ;;  %4992 = vmatmul.msk.f32.gmra.mxu3 %vm1309_vm1, %v6294_v19 }
 0xb7d   : > { %v2399_v46 = vpop.f32.mrf.mxu0 }
 0xb7e   : > { %v2400_v24 = vadd.f32 %v2399_v46, %v2372_v22 }
 0xb80   : > { %2522 = vrot.lane.b32.xlu0 %v2400_v24, %s7118_s9  ;;  %2430 = vrot.lane.b32.xlu1 %v2400_v24, %s7123_s13 }
 0xb83   : > { %v2422_v25 = vpop.f32.mrf.mxu3 }
 0xb84   : > { %v2423_v30 = vadd.f32 %v2422_v25, %v2373_v32 }
 0xb85   : > { %v2402_v27 = vpop.f32.mrf.mxu0 }
 0xb86   : > { %v2403_v28 = vadd.f32 %v2402_v27, %v2372_v22 }
 0xb88   : > { %2624 = vrot.lane.b32.xlu1 %v2403_v28, %s7124_s17  ;;  %2524 = vrot.lane.b32.xlu2 %v2403_v28, %s7118_s9 }
 0xb89   : > { %2432 = vrot.lane.b32.xlu0 %v2403_v28, %s7123_s13 }
 0xb8b   : > { %v2425_v29 = vpop.f32.mrf.mxu3 }
 0xb8c   : > { %v2426_v17 = vadd.f32 %v2425_v29, %v2373_v32 }
 0xb8e   : > { %2509 = vmatpush.msrb.mxu3 %v2426_v17  ;;  %v6306_v40 = vpack.i.bf16 %v2423_v30, %v2426_v17 }
 0xb90   : > { %2510 = vmatpush.msrb.mxu3 %v2423_v30  ;;  %2720 = vrot.lane.b32.xlu1 %v2400_v24, %s7125_s3 }
 0xb91   : > { %2518 = vrot.lane.b32.xlu2 %v2400_v24, %s7126_s21  ;;  %2622 = vrot.lane.b32.xlu0 %v2400_v24, %s7124_s17 }
 0xb98   : > { %2620 = vrot.lane.b32.xlu1 %v2403_v28, %s7127_s25 }
 0xb99   : > { %2722 = vrot.lane.b32.xlu2 %v2403_v28, %s7125_s3  ;;  %2520 = vrot.lane.b32.xlu0 %v2403_v28, %s7126_s21 }
 0xba1   : > { %2618 = vrot.lane.b32.xlu2 %v2400_v24, %s7127_s25  ;;  %2716 = vrot.lane.b32.xlu0 %v2400_v24, %s7128_s29 }
 0xba9   : > { %2718 = vrot.lane.b32.xlu2 %v2403_v28, %s7128_s29 }
 0xbe2   : > { %v2525_v33 = vpop.permute.xlu2 %2524 }
 0xbe3   : > { %4999 = vmatpush.xpose.msk.msra.mxu1 %vm1451_vm9, %v2525_v33 }
 0xbeb   : > { %v2519_v35 = vpop.permute.xlu2 %2518 }
 0xbf2   : > { %v2523_v34 = vpop.permute.xlu0 %2522  ;;  %v2431_v37 = vpop.permute.xlu1 %2430 }
 0xbf3   : > { %5000 = vmatpush.xpose.msk.msra.mxu1 %vm1451_vm9, %v2523_v34  ;;  %v2723_v45 = vpop.permute.xlu2 %2722 }
 0xbf6   : > { %5001 = vmatmul.msk.f32.vlgmr.msra.gmra.mxu1 %vm1451_vm9, %v2519_v35 }
 0xbf7   : > { %5011 = vmatpush.xpose.msk.msrb.mxu1 %vm1451_vm9, %v2723_v45 }
 0xbfa   : > { %v2625_v38 = vpop.permute.xlu1 %2624 }
 0xbfb   : > { %v2433_v39 = vpop.permute.xlu0 %2432  ;;  %v2619_v42 = vpop.permute.xlu2 %2618 }
 0xbfc   : > { %4993 = vmatpush.xpose.msk.msra.mxu0 %vm1451_vm9, %v2433_v39 }
 0xc00   : > { %4994 = vmatpush.xpose.msk.msra.mxu0 %vm1451_vm9, %v2431_v37 }
 0xc02   : > { %v2721_v36 = vpop.permute.xlu1 %2720 }
 0xc03   : > { %v2623_v41 = vpop.permute.xlu0 %2622  ;;  %4995 = vmatmul.msk.f32.vlgmr.msra.gmra.mxu0 %vm1451_vm9, %v2400_v24  ;;  %5012 = vmatpush.xpose.msk.msrb.mxu1 %vm1451_vm9, %v2721_v36  ;;  %v2719_v5 = vpop.permute.xlu2 %2718 }
 0xc04   : > { %5005 = vmatpush.xpose.msk.msrb.mxu0 %vm1451_vm9, %v2625_v38 }
 0xc08   : > { %5006 = vmatpush.xpose.msk.msrb.mxu0 %vm1451_vm9, %v2623_v41 }
 0xc0a   : > { %v2621_v44 = vpop.permute.xlu1 %2620 }
 0xc0b   : > { %v2521_v53 = vpop.permute.xlu0 %2520  ;;  %4996 = vmatmul.msk.f32.gmra.mxu0 %vm1451_vm9, %v2403_v28 }
 0xc0c   : > { %5002 = vmatmul.msk.f32.gmra.mxu1 %vm1451_vm9, %v2521_v53 }
 0xc13   : > { %v2717_v43 = vpop.permute.xlu0 %2716  ;;  %5007 = vmatmul.msk.f32.vlgmr.msrb.gmra.mxu0 %vm1451_vm9, %v2619_v42 }
 0xc14   : > { %5013 = vmatmul.msk.f32.vlgmr.msrb.gmra.mxu1 %vm1451_vm9, %v2717_v43 }
 0xc1b   : > { %5008 = vmatmul.msk.f32.gmra.mxu0 %vm1451_vm9, %v2621_v44 }
 0xc1c   : > { %5014 = vmatmul.msk.f32.gmra.mxu1 %vm1451_vm9, %v2719_v5 }
 0xc73   : > { %v2551_v62 = vpop.f32.mrf.mxu1 }
 0xc74   : > { %v2557_v47 = vmul.f32 0.25, %v2551_v62 }
 0xc76   : > { %v2559_v48 = vsel %vm1451_vm9, %v2557_v47, -inf }
 0xc77   : > { %2560 = vmax.xlane.f32.xlu1 %v2559_v48 }
 0xc80   : > { %v2459_v49 = vpop.f32.mrf.mxu0 }
 0xc81   : > { %v2465_v50 = vmul.f32 0.25, %v2459_v49 }
 0xc83   : > { %v2467_v51 = vsel %vm1451_vm9, %v2465_v50, -inf }
 0xc84   : > { %2468 = vmax.xlane.f32.xlu0 %v2467_v51 }
 0xc88   : > { %v2462_v31 = vpop.f32.mrf.mxu0 }
 0xc89   : > { %v2466_v52 = vmul.f32 0.25, %v2462_v31  ;;  %v2554_v11 = vpop.f32.mrf.mxu1 }
 0xc8a   : > { %v2558_v54 = vmul.f32 0.25, %v2554_v11 }
 0xc8b   : > { %v2470_v55 = vsel %vm1451_vm9, %v2466_v52, -inf }
 0xc8c   : > { %2471 = vmax.xlane.f32.xlu2 %v2470_v55  ;;  %v2562_v63 = vsel %vm1451_vm9, %v2558_v54, -inf }
 0xc8d   : > { %2563 = vmax.xlane.f32.xlu0 %v2562_v63 }
 0xc90   : > { %v2651_v8 = vpop.f32.mrf.mxu0 }
 0xc91   : > { %v2657_v57 = vmul.f32 0.25, %v2651_v8  ;;  %v2749_v13 = vpop.f32.mrf.mxu1 }
 0xc92   : > { %v2755_v58 = vmul.f32 0.25, %v2749_v13 }
 0xc93   : > { %v2659_v59 = vsel %vm1451_vm9, %v2657_v57, -inf }
 0xc94   : > { %2660 = vmax.xlane.f32.xlu1 %v2659_v59  ;;  %v2757_v61 = vsel %vm1451_vm9, %v2755_v58, -inf }
 0xc95   : > { %2758 = vmax.xlane.f32.xlu2 %v2757_v61 }
 0xc98   : > { %v2654_v0 = vpop.f32.mrf.mxu0 }
 0xc99   : > { %v2658_v1 = vmul.f32 0.25, %v2654_v0  ;;  %v2752_v2 = vpop.f32.mrf.mxu1 }
 0xc9a   : > { %v2756_v60 = vmul.f32 0.25, %v2752_v2 }
 0xc9b   : > { %v2662_v3 = vsel %vm1451_vm9, %v2658_v1, -inf }
 0xc9c   : > { %2663 = vmax.xlane.f32.xlu0 %v2662_v3  ;;  %v2760_v14 = vsel %vm1451_vm9, %v2756_v60, -inf }
 0xc9d   : > { %2761 = vmax.xlane.f32.xlu1 %v2760_v14 }
 0xcad   : > { %5322 = vrot.lane.b32.xlu2 %v6306_v40, %s7126_s21 }
 0xcea   : > { %v2561_v4 = vpop.xlane.xlu1 %2560 }
 0xceb   : > { %v2565_v26 = vsub.f32 %v2557_v47, %v2561_v4 }
 0xced   : > { %v2567_v7 = vmul.f32 1.442695, %v2565_v26 }
 0xcef   : > { %5421 = vpow2.f32 %v2567_v7 }
 0xcf5   : > { %v5422_v9 = vpop.eup %5421 }
 0xcf6   : > { %v2571_v10 = vsel %vm1451_vm9, %v5422_v9, 0.0 }
 0xcf7   : > { %2572 = vadd.xlane.f32.xlu0 %v2571_v10  ;;  %v2469_v12 = vpop.xlane.xlu0 %2468 }
 0xcf8   : > { %v2473_v20 = vsub.f32 %v2465_v50, %v2469_v12 }
 0xcfa   : > { %v2475_v15 = vmul.f32 1.442695, %v2473_v20 }
 0xcfc   : > { %5423 = vpow2.f32 %v2475_v15 }
 0xcff   : > { %v2472_v16 = vpop.xlane.xlu2 %2471 }
 0xd00   : > { %v2474_v6 = vsub.f32 %v2466_v52, %v2472_v16  ;;  %v2564_v18 = vpop.xlane.xlu0 %2563 }
 0xd01   : > { %v2566_v21 = vsub.f32 %v2558_v54, %v2564_v18 }
 0xd02   : > { %v5424_v22 = vpop.eup %5423  ;;  %v2477_v46 = vmul.f32 1.442695, %v2474_v6 }
 0xd03   : > { %v2569_v24 = vmul.f32 1.442695, %v2566_v21  ;;  %v2479_v25 = vsel %vm1451_vm9, %v5424_v22, 0.0 }
 0xd04   : > { %5425 = vpow2.f32 %v2477_v46  ;;  %2480 = vadd.xlane.f32.xlu2 %v2479_v25 }
 0xd05   : > { %5427 = vpow2.f32 %v2569_v24 }
 0xd07   : > { %v2661_v27 = vpop.xlane.xlu1 %2660 }
 0xd08   : > { %v2665_v28 = vsub.f32 %v2657_v57, %v2661_v27  ;;  %v2759_v32 = vpop.xlane.xlu2 %2758 }
 0xd09   : > { %v2763_v29 = vsub.f32 %v2755_v58, %v2759_v32 }
 0xd0a   : > { %v5426_v30 = vpop.eup %5425  ;;  %v2667_v17 = vmul.f32 1.442695, %v2665_v28 }
 0xd0b   : > { %v5428_v33 = vpop.eup %5427  ;;  %v2765_v34 = vmul.f32 1.442695, %v2763_v29  ;;  %v2482_v35 = vsel %vm1451_vm9, %v5426_v30, 0.0 }
 0xd0c   : > { %5429 = vpow2.f32 %v2667_v17  ;;  %2483 = vadd.xlane.f32.xlu1 %v2482_v35  ;;  %v2574_v37 = vsel %vm1451_vm9, %v5428_v33, 0.0  ;;  %v5023_v17 = vld [vmem:[%s7104_s8 + $0x70] sm:$0xff]  ;;  %v5020_v35 = vld [vmem:[%s7104_s8 + $0x58] sm:$0xff] }
 0xd0d   : > { %5431 = vpow2.f32 %v2765_v34  ;;  %2575 = vadd.xlane.f32.xlu0 %v2574_v37  ;;  %v5021_v34 = vld [vmem:[%s7104_s8 + $0x60] sm:$0xff]  ;;  %v5019_v37 = vld [vmem:[%s7104_s8 + $0x50] sm:$0xff] }
 0xd0f   : > { %v2664_v45 = vpop.xlane.xlu0 %2663 }
 0xd10   : > { %v2666_v38 = vsub.f32 %v2658_v1, %v2664_v45  ;;  %v5323_v39 = vpop.permute.xlu2 %5322  ;;  %v2762_v36 = vpop.xlane.xlu1 %2761  ;;  %v5018_v45 = vld [vmem:[%s7104_s8 + $0x48] sm:$0xff] }
 0xd11   : > { %v5324_v41 = vunpack.i.l.bf16 %v5323_v39  ;;  %v5325_v44 = vunpack.i.h.bf16 %v5323_v39  ;;  %v2764_v5 = vsub.f32 %v2756_v60, %v2762_v36 }
 0xd12   : > { %v6347_v53 = vpop.eup %5429  ;;  %v2669_v42 = vmul.f32 1.442695, %v2666_v38  ;;  %v5017_v38 = vld [vmem:[%s7104_s8 + $0x40] sm:$0xff] }
 0xd13   : > { %v5432_v43 = vpop.eup %5431  ;;  %2609 = vmatpush.msrb.mxu2 %v5324_v41  ;;  %v2671_v62 = vsel %vm1451_vm9, %v6347_v53, 0.0  ;;  %v2767_v48 = vmul.f32 1.442695, %v2764_v5 }
 0xd14   : > { %5433 = vpow2.f32 %v2669_v42  ;;  %2672 = vadd.xlane.f32.xlu1 %v2671_v62  ;;  %v2769_v47 = vsel %vm1451_vm9, %v5432_v43, 0.0 }
 0xd15   : > { %2610 = vmatpush.msrb.mxu2 %v5325_v44  ;;  %2770 = vadd.xlane.f32.xlu0 %v2769_v47  ;;  %5435 = vpow2.f32 %v2767_v48 }
 0xd1a   : > { %v5434_v49 = vpop.eup %5433 }
 0xd1b   : > { %v2674_v50 = vsel %vm1451_vm9, %v5434_v49, 0.0  ;;  %v5436_v51 = vpop.eup %5435 }
 0xd1c   : > { %5332 = vrot.lane.b32.xlu2 %v6306_v40, %s7128_s29  ;;  %v2772_v31 = vsel %vm1451_vm9, %v5436_v51, 0.0 }
 0xd1d   : > { %2675 = vadd.xlane.f32.xlu0 %v2674_v50  ;;  %v5345_v50 = vld [vmem:[%s7103_s14 + $0x1] ss:$0 sm:$0xff]  ;;  %s7132_s14 = sld [smem:[#allocation32_spill]] }
 0xd25   : > { %2773 = vadd.xlane.f32.xlu0 %v2772_v31 }
 0xd2d   : > { %5327 = vrot.lane.b32.xlu1 %v6306_v40, %s7127_s25 }
 0xd6a   : > { %v2573_v52 = vpop.xlane.xlu0 %2572 }
 0xd6b   : > { %5437 = vrcp.f32 %v2573_v52 }
 0xd71   : > { %v5438_v11 = vpop.eup %5437 }
 0xd72   : > { %v2579_v54 = vmul.f32 %v5438_v11, %v5422_v9 }
 0xd74   : > { %5003 = vmatmul.msk.f32.vlgmr.msrb.gmra.mxu2 %vm1451_vm9, %v2579_v54 }
 0xd77   : > { %v2481_v55 = vpop.xlane.xlu2 %2480 }
 0xd78   : > { %5439 = vrcp.f32 %v2481_v55 }
 0xd7e   : > { %v5440_v63 = vpop.eup %5439 }
 0xd7f   : > { %v2487_v8 = vmul.f32 %v5440_v63, %v5424_v22  ;;  %v5333_v57 = vpop.permute.xlu2 %5332  ;;  %v2484_v13 = vpop.xlane.xlu1 %2483 }
 0xd80   : > { %v5334_v58 = vunpack.i.l.bf16 %v5333_v57  ;;  %5441 = vrcp.f32 %v2484_v13  ;;  %v2576_v59 = vpop.xlane.xlu0 %2575  ;;  %v5335_v61 = vunpack.i.h.bf16 %v5333_v57 }
 0xd81   : > { %5443 = vrcp.f32 %v2576_v59  ;;  %4997 = vmatmul.msk.f32.vlgmr.msrb.gmra.mxu3 %vm1451_vm9, %v2487_v8 }
 0xd82   : > { %2805 = vmatpush.msra.mxu2 %v5334_v58 }
 0xd84   : > { %2806 = vmatpush.msra.mxu2 %v5335_v61 }
 0xd86   : > { %v5442_v40 = vpop.eup %5441 }
 0xd87   : > { %v5444_v0 = vpop.eup %5443  ;;  %v2488_v1 = vmul.f32 %v5442_v40, %v5426_v30  ;;  %v2673_v26 = vpop.xlane.xlu1 %2672  ;;  %v5024_v30 = vld [vmem:[%s7104_s8 + $0x78] sm:$0xff] }
 0xd88   : > { %v2771_v2 = vpop.xlane.xlu0 %2770  ;;  %v2580_v60 = vmul.f32 %v5444_v0, %v5428_v33  ;;  %2872 = vmatpush.msra.mxu0 %v5024_v30  ;;  %v5022_v33 = vld [vmem:[%s7104_s8 + $0x68] sm:$0xff]  ;;  %s7046_s8 = sshll.u32 %s5909_s26, 3 }
 0xd89   : > { %5445 = vrcp.f32 %v2771_v2  ;;  %4998 = vmatmul.msk.f32.gmra.mxu3 %vm1451_vm9, %v2488_v1  ;;  %s6396_s2 = scalar_lea.vmem %s7129_s18, %s7046_s8  ;;  %s7130_s18 = sld [smem:[#allocation27_spill]] }
 0xd8a   : > { %5004 = vmatmul.msk.f32.gmra.mxu2 %vm1451_vm9, %v2580_v60  ;;  %2873 = vmatpush.msra.mxu0 %v5023_v17  ;;  %v3406_v55 = vld [vmem:[%s6396_s2] sm:$0xff]  ;;  %s7131_s8 = sld [smem:[#allocation31_spill]] }
 0xd8b   : > { %v3421_v57 = vsel %vm1309_vm1, %v3406_v55, 0.0 }
 0xd8c   : > { %2874 = vmatpush.msra.mxu0 %v5022_v33 }
 0xd8e   : > { %2875 = vmatpush.msra.mxu0 %v5021_v34 }
 0xd8f   : > { %v5446_v3 = vpop.eup %5445  ;;  %v3463_v30 = vld [vmem:[%s7130_s18 + $0x60] sm:$0xff]  ;;  %v3461_v34 = vld [vmem:[%s7130_s18 + $0x50] sm:$0xff] }
 0xd90   : > { %v2777_v14 = vmul.f32 %v5446_v3, %v5432_v43  ;;  %v2676_v4 = vpop.xlane.xlu0 %2675  ;;  %2876 = vmatpush.msra.mxu0 %v5020_v35  ;;  %v3459_v35 = vld [vmem:[%s7130_s18 + $0x40] sm:$0xff] }
 0xd92   : > { %5015 = vmatmul.msk.f32.vlgmr.msra.gmra.mxu2 %vm1451_vm9, %v2777_v14  ;;  %2877 = vmatpush.msra.mxu0 %v5019_v37 }
 0xd94   : > { %2878 = vmatpush.msra.mxu0 %v5018_v45  ;;  %v3457_v45 = vld [vmem:[%s7130_s18 + $0x30] sm:$0xff] }
 0xd96   : > { %2879 = vmatpush.msra.mxu0 %v5017_v38  ;;  %v3455_v38 = vld [vmem:[%s7130_s18 + $0x20] sm:$0xff] }
 0xd98   : > { %v2774_v7 = vpop.xlane.xlu0 %2773 }
 0xd99   : > { %5447 = vrcp.f32 %v2774_v7 }
 0xd9a   : > { %5449 = vrcp.f32 %v2673_v26 }
 0xd9b   : > { %5451 = vrcp.f32 %v2676_v4 }
 0xd9f   : > { %v5448_v9 = vpop.eup %5447  ;;  %v5328_v10 = vpop.permute.xlu1 %5327 }
 0xda0   : > { %v5450_v12 = vpop.eup %5449  ;;  %v5329_v20 = vunpack.i.l.bf16 %v5328_v10  ;;  %v2778_v15 = vmul.f32 %v5448_v9, %v5436_v51  ;;  %v5330_v16 = vunpack.i.h.bf16 %v5328_v10  ;;  %v5044_v9 = vld [vmem:[%s7099_s30 + $0xf0] sm:$0xff]  ;;  %v5045_v10 = vld [vmem:[%s7099_s30 + $0xf8] sm:$0xff] }
 0xda1   : > { %v2679_v6 = vmul.f32 %v5450_v12, %v6347_v53  ;;  %v5452_v18 = vpop.eup %5451  ;;  %3008 = vmatpush.msra.mxu1 %v5045_v10  ;;  %v5042_v12 = vld [vmem:[%s7099_s30 + $0xe0] sm:$0xff] }
 0xda2   : > { %2707 = vmatpush.msra.mxu3 %v5329_v20  ;;  %5016 = vmatmul.msk.f32.gmra.mxu2 %vm1451_vm9, %v2778_v15  ;;  %v2680_v21 = vmul.f32 %v5452_v18, %v5434_v49  ;;  %v5043_v20 = vld [vmem:[%s7099_s30 + $0xe8] sm:$0xff]  ;;  %v5040_v15 = vld [vmem:[%s7099_s30 + $0xd0] sm:$0xff] }
 0xda3   : > { %3009 = vmatpush.msra.mxu1 %v5043_v20  ;;  %v5039_v18 = vld [vmem:[%s7099_s30 + $0xc8] sm:$0xff] }
 0xda4   : > { %2708 = vmatpush.msra.mxu3 %v5330_v16  ;;  %v5041_v16 = vld [vmem:[%s7099_s30 + $0xd8] sm:$0xff] }
 0xda5   : > { %5009 = vmatmul.msk.f32.vlgmr.msra.gmra.mxu3 %vm1451_vm9, %v2679_v6  ;;  %3010 = vmatpush.msra.mxu1 %v5041_v16  ;;  %v5038_v6 = vld [vmem:[%s7099_s30 + $0xc0] sm:$0xff] }
 0xda6   : > { %2985 = vmatpush.msrb.mxu3 %v5044_v9  ;;  %v5347_v9 = vld [vmem:[%s7131_s8] ss:$0 sm:$0xff] }
 0xda7   : > { %3011 = vmatpush.msra.mxu1 %v5039_v18 }
 0xda8   : > { %2986 = vmatpush.msrb.mxu3 %v5042_v12 }
 0xdaa   : > { %2987 = vmatpush.msrb.mxu3 %v5040_v15  ;;  %v5349_v15 = vld [vmem:[%s7132_s14] ss:$0 sm:$0xff] }
 0xdac   : > { %2988 = vmatpush.msrb.mxu3 %v5038_v6  ;;  %v5085_v6 = vld [vmem:[%s7119_s16 + $0x1f0] sm:$0xff] }
 0xdad   : > { %5010 = vmatmul.msk.f32.gmra.mxu3 %vm1451_vm9, %v2680_v21  ;;  %v5036_v21 = vld [vmem:[%s7099_s30 + $0xb0] sm:$0xff] }
 0xdae   : > { %2989 = vmatpush.msrb.mxu3 %v5036_v21  ;;  %v5084_v21 = vld [vmem:[%s7119_s16 + $0x1e8] sm:$0xff] }
 0xdf7   : > { %v2612_v22 = vpop.f32.mrf.mxu2 }
 0xdf8   : > { %2816 = vrot.lane.b32.xlu2 %v2612_v22, %s7125_s3  ;;  %v5037_v22 = vld [vmem:[%s7099_s30 + $0xb8] sm:$0xff] }
 0xdf9   : > { %3012 = vmatpush.msra.mxu1 %v5037_v22  ;;  %v5070_v22 = vld [vmem:[%s7119_s16 + $0x178] sm:$0xff] }
 0xdfa   : > { %3237 = vmatpush.msrb.mxu2 %v5070_v22  ;;  %v5060_v22 = vld [vmem:[%s7119_s16 + $0x128] sm:$0xff] }
 0xe04   : > { %v2512_v25 = vpop.f32.mrf.mxu3 }
 0xe0c   : > { %v2515_v27 = vpop.f32.mrf.mxu3 }
 0xe0d   : > { %v2615_v46 = vpop.f32.mrf.mxu2 }
 0xe0e   : > { %2818 = vrot.lane.b32.xlu1 %v2615_v46, %s7125_s3  ;;  %v5034_v46 = vld [vmem:[%s7099_s30 + $0xa0] sm:$0xff] }
 0xe0f   : > { %2990 = vmatpush.msrb.mxu3 %v5034_v46  ;;  %v5083_v46 = vld [vmem:[%s7119_s16 + $0x1e0] sm:$0xff] }
 0xe15   : > { %v2808_v24 = vpop.f32.mrf.mxu2 }
 0xe16   : > { %2832 = vrot.lane.b32.xlu2 %v2808_v24, %s7118_s9  ;;  %v5035_v24 = vld [vmem:[%s7099_s30 + $0xa8] sm:$0xff] }
 0xe17   : > { %3013 = vmatpush.msra.mxu1 %v5035_v24 }
 0xe25   : > { %v2811_v28 = vpop.f32.mrf.mxu2 }
 0xe26   : > { %2834 = vrot.lane.b32.xlu1 %v2811_v28, %s7118_s9  ;;  %v5030_v28 = vld [vmem:[%s7099_s30 + $0x80] sm:$0xff] }
 0xe28   : > { %v2710_v32 = vpop.f32.mrf.mxu3 }
 0xe29   : > { %2824 = vrot.lane.b32.xlu0 %v2710_v32, %s7124_s17  ;;  %v5031_v32 = vld [vmem:[%s7099_s30 + $0x88] sm:$0xff] }
 0xe30   : > { %v2713_v29 = vpop.f32.mrf.mxu3 }
 0xe31   : > { %2826 = vrot.lane.b32.xlu2 %v2713_v29, %s7124_s17  ;;  %v3465_v29 = vld [vmem:[%s7130_s18 + $0x70] sm:$0xff] }
 0xe52   : > { %v2817_v39 = vpop.permute.xlu2 %2816 }
 0xe53   : > { %v2838_v53 = vsel %vm1451_vm9, %v2512_v25, %v2817_v39  ;;  %v5032_v25 = vld [vmem:[%s7099_s30 + $0x90] sm:$0xff] }
 0xe54   : > { %2991 = vmatpush.msrb.mxu3 %v5032_v25  ;;  %v3453_v39 = vld [vmem:[%s7130_s18 + $0x10] sm:$0xff] }
 0xe56   : > { %2992 = vmatpush.msrb.mxu3 %v5030_v28  ;;  %v5082_v28 = vld [vmem:[%s7119_s16 + $0x1d8] sm:$0xff] }
 0xe70   : > { %v2833_v36 = vpop.permute.xlu2 %2832 }
 0xe80   : > { %v2819_v41 = vpop.permute.xlu1 %2818 }
 0xe81   : > { %v2839_v47 = vsel %vm1451_vm9, %v2515_v27, %v2819_v41  ;;  %v5033_v27 = vld [vmem:[%s7099_s30 + $0x98] sm:$0xff] }
 0xe82   : > { %3014 = vmatpush.msra.mxu1 %v5033_v27  ;;  %v5069_v27 = vld [vmem:[%s7119_s16 + $0x170] sm:$0xff] }
 0xe83   : > { %3238 = vmatpush.msrb.mxu2 %v5069_v27 }
 0xe84   : > { %3015 = vmatpush.msra.mxu1 %v5031_v32 }
 0xe86   : > { %3484 = vmatpush.msrb.mxu1 %v3465_v29 }
 0xe88   : > { %3485 = vmatpush.msrb.mxu1 %v3463_v30  ;;  %v5068_v30 = vld [vmem:[%s7119_s16 + $0x168] sm:$0xff] }
 0xe89   : > { %3239 = vmatpush.msrb.mxu2 %v5068_v30 }
 0xe8a   : > { %3486 = vmatpush.msrb.mxu1 %v3461_v34  ;;  %v5067_v34 = vld [vmem:[%s7119_s16 + $0x160] sm:$0xff] }
 0xe8b   : > { %v2827_v5 = vpop.permute.xlu2 %2826  ;;  %3240 = vmatpush.msrb.mxu2 %v5067_v34  ;;  %v5072_v34 = vld [vmem:[%s7119_s16 + $0x188] sm:$0xff] }
 0xe8c   : > { %v2841_v48 = vsel %vm1273_vm0, %v2839_v47, %v2827_v5  ;;  %3487 = vmatpush.msrb.mxu1 %v3459_v35  ;;  %v5080_v35 = vld [vmem:[%s7119_s16 + $0x1c8] sm:$0xff] }
 0xe8e   : > { %3488 = vmatpush.msrb.mxu1 %v3457_v45 }
 0xe90   : > { %3489 = vmatpush.msrb.mxu1 %v3455_v38 }
 0xe92   : > { %3490 = vmatpush.msrb.mxu1 %v3453_v39  ;;  %v5066_v39 = vld [vmem:[%s7119_s16 + $0x158] sm:$0xff] }
 0xe93   : > { %3241 = vmatpush.msrb.mxu2 %v5066_v39 }
 0xe98   : > { %v2835_v62 = vpop.permute.xlu1 %2834 }
 0xe99   : > { %v2843_v49 = vsel %vm1860_vm10, %v2841_v48, %v2835_v62 }
 0xe9b   : > { %v2825_v42 = vpop.permute.xlu0 %2824 }
 0xe9c   : > { %v2840_v43 = vsel %vm1273_vm0, %v2838_v53, %v2825_v42 }
 0xe9d   : > { %v2842_v44 = vsel %vm1860_vm10, %v2840_v43, %v2833_v36  ;;  %v3451_v43 = vld [vmem:[%s7130_s18] sm:$0xff] }
 0xe9e   : > { %5026 = vmatmul.msk.f32.vlgmr.msra.gmra.mxu0 %vm1309_vm1, %v2842_v44  ;;  %3491 = vmatpush.msrb.mxu1 %v3451_v43 }
 0xea6   : > { %5027 = vmatmul.msk.f32.gmra.mxu0 %vm1309_vm1, %v2843_v49 }
 0xf1b   : > { %v2881_v51 = vpop.f32.mrf.mxu0 }
 0xf1c   : > { %v2882_v31 = vadd.f32 %v5345_v50, %v2881_v51 }
 0xf1e   : > { %v2887_v52 = vadd.f32 %v2882_v31, %v6287_v56 }
 0xf20   : > { %v2893_v11 = vsel %vm1309_vm1, %v2887_v52, 0.0 }
 0xf21   : > { %2894 = vadd.xlane.f32.xlu0 %v2893_v11 }
 0xf23   : > { %v2884_v54 = vpop.f32.mrf.mxu0 }
 0xf24   : > { %v2885_v63 = vadd.f32 %v5345_v50, %v2884_v54  ;;  %v5346_v54 = vld [vmem:[%s7101_s19 + $0x1] ss:$0 sm:$0xff]  ;;  %s7142_s19 = sld [smem:[#allocation37_spill]] }
 0xf26   : > { %v2888_v8 = vadd.f32 %v2885_v63, %v6294_v19 }
 0xf28   : > { %v2896_v13 = vsel %vm1309_vm1, %v2888_v8, 0.0 }
 0xf29   : > { %2897 = vadd.xlane.f32.xlu2 %v2896_v13  ;;  %3422 = vadd.xlane.f32.xlu0 %v3421_v57 }
 0xf94   : > { %v2895_v58 = vpop.xlane.xlu0 %2894 }
 0xf95   : > { %v2899_v56 = vmul.f32 %v2895_v58, %v5923_v23  ;;  %v5348_v58 = vld [vmem:[%s7100_s24 + $0x1] ss:$0 sm:$0xff]  ;;  %s7143_s24 = sld [smem:[#allocation38_spill]] }
 0xf97   : > { %v6403_v59 = vsub.f32 %v2887_v52, %v2899_v56 }
 0xf99   : > { %v2903_v61 = vmul.f32 %v6403_v59, %v6403_v59 }
 0xf9b   : > { %v2905_v40 = vsel %vm1309_vm1, %v2903_v61, 0.0 }
 0xf9c   : > { %2906 = vadd.xlane.f32.xlu1 %v2905_v40  ;;  %v2898_v19 = vpop.xlane.xlu2 %2897  ;;  %v3423_v0 = vpop.xlane.xlu0 %3422 }
 0xf9d   : > { %v2900_v1 = vmul.f32 %v2898_v19, %v5923_v23  ;;  %v3424_v2 = vmul.f32 %v3423_v0, %v5923_v23 }
 0xf9f   : > { %v6410_v60 = vsub.f32 %v2888_v8, %v2900_v1  ;;  %v6412_v3 = vsub.f32 %v3406_v55, %v3424_v2 }
 0xfa1   : > { %v2904_v14 = vmul.f32 %v6410_v60, %v6410_v60  ;;  %v3426_v4 = vmul.f32 %v6412_v3, %v6412_v3 }
 0xfa3   : > { %v2908_v26 = vsel %vm1309_vm1, %v2904_v14, 0.0  ;;  %v3427_v7 = vsel %vm1309_vm1, %v3426_v4, 0.0 }
 0xfa4   : > { %2909 = vadd.xlane.f32.xlu2 %v2908_v26  ;;  %3428 = vadd.xlane.f32.xlu1 %v3427_v7 }
0x100f   : > { %v2907_v17 = vpop.xlane.xlu1 %2906 }
0x1010   : > { %v2911_v33 = vmul.f32 %v2907_v17, %v5923_v23  ;;  %v5081_v17 = vld [vmem:[%s7119_s16 + $0x1d0] sm:$0xff] }
0x1012   : > { %v2913_v37 = vadd.f32 1e-12, %v2911_v33 }
0x1014   : > { %5453 = vrsqrt.f32 %v2913_v37  ;;  %vm2921_vm2 = vweird.f32 %v2913_v37 }
0x1017   : > { %v2910_v36 = vpop.xlane.xlu2 %2909  ;;  %v3429_v41 = vpop.xlane.xlu1 %3428 }
0x1018   : > { %v2912_v53 = vmul.f32 %v2910_v36, %v5923_v23  ;;  %v3430_v42 = vmul.f32 %v3429_v41, %v5923_v23  ;;  %v5079_v36 = vld [vmem:[%s7119_s16 + $0x1c0] sm:$0xff] }
0x101a   : > { %v5454_v44 = vpop.eup %5453  ;;  %v2914_v5 = vadd.f32 1e-12, %v2912_v53  ;;  %v3431_v62 = vadd.f32 1e-05, %v3430_v42 }
0x101b   : > { %v2916_v47 = vmul.f32 %v5454_v44, %v2913_v37  ;;  %vm2922_vm15 = vweird.f32 %v5454_v44 }
0x101c   : > { %5455 = vrsqrt.f32 %v2914_v5  ;;  %vm2923_vm3 = vmor %vm2921_vm2, %vm2922_vm15  ;;  %vm3438_vm5 = vweird.f32 %v3431_v62  ;;  %vm2931_vm7 = vweird.f32 %v2914_v5 }
0x101d   : > { %v2917_v48 = vmul.f32 %v5454_v44, %v2916_v47  ;;  %5457 = vrsqrt.f32 %v3431_v62  ;;  %v5078_v47 = vld [vmem:[%s7119_s16 + $0x1b8] sm:$0xff] }
0x101f   : > { %v2918_v49 = vmul.f32 0.5, %v2917_v48 }
0x1021   : > { %v2919_v50 = vsub.f32 1.5, %v2918_v49 }
0x1022   : > { %v5456_v51 = vpop.eup %5455 }
0x1023   : > { %v5458_v31 = vpop.eup %5457  ;;  %v2920_v52 = vmul.f32 %v5454_v44, %v2919_v50  ;;  %v2926_v11 = vmul.f32 %v5456_v51, %v2914_v5  ;;  %vm2932_vm4 = vweird.f32 %v5456_v51  ;;  %v5064_v50 = vld [vmem:[%s7119_s16 + $0x148] sm:$0xff] }
0x1024   : > { %v3433_v55 = vmul.f32 %v5458_v31, %v3431_v62  ;;  %vm3439_vm6 = vweird.f32 %v5458_v31  ;;  %vm2933_vm8 = vmor %vm2931_vm7, %vm2932_vm4 }
0x1025   : > { %v2924_v63 = vsel %vm2923_vm3, %v5454_v44, %v2920_v52  ;;  %v2927_v8 = vmul.f32 %v5456_v51, %v2926_v11  ;;  %vm3440_vm11 = vmor %vm3438_vm5, %vm3439_vm6  ;;  %v5065_v44 = vld [vmem:[%s7119_s16 + $0x150] sm:$0xff] }
0x1026   : > { %v2935_v57 = vmul.f32 %v2924_v63, %v6403_v59  ;;  %v3434_v13 = vmul.f32 %v5458_v31, %v3433_v55  ;;  %3242 = vmatpush.msrb.mxu2 %v5065_v44  ;;  %v5077_v52 = vld [vmem:[%s7119_s16 + $0x1b0] sm:$0xff]  ;;  %v5063_v55 = vld [vmem:[%s7119_s16 + $0x140] sm:$0xff]  ;;  %v5076_v63 = vld [vmem:[%s7119_s16 + $0x1a8] sm:$0xff] }
0x1027   : > { %v2928_v56 = vmul.f32 0.5, %v2927_v8  ;;  %v5058_v44 = vld [vmem:[%s7119_s16 + $0x118] sm:$0xff] }
0x1028   : > { %v2940_v61 = vmul.f32 %v5346_v54, %v2935_v57  ;;  %v3435_v40 = vmul.f32 0.5, %v3434_v13  ;;  %3243 = vmatpush.msrb.mxu2 %v5064_v50 }
0x1029   : > { %v2929_v19 = vsub.f32 1.5, %v2928_v56 }
0x102a   : > { %v3436_v0 = vsub.f32 1.5, %v3435_v40  ;;  %v6450_v1 = vadd.f32 %v5348_v58, %v2940_v61  ;;  %3244 = vmatpush.msrb.mxu2 %v5063_v55 }
0x102b   : > { %v2930_v2 = vmul.f32 %v5456_v51, %v2929_v19  ;;  %v5062_v19 = vld [vmem:[%s7119_s16 + $0x138] sm:$0xff] }
0x102c   : > { %v3437_v14 = vmul.f32 %v5458_v31, %v3436_v0  ;;  %5047 = vmatmul.msk.f32.vlgmr.msrb.gmra.mxu3 %vm1309_vm1, %v6450_v1  ;;  %5049 = vmatmul.msk.f32.vlgmr.msra.gmra.mxu1 %vm1309_vm1, %v6450_v1  ;;  %v5075_v0 = vld [vmem:[%s7119_s16 + $0x1a0] sm:$0xff] }
0x102d   : > { %v2934_v59 = vsel %vm2933_vm8, %v5456_v51, %v2930_v2  ;;  %3245 = vmatpush.msrb.mxu2 %v5062_v19 }
0x102e   : > { %v2936_v4 = vmul.f32 %v2934_v59, %v6410_v60  ;;  %v3441_v26 = vsel %vm3440_vm11, %v5458_v31, %v3437_v14  ;;  %v5086_v60 = vld [vmem:[%s7119_s16 + $0x1f8] sm:$0xff] }
0x102f   : > { %v3442_v10 = vmul.f32 %v3441_v26, %v6412_v3  ;;  %v6472_v3 = vld [vmem:[%s7102_s6 + $0x2] sm:$0x3]  ;;  %3260 = vmatpush.msrb.mxu0 %v5086_v60  ;;  %s7133_s6 = sld [smem:[#allocation28_spill]] }
0x1030   : > { %v2941_v7 = vmul.f32 %v5346_v54, %v2936_v4  ;;  %v2968_v18 = vperm.slane %v6472_v3, 1  ;;  %v2967_v29 = vperm.slane %v6472_v3, 0 }
0x1031   : > { %v3446_v20 = vmul.f32 %v5347_v9, %v3442_v10  ;;  %3261 = vmatpush.msrb.mxu0 %v5085_v6  ;;  %v5061_v10 = vld [vmem:[%s7119_s16 + $0x130] sm:$0xff] }
0x1032   : > { %v6459_v12 = vadd.f32 %v5348_v58, %v2941_v7  ;;  %3246 = vmatpush.msrb.mxu2 %v5061_v10 }
0x1033   : > { %v6466_v16 = vadd.f32 %v5349_v15, %v3446_v20  ;;  %3262 = vmatpush.msrb.mxu0 %v5084_v21  ;;  %v5074_v20 = vld [vmem:[%s7119_s16 + $0x198] sm:$0xff] }
0x1034   : > { %5048 = vmatmul.msk.f32.gmra.mxu3 %vm1309_vm1, %v6459_v12  ;;  %5050 = vmatmul.msk.f32.gmra.mxu1 %vm1309_vm1, %v6459_v12 }
0x1035   : > { %3263 = vmatpush.msrb.mxu0 %v5083_v46  ;;  %v6508_v62 = vld [vmem:[%s7133_s6] sm:$0x3]  ;;  %v5073_v46 = vld [vmem:[%s7119_s16 + $0x190] sm:$0xff]  ;;  %3247 = vmatpush.msrb.mxu2 %v5060_v22 }
0x1036   : > { %v3469_v58 = vperm.slane %v6508_v62, 0 }
0x1037   : > { %3264 = vmatpush.msrb.mxu0 %v5082_v28 }
0x1039   : > { %3265 = vmatpush.msrb.mxu0 %v5081_v17 }
0x103b   : > { %3266 = vmatpush.msrb.mxu0 %v5080_v35 }
0x103c   : > { %5092 = vmatmul.msk.f32.vlgmr.msrb.gmra.mxu1 %vm1309_vm1, %v6466_v16 }
0x103d   : > { %3267 = vmatpush.msrb.mxu0 %v5079_v36 }
0x103f   : > { %3268 = vmatpush.msrb.mxu0 %v5078_v47  ;;  %v5071_v47 = vld [vmem:[%s7119_s16 + $0x180] sm:$0xff] }
0x1041   : > { %3269 = vmatpush.msrb.mxu0 %v5077_v52  ;;  %v5057_v52 = vld [vmem:[%s7119_s16 + $0x110] sm:$0xff] }
0x1043   : > { %3270 = vmatpush.msrb.mxu0 %v5076_v63 }
0x1045   : > { %3271 = vmatpush.msrb.mxu0 %v5075_v0 }
0x1047   : > { %3272 = vmatpush.msrb.mxu0 %v5074_v20 }
0x1049   : > { %3273 = vmatpush.msrb.mxu0 %v5073_v46 }
0x104b   : > { %3274 = vmatpush.msrb.mxu0 %v5072_v34 }
0x104d   : > { %3275 = vmatpush.msrb.mxu0 %v5071_v47 }
0x10a9   : > { %v3017_v24 = vpop.f32.mrf.mxu1 }
0x10aa   : > { %v6479_v25 = vadd.f32 %v3017_v24, %v2968_v18 }
0x10ac   : > { %v6484_v32 = vmul.f32 0.70710677, %v6479_v25 }
0x10ae   : > { %v3071_v33 = vmul.f32 %v6484_v32, %v6484_v32 }
0x10af   : > { %v2994_v37 = vpop.f32.mrf.mxu3 }
0x10b0   : > { %v6493_v45 = vmin.f32 %v3071_v33, 16.0  ;;  %v6495_v38 = vadd.f32 %v2994_v37, %v2967_v29  ;;  %v5059_v33 = vld [vmem:[%s7119_s16 + $0x120] sm:$0xff] }
0x10b1   : > { %v3020_v41 = vpop.f32.mrf.mxu1  ;;  %3248 = vmatpush.msrb.mxu2 %v5059_v33 }
0x10b2   : > { %v3073_v53 = vmul.f32 2.1237322e-06, %v6493_v45  ;;  %v3084_v42 = vmul.f32 3.8918573e-05, %v6493_v45  ;;  %v6501_v43 = vadd.f32 %v3020_v41, %v2968_v18  ;;  %v6505_v5 = vmul.f32 0.70710677, %v6495_v38 }
0x10b3   : > { %3249 = vmatpush.msrb.mxu2 %v5058_v44 }
0x10b4   : > { %v3074_v48 = vadd.f32 0.00028619796, %v3073_v53  ;;  %v3085_v49 = vadd.f32 0.001143296, %v3084_v42  ;;  %v3031_v51 = vmul.f32 %v6505_v5, %v6505_v5  ;;  %v6515_v31 = vmul.f32 0.70710677, %v6501_v43 }
0x10b5   : > { %3250 = vmatpush.msrb.mxu2 %v5057_v52 }
0x10b6   : > { %v3075_v11 = vmul.f32 %v3074_v48, %v6493_v45  ;;  %v3086_v54 = vmul.f32 %v3085_v49, %v6493_v45  ;;  %v6522_v8 = vmin.f32 %v3031_v51, 16.0  ;;  %v3151_v57 = vmul.f32 %v6515_v31, %v6515_v31 }
0x10b7   : > { %v2997_v13 = vpop.f32.mrf.mxu3 }
0x10b8   : > { %v3076_v56 = vadd.f32 0.0036580483, %v3075_v11  ;;  %v3087_v61 = vadd.f32 0.014752088, %v3086_v54  ;;  %v6527_v40 = vadd.f32 %v2997_v13, %v2967_v29  ;;  %v3033_v2 = vmul.f32 2.1237322e-06, %v6522_v8 }
0x10b9   : > { %v3044_v14 = vmul.f32 3.8918573e-05, %v6522_v8  ;;  %v6533_v59 = vmin.f32 %v3151_v57, 16.0  ;;  %v3493_v4 = vpop.f32.mrf.mxu1  ;;  %v5056_v13 = vld [vmem:[%s7119_s16 + $0x108] sm:$0xff] }
0x10ba   : > { %v3077_v26 = vmul.f32 %v3076_v56, %v6493_v45  ;;  %v3088_v7 = vmul.f32 %v3087_v61, %v6493_v45  ;;  %v6538_v9 = vmul.f32 0.70710677, %v6527_v40  ;;  %v3034_v15 = vadd.f32 0.00028619796, %v3033_v2  ;;  %v5055_v56 = vld [vmem:[%s7119_s16 + $0x100] sm:$0xff]  ;;  %3251 = vmatpush.msrb.mxu2 %v5056_v13  ;;  %s7134_s16 = sld [smem:[#allocation26_spill]] }
0x10bb   : > { %v3045_v60 = vadd.f32 0.001143296, %v3044_v14  ;;  %v3153_v3 = vmul.f32 2.1237322e-06, %v6533_v59  ;;  %v6543_v6 = vadd.f32 %v3493_v4, %v3469_v58  ;;  %v3164_v29 = vmul.f32 3.8918573e-05, %v6533_v59 }
0x10bc   : > { %v3089_v18 = vadd.f32 0.112945676, %v3088_v7  ;;  %v3111_v21 = vmul.f32 %v6538_v9, %v6538_v9  ;;  %v3035_v24 = vmul.f32 %v3034_v15, %v6522_v8  ;;  %v3078_v30 = vadd.f32 0.05243302, %v3077_v26  ;;  %3252 = vmatpush.msrb.mxu2 %v5055_v56 }
0x10bd   : > { %v3046_v27 = vmul.f32 %v3045_v60, %v6522_v8  ;;  %v3154_v28 = vadd.f32 0.00028619796, %v3153_v3  ;;  %3717 = vrot.lane.b32.xlu0 %v6543_v6, %s7125_s3  ;;  %3582 = vrot.lane.b32.xlu1 %v6543_v6, %s7118_s9  ;;  %v3165_v36 = vadd.f32 0.001143296, %v3164_v29 }
0x10be   : > { %v3090_v17 = vmul.f32 %v3089_v18, %v6493_v45  ;;  %3580 = vrot.lane.b32.xlu2 %v6543_v6, %s7126_s21  ;;  %v3036_v35 = vadd.f32 0.0036580483, %v3035_v24  ;;  %v6562_v53 = vmin.f32 %v3111_v21, 16.0  ;;  %v3079_v49 = vmul.f32 %v3078_v30, %v6493_v45 }
0x10bf   : > { %v3047_v37 = vadd.f32 0.014752088, %v3046_v27  ;;  %v3155_v39 = vmul.f32 %v3154_v28, %v6533_v59  ;;  %v3166_v48 = vmul.f32 %v3165_v36, %v6533_v59 }
0x10c0   : > { %v3091_v41 = vadd.f32 0.4994258, %v3090_v17  ;;  %v3037_v51 = vmul.f32 %v3036_v35, %v6522_v8  ;;  %v3113_v57 = vmul.f32 2.1237322e-06, %v6562_v53  ;;  %v3080_v19 = vadd.f32 0.18741608, %v3079_v49 }
0x10c1   : > { %v3048_v42 = vmul.f32 %v3047_v37, %v6522_v8  ;;  %v3156_v54 = vadd.f32 0.0036580483, %v3155_v39  ;;  %v3167_v55 = vadd.f32 0.014752088, %v3166_v48  ;;  %v3124_v2 = vmul.f32 3.8918573e-05, %v6562_v53 }
0x10c2   : > { %v3092_v50 = vmul.f32 %v3091_v41, %v6493_v45  ;;  %v3038_v0 = vadd.f32 0.05243302, %v3037_v51  ;;  %v3114_v26 = vadd.f32 0.00028619796, %v3113_v57  ;;  %v3081_v20 = vmul.f32 %v3080_v19, %v6493_v45 }
0x10c3   : > { %v3049_v11 = vadd.f32 0.112945676, %v3048_v42  ;;  %v3168_v61 = vmul.f32 %v3167_v55, %v6533_v59  ;;  %v3157_v4 = vmul.f32 %v3156_v54, %v6533_v59  ;;  %v3125_v3 = vadd.f32 0.001143296, %v3124_v2 }
0x10c4   : > { %v3093_v63 = vadd.f32 1.0, %v3092_v50  ;;  %v3039_v15 = vmul.f32 %v3038_v0, %v6522_v8  ;;  %v3115_v46 = vmul.f32 %v3114_v26, %v6562_v53  ;;  %v3082_v29 = vadd.f32 1.1283791, %v3081_v20 }
0x10c5   : > { %v3050_v58 = vmul.f32 %v3049_v11, %v6522_v8  ;;  %3715 = vrot.lane.b32.xlu0 %v6543_v6, %s7128_s29  ;;  %3517 = vrot.lane.b32.xlu1 %v6543_v6, %s7123_s13  ;;  %v3169_v7 = vadd.f32 0.112945676, %v3168_v61  ;;  %v3158_v21 = vadd.f32 0.05243302, %v3157_v4  ;;  %v3126_v27 = vmul.f32 %v3125_v3, %v6562_v53 }
0x10c6   : > { %5459 = vrcp.f32 %v3093_v63  ;;  %v3040_v30 = vadd.f32 0.18741608, %v3039_v15  ;;  %v3103_v35 = vand.u32 2147483647, %v3093_v63  ;;  %v3105_v37 = vand.u32 2147483648, %v3093_v63 }
0x10c7   : > { %v3051_v14 = vadd.f32 0.4994258, %v3050_v58  ;;  %v3170_v60 = vmul.f32 %v3169_v7, %v6533_v59  ;;  %v3159_v45 = vmul.f32 %v3158_v21, %v6533_v59  ;;  %v3127_v34 = vadd.f32 0.014752088, %v3126_v27 }
0x10c8   : > { %v3116_v39 = vadd.f32 0.0036580483, %v3115_v46  ;;  %v3041_v44 = vmul.f32 %v3040_v30, %v6522_v8  ;;  %vm3099_vm13 = vweird.f32 %v3093_v63  ;;  %v3106_v50 = vor.u32 1.1754944e-38, %v3105_v37 }
0x10c9   : > { %v3052_v10 = vmul.f32 %v3051_v14, %v6522_v8  ;;  %v3171_v24 = vadd.f32 0.4994258, %v3170_v60  ;;  %v3128_v42 = vmul.f32 %v3127_v34, %v6562_v53  ;;  %v3160_v49 = vadd.f32 0.18741608, %v3159_v45 }
0x10ca   : > { %v3117_v52 = vmul.f32 %v3116_v39, %v6562_v53  ;;  %v3083_v11 = vmul.f32 %v3082_v29, %v6484_v32  ;;  %vm3104_vm15 = vcmp.eq.f32.partialorder %v3103_v35, 8.507059e+37  ;;  %v3042_v13 = vadd.f32 1.1283791, %v3041_v44 }
0x10cb   : > { %v3053_v18 = vadd.f32 1.0, %v3052_v10  ;;  %v3172_v33 = vmul.f32 %v3171_v24, %v6533_v59  ;;  %v3129_v55 = vadd.f32 0.112945676, %v3128_v42  ;;  %v3024_v4 = vmul.f32 0.5, %v6479_v25 }
0x10cc   : > { %v5460_v22 = vpop.eup %5459  ;;  %v3118_v2 = vadd.f32 0.05243302, %v3117_v52  ;;  %v3043_v7 = vmul.f32 %v3042_v13, %v6505_v5  ;;  %v3023_v45 = vmul.f32 0.5, %v6495_v38 }
0x10cd   : > { %v3095_v28 = vmul.f32 %v5460_v22, %v3093_v63  ;;  %5461 = vrcp.f32 %v3053_v18  ;;  %vm3100_vm12 = vweird.f32 %v5460_v22  ;;  %v6591_v41 = vadd.f32 1.0, %v3172_v33 }
0x10ce   : > { %vm3101_vm14 = vmor %vm3099_vm13, %vm3100_vm12  ;;  %v3065_v56 = vand.u32 2147483648, %v3053_v18  ;;  %v3161_v63 = vmul.f32 %v3160_v49, %v6533_v59  ;;  %v3130_v61 = vmul.f32 %v3129_v55, %v6562_v53  ;;  %v3063_v0 = vand.u32 2147483647, %v3053_v18 }
0x10cf   : > { %v3096_v17 = vsub.f32 1.0, %v3095_v28  ;;  %5463 = vrcp.f32 %v6591_v41  ;;  %vm3059_vm3 = vweird.f32 %v3053_v18  ;;  %v3185_v27 = vand.u32 2147483648, %v6591_v41 }
0x10d0   : > { %v3131_v26 = vadd.f32 0.4994258, %v3130_v61  ;;  %v3066_v59 = vor.u32 1.1754944e-38, %v3065_v56  ;;  %v3162_v60 = vadd.f32 1.1283791, %v3161_v63  ;;  %vm3064_vm5 = vcmp.eq.f32.partialorder %v3063_v0, 8.507059e+37 }
0x10d1   : > { %v3097_v36 = vmul.f32 %v5460_v22, %v3096_v17  ;;  %v3183_v29 = vand.u32 2147483647, %v6591_v41  ;;  %vm3179_vm7 = vweird.f32 %v6591_v41  ;;  %v3186_v34 = vor.u32 1.1754944e-38, %v3185_v27 }
0x10d2   : > { %v3132_v3 = vmul.f32 %v3131_v26, %v6562_v53  ;;  %v3163_v37 = vmul.f32 %v3162_v60, %v6515_v31  ;;  %v3025_v63 = vmul.f32 0.5, %v6527_v40  ;;  %v5350_v40 = vld [vmem:[%s7120_s5 + $0x1] ss:$0 sm:$0xff]  ;;  %s1253_s5 = scalar_lea.vmem %s7134_s16, %s5909_s26  ;;  %s7136_s16 = sld [smem:[#allocation24_spill]] }
0x10d3   : > { %v5462_v47 = vpop.eup %5461  ;;  %v3098_v48 = vadd.f32 %v5460_v22, %v3097_v36  ;;  %vm3184_vm11 = vcmp.eq.f32.partialorder %v3183_v29, 8.507059e+37  ;;  %v5645_v29 = vmov -1e+09  }
0x10d4   : > { %v3055_v51 = vmul.f32 %v5462_v47, %v3053_v18  ;;  %vm3060_vm2 = vweird.f32 %v5462_v47  ;;  %v3133_v5 = vadd.f32 1.0, %v3132_v3 }
0x10d5   : > { %v3102_v54 = vsel %vm3101_vm14, %v5460_v22, %v3098_v48  ;;  %v5464_v14 = vpop.eup %5463  ;;  %vm3061_vm4 = vmor %vm3059_vm3, %vm3060_vm2  ;;  %v3119_v22 = vmul.f32 %v3118_v2, %v6562_v53 }
0x10d6   : > { %v3107_v57 = vsel %vm3104_vm15, %v3106_v50, %v3102_v54  ;;  %v3056_v58 = vsub.f32 1.0, %v3055_v51  ;;  %v3175_v20 = vmul.f32 %v5464_v14, %v6591_v41  ;;  %vm3180_vm6 = vweird.f32 %v5464_v14 }
0x10d7   : > { %v3108_v8 = vmul.f32 %v3107_v57, %v3083_v11  ;;  %5465 = vrcp.f32 %v3133_v5  ;;  %v3120_v33 = vadd.f32 0.18741608, %v3119_v22  ;;  %vm3181_vm8 = vmor %vm3179_vm7, %vm3180_vm6  ;;  %v3026_v41 = vmul.f32 0.5, %v6501_v43 }
0x10d8   : > { %v3057_v19 = vmul.f32 %v5462_v47, %v3056_v58  ;;  %v3176_v46 = vsub.f32 1.0, %v3175_v20  ;;  %v3145_v11 = vand.u32 2147483648, %v3133_v5  ;;  %v3143_v31 = vand.u32 2147483647, %v3133_v5 }
0x10d9   : > { %v5052_v32 = vclamps-f32 %v3108_v8, 1.0  ;;  %v3121_v48 = vmul.f32 %v3120_v33, %v6562_v53  ;;  %vm3139_vm13 = vweird.f32 %v3133_v5  ;;  %vm3545_vm6 = vcmask 64512  }
0x10da   : > { %v3058_v10 = vadd.f32 %v5462_v47, %v3057_v19  ;;  %v3177_v18 = vmul.f32 %v5464_v14, %v3176_v46  ;;  %v3146_v13 = vor.u32 1.1754944e-38, %v3145_v11  ;;  %vm3144_vm15 = vcmp.eq.f32.partialorder %v3143_v31, 8.507059e+37 }
0x10db   : > { %v3192_v15 = vadd.f32 1.0, %v5052_v32  ;;  %v3122_v52 = vadd.f32 1.1283791, %v3121_v48 }
0x10dc   : > { %v3062_v21 = vsel %vm3061_vm4, %v5462_v47, %v3058_v10  ;;  %v3178_v17 = vadd.f32 %v5464_v14, %v3177_v18 }
0x10dd   : > { %v3196_v25 = vmul.f32 %v3192_v15, %v3024_v4  ;;  %v3067_v24 = vsel %vm3064_vm5, %v3066_v59, %v3062_v21  ;;  %v5466_v47 = vpop.eup %5465  ;;  %v3123_v53 = vmul.f32 %v3122_v52, %v6538_v9 }
0x10de   : > { %v3068_v28 = vmul.f32 %v3067_v24, %v3043_v7  ;;  %v3182_v39 = vsel %vm3181_vm8, %v5464_v14, %v3178_v17  ;;  %v3135_v50 = vmul.f32 %v5466_v47, %v3133_v5  ;;  %vm3140_vm12 = vweird.f32 %v5466_v47 }
0x10df   : > { %3276 = vmatmul.f32.vlgmr.msrb.gmra.mxu0 %v3196_v25  ;;  %v3187_v36 = vsel %vm3184_vm11, %v3186_v34, %v3182_v39  ;;  %vm3141_vm14 = vmor %vm3139_vm13, %vm3140_vm12  ;;  %v3409_v25 = vlaneseq  ;;  %v5644_v24 = vmov 0  }
0x10e0   : > { %v5051_v30 = vclamps-f32 %v3068_v28, 1.0  ;;  %v3188_v44 = vmul.f32 %v3187_v36, %v3163_v37  ;;  %v3136_v51 = vsub.f32 1.0, %v3135_v50 }
0x10e1   : > { %v3410_v5 = vshrl.u32 %v3409_v25, 7  ;;  %v3412_v28 = vand.u32 127, %v3409_v25  ;;  %v3454_v25 = vld [vmem:[%s7130_s18 + $0x18] sm:$0xff] }
0x10e2   : > { %v3191_v35 = vadd.f32 1.0, %v5051_v30  ;;  %v5054_v49 = vclamps-f32 %v3188_v44, 1.0  ;;  %v3137_v55 = vmul.f32 %v5466_v47, %v3136_v51 }
0x10e3   : > { %vm3413_vm3 = vcmp.le.s32.totalorder %v3412_v28, %v3410_v5 }
0x10e4   : > { %v3195_v42 = vmul.f32 %v3191_v35, %v3023_v45  ;;  %v3194_v38 = vadd.f32 1.0, %v5054_v49  ;;  %v3138_v57 = vadd.f32 %v5466_v47, %v3137_v55 }
0x10e6   : > { %3253 = vmatmul.f32.vlgmr.msrb.gmra.mxu2 %v3195_v42  ;;  %v3198_v54 = vmul.f32 %v3194_v38, %v3026_v41  ;;  %v3142_v58 = vsel %vm3141_vm14, %v5466_v47, %v3138_v57 }
0x10e7   : > { %v3147_v8 = vsel %vm3144_vm15, %v3146_v13, %v3142_v58 }
0x10e8   : > { %3279 = vmatmul.f32.gmra.mxu0 %v3198_v54  ;;  %v3148_v56 = vmul.f32 %v3147_v8, %v3123_v53 }
0x10ea   : > { %v5053_v43 = vclamps-f32 %v3148_v56, 1.0 }
0x10ec   : > { %v3193_v61 = vadd.f32 1.0, %v5053_v43 }
0x10ee   : > { %v3197_v19 = vmul.f32 %v3193_v61, %v3025_v63 }
0x10f0   : > { %3256 = vmatmul.f32.gmra.mxu2 %v3197_v19 }
0x1118   : > { %v3581_v14 = vpop.permute.xlu2 %3580 }
0x112f   : > { %v3718_v0 = vpop.permute.xlu0 %3717  ;;  %v3583_v2 = vpop.permute.xlu1 %3582 }
0x1130   : > { %5097 = vmatpush.xpose.msk.msra.mxu2 %vm1451_vm9, %v3583_v2 }
0x1133   : > { %5098 = vmatmul.msk.f32.vlgmr.msra.gmra.mxu2 %vm1451_vm9, %v3581_v14 }
0x1134   : > { %5103 = vmatpush.xpose.msk.msrb.mxu2 %vm1451_vm9, %v3718_v0 }
0x1137   : > { %v3518_v9 = vpop.permute.xlu1 %3517  ;;  %v3716_v4 = vpop.permute.xlu0 %3715 }
0x1138   : > { %5094 = vmatpush.xpose.msk.msra.mxu1 %vm1451_vm9, %v3518_v9 }
0x113b   : > { %5095 = vmatmul.msk.f32.vlgmr.msra.gmra.mxu1 %vm1451_vm9, %v6543_v6  ;;  %5104 = vmatmul.msk.f32.vlgmr.msrb.gmra.mxu2 %vm1451_vm9, %v3716_v4 }
0x115c   : > { %v3277_v7 = vpop.f32.mrf.mxu0 }
0x1165   : > { %v3280_v3 = vpop.f32.mrf.mxu0 }
0x1169   : > { %v3254_v32 = vpop.f32.mrf.mxu2 }
0x116a   : > { %v3255_v26 = vadd.f32 %v5350_v40, %v3254_v32  ;;  %v3466_v32 = vld [vmem:[%s7130_s18 + $0x78] sm:$0xff] }
0x116c   : > { %v3278_v10 = vadd.f32 %v3277_v7, %v3255_v26 }
0x116e   : > { %v3283_v20 = vadd.f32 %v3278_v10, %v6450_v1  ;;  %v3407_v1 = vld [vmem:[%s1253_s5] sm:$0x1]  ;;  %s7135_s5 = sld [smem:[#allocation23_spill]]  ;;  %v3464_v10 = vld [vmem:[%s7130_s18 + $0x68] sm:$0xff] }
0x116f   : > { %vm3408_vm2 = vcmp.gt.f32.partialorder %v3407_v1, 0.0 }
0x1170   : > { %v3289_v15 = vsel %vm1309_vm1, %v3283_v20, 0.0  ;;  %v3414_v27 = vsel %vm3408_vm2, 1, %v5644_v24 }
0x1171   : > { %3290 = vadd.xlane.f32.xlu2 %v3289_v15  ;;  %v3415_v18 = vperm.slane %v3414_v27, 0 }
0x1173   : > { %v3257_v59 = vpop.f32.mrf.mxu2  ;;  %vm3416_vm4 = vcmp.eq.s32.totalorder %v3415_v18, 1  ;;  %v3452_v18 = vld [vmem:[%s7130_s18 + $0x8] sm:$0xff] }
0x1174   : > { %v3258_v60 = vadd.f32 %v5350_v40, %v3257_v59  ;;  %vm3417_vm5 = vmand %vm3413_vm3, %vm3416_vm4  ;;  %v3350_v56 = vld [vmem:[%s7135_s5 + $0x38] sm:$0xff]  ;;  %v3349_v43 = vld [vmem:[%s7135_s5 + $0x30] sm:$0xff] }
0x1175   : > { %v6632_v30 = vsel %vm3417_vm5, 0.0, %v5645_v29  ;;  %3369 = vmatpush.msra.mxu3 %v3350_v56  ;;  %v3348_v63 = vld [vmem:[%s7135_s5 + $0x28] sm:$0xff]  ;;  %v3347_v61 = vld [vmem:[%s7135_s5 + $0x20] sm:$0xff]  ;;  %v3346_v19 = vld [vmem:[%s7135_s5 + $0x18] sm:$0xff] }
0x1176   : > { %v3281_v21 = vadd.f32 %v3280_v3, %v3258_v60  ;;  %v3345_v14 = vld [vmem:[%s7135_s5 + $0x10] sm:$0xff]  ;;  %v3344_v4 = vld [vmem:[%s7135_s5 + $0x8] sm:$0xff]  ;;  %v3343_v40 = vld [vmem:[%s7135_s5] sm:$0xff]  ;;  %s7138_s5 = sld [smem:[#allocation30_spill]] }
0x1177   : > { %3370 = vmatpush.msra.mxu3 %v3349_v43  ;;  %v3460_v60 = vld [vmem:[%s7130_s18 + $0x48] sm:$0xff] }
0x1178   : > { %v3284_v22 = vadd.f32 %v3281_v21, %v6459_v12 }
0x1179   : > { %3371 = vmatpush.msra.mxu3 %v3348_v63 }
0x117a   : > { %v3292_v46 = vsel %vm1309_vm1, %v3284_v22, 0.0 }
0x117b   : > { %3293 = vadd.xlane.f32.xlu0 %v3292_v46  ;;  %3372 = vmatpush.msra.mxu3 %v3347_v61  ;;  %v3456_v46 = vld [vmem:[%s7130_s18 + $0x28] sm:$0xff] }
0x117d   : > { %3373 = vmatpush.msra.mxu3 %v3346_v19 }
0x117f   : > { %3374 = vmatpush.msra.mxu3 %v3345_v14 }
0x1181   : > { %3375 = vmatpush.msra.mxu3 %v3344_v4 }
0x1183   : > { %3376 = vmatpush.msra.mxu3 %v3343_v40 }
0x1185   : > { %3504 = vmatpush.msrb.mxu3 %v3466_v32 }
0x1187   : > { %3505 = vmatpush.msrb.mxu3 %v3464_v10 }
0x1189   : > { %3650 = vrot.lane.b32.xlu2 %v6543_v6, %s7124_s17 }
0x118f   : > { %3648 = vrot.lane.b32.xlu0 %v6543_v6, %s7127_s25 }
0x11b6   : > { %v3605_v12 = vpop.f32.mrf.mxu2 }
0x11b7   : > { %v3608_v17 = vmul.f32 0.25, %v3605_v12 }
0x11b8   : > { %v3540_v37 = vpop.f32.mrf.mxu1 }
0x11b9   : > { %v3609_v45 = vadd.f32 %v3608_v17, %v6632_v30  ;;  %v3543_v36 = vmul.f32 0.25, %v3540_v37  ;;  %v5351_v17 = vld [vmem:[%s7121_s15 + $0x1] ss:$0 sm:$0xff] }
0x11bb   : > { %v3610_v6 = vsel %vm3545_vm6, %v3609_v45, -inf  ;;  %v3544_v47 = vadd.f32 %v3543_v36, %v6632_v30 }
0x11bc   : > { %3611 = vmax.xlane.f32.xlu0 %v3610_v6 }
0x11bd   : > { %v3546_v48 = vsel %vm3545_vm6, %v3544_v47, -inf }
0x11be   : > { %v3740_v38 = vpop.f32.mrf.mxu2 }
0x11bf   : > { %v3743_v52 = vmul.f32 0.25, %v3740_v38 }
0x11c1   : > { %v6652_v54 = vadd.f32 %v3743_v52, %v6632_v30 }
0x11c3   : > { %v3745_v55 = vsel %vm3545_vm6, %v6652_v54, -inf }
0x11e4   : > { %v3291_v33 = vpop.xlane.xlu2 %3290 }
0x11e5   : > { %v3295_v34 = vmul.f32 %v3291_v33, %v5923_v23 }
0x11e7   : > { %v6637_v35 = vsub.f32 %v3283_v20, %v3295_v34  ;;  %v3462_v20 = vld [vmem:[%s7130_s18 + $0x58] sm:$0xff]  ;;  %v5352_v34 = vld [vmem:[%s7122_s10 + $0x1] ss:$0 sm:$0xff]  ;;  %s7139_s10 = sld [smem:[#allocation33_spill]] }
0x11e8   : > { %3506 = vmatpush.msrb.mxu3 %v3462_v20 }
0x11e9   : > { %v3299_v39 = vmul.f32 %v6637_v35, %v6637_v35 }
0x11ea   : > { %3507 = vmatpush.msrb.mxu3 %v3460_v60 }
0x11eb   : > { %v3301_v42 = vsel %vm1309_vm1, %v3299_v39, 0.0 }
0x11ec   : > { %3302 = vadd.xlane.f32.xlu1 %v3301_v42  ;;  %v3651_v44 = vpop.permute.xlu2 %3650 }
0x11ed   : > { %5100 = vmatpush.xpose.msk.msra.mxu0 %vm1451_vm9, %v3651_v44 }
0x11ee   : > { %v3294_v49 = vpop.xlane.xlu0 %3293 }
0x11ef   : > { %v3296_v50 = vmul.f32 %v3294_v49, %v5923_v23 }
0x11f1   : > { %v6646_v41 = vsub.f32 %v3284_v22, %v3296_v50  ;;  %v3458_v22 = vld [vmem:[%s7130_s18 + $0x38] sm:$0xff] }
0x11f2   : > { %3508 = vmatpush.msrb.mxu3 %v3458_v22 }
0x11f3   : > { %v3300_v51 = vmul.f32 %v6646_v41, %v6646_v41 }
0x11f4   : > { %3547 = vmax.xlane.f32.xlu1 %v3546_v48  ;;  %3509 = vmatpush.msrb.mxu3 %v3456_v46 }
0x11f5   : > { %v3304_v11 = vsel %vm1309_vm1, %v3300_v51, 0.0 }
0x11f6   : > { %3305 = vadd.xlane.f32.xlu2 %v3304_v11  ;;  %3510 = vmatpush.msrb.mxu3 %v3454_v25 }
0x11f8   : > { %3511 = vmatpush.msrb.mxu3 %v3452_v18 }
0x11fe   : > { %3746 = vmax.xlane.f32.xlu2 %v3745_v55 }
0x1201   : > { %v3649_v31 = vpop.permute.xlu0 %3648 }
0x1202   : > { %5101 = vmatmul.msk.f32.vlgmr.msra.gmra.mxu0 %vm1451_vm9, %v3649_v31 }
0x122f   : > { %v3612_v57 = vpop.xlane.xlu0 %3611 }
0x1230   : > { %v3613_v13 = vsub.f32 %v3609_v45, %v3612_v57 }
0x1232   : > { %v3614_v53 = vmul.f32 1.442695, %v3613_v13 }
0x1234   : > { %5467 = vpow2.f32 %v3614_v53 }
0x123a   : > { %v6657_v58 = vpop.eup %5467 }
0x123b   : > { %v3616_v8 = vsel %vm3545_vm6, %v6657_v58, 0.0 }
0x123c   : > { %3617 = vadd.xlane.f32.xlu0 %v3616_v8 }
0x125f   : > { %v3303_v0 = vpop.xlane.xlu1 %3302 }
0x1260   : > { %v3307_v2 = vmul.f32 %v3303_v0, %v5923_v23 }
0x1262   : > { %v3309_v9 = vadd.f32 1e-12, %v3307_v2  ;;  %v6699_v2 = vld [vmem:[%s7136_s16] ss:$0 sm:$0xff]  ;;  %s7137_s16 = sld [smem:[#allocation29_spill]] }
0x1264   : > { %5469 = vrsqrt.f32 %v3309_v9  ;;  %vm3317_vm8 = vweird.f32 %v3309_v9 }
0x1267   : > { %v3548_v26 = vpop.xlane.xlu1 %3547 }
0x1268   : > { %v3549_v7 = vsub.f32 %v3544_v47, %v3548_v26  ;;  %v3804_v25 = vld [vmem:[%s7137_s16 + $0x38] sm:$0xff] }
0x1269   : > { %v3306_v27 = vpop.xlane.xlu2 %3305  ;;  %3820 = vmatpush.msrb.mxu0 %v3804_v25  ;;  %v5355_v25 = vld [vmem:[%s7142_s19] ss:$0 sm:$0xff] }
0x126a   : > { %v5470_v15 = vpop.eup %5469  ;;  %v3550_v59 = vmul.f32 1.442695, %v3549_v7  ;;  %v3308_v28 = vmul.f32 %v3306_v27, %v5923_v23  ;;  %v3802_v27 = vld [vmem:[%s7137_s16 + $0x28] sm:$0xff] }
0x126b   : > { %v3312_v3 = vmul.f32 %v5470_v15, %v3309_v9  ;;  %vm3318_vm7 = vweird.f32 %v5470_v15 }
0x126c   : > { %5471 = vpow2.f32 %v3550_v59  ;;  %vm3319_vm11 = vmor %vm3317_vm8, %vm3318_vm7  ;;  %v3310_v45 = vadd.f32 1e-12, %v3308_v28 }
0x126d   : > { %v3313_v21 = vmul.f32 %v5470_v15, %v3312_v3 }
0x126e   : > { %5473 = vrsqrt.f32 %v3310_v45  ;;  %vm3327_vm13 = vweird.f32 %v3310_v45 }
0x126f   : > { %v3314_v1 = vmul.f32 0.5, %v3313_v21 }
0x1271   : > { %v3315_v24 = vsub.f32 1.5, %v3314_v1  ;;  %v3747_v47 = vpop.xlane.xlu2 %3746 }
0x1272   : > { %v6677_v5 = vpop.eup %5471  ;;  %v3748_v50 = vsub.f32 %v6652_v54, %v3747_v47 }
0x1273   : > { %v3316_v12 = vmul.f32 %v5470_v15, %v3315_v24  ;;  %v3552_v29 = vsel %vm3545_vm6, %v6677_v5, 0.0  ;;  %v3803_v24 = vld [vmem:[%s7137_s16 + $0x30] sm:$0xff] }
0x1274   : > { %3553 = vadd.xlane.f32.xlu2 %v3552_v29  ;;  %v5474_v36 = vpop.eup %5473  ;;  %3821 = vmatpush.msrb.mxu0 %v3803_v24  ;;  %v3800_v29 = vld [vmem:[%s7137_s16 + $0x18] sm:$0xff] }
0x1275   : > { %v3320_v6 = vsel %vm3319_vm11, %v5470_v15, %v3316_v12  ;;  %v3322_v42 = vmul.f32 %v5474_v36, %v3310_v45  ;;  %vm3328_vm12 = vweird.f32 %v5474_v36  ;;  %v3801_v12 = vld [vmem:[%s7137_s16 + $0x20] sm:$0xff]  ;;  %v3798_v45 = vld [vmem:[%s7137_s16 + $0x8] sm:$0xff] }
0x1276   : > { %v3331_v33 = vmul.f32 %v3320_v6, %v6637_v35  ;;  %vm3329_vm14 = vmor %vm3327_vm13, %vm3328_vm12  ;;  %v3749_v35 = vmul.f32 1.442695, %v3748_v50  ;;  %3822 = vmatpush.msrb.mxu0 %v3802_v27  ;;  %v3797_v6 = vld [vmem:[%s7137_s16] sm:$0xff] }
0x1277   : > { %v3323_v44 = vmul.f32 %v5474_v36, %v3322_v42 }
0x1278   : > { %v3336_v37 = vmul.f32 %v5351_v17, %v3331_v33  ;;  %5475 = vpow2.f32 %v3749_v35  ;;  %3823 = vmatpush.msrb.mxu0 %v3801_v12 }
0x1279   : > { %v3324_v48 = vmul.f32 0.5, %v3323_v44  ;;  %v5354_v44 = vld [vmem:[%s7138_s5] ss:$0 sm:$0xff] }
0x127a   : > { %v3341_v39 = vadd.f32 %v5352_v34, %v3336_v37  ;;  %3824 = vmatpush.msrb.mxu0 %v3800_v29 }
0x127b   : > { %v3325_v49 = vsub.f32 1.5, %v3324_v48 }
0x127c   : > { %5090 = vmatmul.msk.f32.vlgmr.msra.gmra.mxu3 %vm1309_vm1, %v3341_v39 }
0x127d   : > { %v3326_v38 = vmul.f32 %v5474_v36, %v3325_v49  ;;  %v5531_v49 = vld [vmem:[%s6396_s2] sm:$0xff]  ;;  %s7140_s2 = sld [smem:[#allocation35_spill]] }
0x127e   : > { %v5476_v54 = vpop.eup %5475 }
0x127f   : > { %v3330_v51 = vsel %vm3329_vm14, %v5474_v36, %v3326_v38  ;;  %v3673_v52 = vpop.f32.mrf.mxu0  ;;  %v3751_v8 = vsel %vm3545_vm6, %v5476_v54, 0.0 }
0x1280   : > { %v3676_v11 = vmul.f32 0.25, %v3673_v52  ;;  %v3332_v55 = vmul.f32 %v3330_v51, %v6646_v41 }
0x1282   : > { %v3677_v31 = vadd.f32 %v3676_v11, %v6632_v30  ;;  %v3337_v57 = vmul.f32 %v5351_v17, %v3332_v55  ;;  %v3799_v17 = vld [vmem:[%s7137_s16 + $0x10] sm:$0xff] }
0x1283   : > { %3825 = vmatpush.msrb.mxu0 %v3799_v17  ;;  %s7141_s15 = smov %s7140_s2 }
0x1284   : > { %v3678_v13 = vsel %vm3545_vm6, %v3677_v31, -inf  ;;  %v3342_v53 = vadd.f32 %v5352_v34, %v3337_v57  ;;  %v3880_v57 = vld [vmem:[%s7139_s10 + $0x78] sm:$0xff]  ;;  %v3978_v12 = vld [vmem:[%s7141_s15 + $0xf0] sm:$0xff]  ;;  %v3977_v17 = vld [vmem:[%s7141_s15 + $0xe8] sm:$0xff] }
0x1285   : > { %3679 = vmax.xlane.f32.xlu1 %v3678_v13  ;;  %3826 = vmatpush.msrb.mxu0 %v3798_v45  ;;  %v3877_v13 = vld [vmem:[%s7139_s10 + $0x60] sm:$0xff]  ;;  %v3958_v29 = vld [vmem:[%s7141_s15 + $0x50] sm:$0xff]  ;;  %v3957_v45 = vld [vmem:[%s7141_s15 + $0x48] sm:$0xff] }
0x1286   : > { %5091 = vmatmul.msk.f32.gmra.mxu3 %vm1309_vm1, %v3342_v53  ;;  %3918 = vmatpush.msra.mxu2 %v3880_v57  ;;  %v3878_v53 = vld [vmem:[%s7139_s10 + $0x68] sm:$0xff]  ;;  %v3967_v57 = vld [vmem:[%s7141_s15 + $0x98] sm:$0xff] }
0x1287   : > { %3827 = vmatpush.msrb.mxu0 %v3797_v6  ;;  %v3976_v6 = vld [vmem:[%s7141_s15 + $0xe0] sm:$0xff] }
0x1288   : > { %3919 = vmatpush.msra.mxu2 %v3878_v53  ;;  %v3965_v53 = vld [vmem:[%s7141_s15 + $0x88] sm:$0xff] }
0x128d   : > { %3752 = vadd.xlane.f32.xlu1 %v3751_v8  ;;  %v3876_v8 = vld [vmem:[%s7139_s10 + $0x58] sm:$0xff] }
0x128e   : > { %5093 = vmatmul.msk.f32.vlgmr.msrb.gmra.mxu3 %vm1309_vm1, %v6466_v16  ;;  %v3470_v16 = vperm.slane %v6508_v62, 1  ;;  %3920 = vmatpush.msra.mxu2 %v3876_v8  ;;  %v3964_v8 = vld [vmem:[%s7141_s15 + $0x80] sm:$0xff] }
0x12af   : > { %v3618_v10 = vpop.xlane.xlu0 %3617 }
0x12e7   : > { %v3554_v0 = vpop.xlane.xlu2 %3553 }
0x12f8   : > { %v3680_v56 = vpop.xlane.xlu1 %3679 }
0x12f9   : > { %v3681_v41 = vsub.f32 %v3677_v31, %v3680_v56  ;;  %v3879_v31 = vld [vmem:[%s7139_s10 + $0x70] sm:$0xff]  ;;  %v3873_v56 = vld [vmem:[%s7139_s10 + $0x40] sm:$0xff] }
0x12fb   : > { %v3682_v43 = vmul.f32 1.442695, %v3681_v41  ;;  %v3874_v41 = vld [vmem:[%s7139_s10 + $0x48] sm:$0xff] }
0x12fc   : > { %3921 = vmatpush.msra.mxu2 %v3874_v41 }
0x12fd   : > { %5477 = vpow2.f32 %v3682_v43  ;;  %v3871_v43 = vld [vmem:[%s7139_s10 + $0x30] sm:$0xff] }
0x12fe   : > { %5479 = vrcp.f32 %v3554_v0  ;;  %v3870_v0 = vld [vmem:[%s7139_s10 + $0x28] sm:$0xff] }
0x12ff   : > { %v6695_v63 = vpop.f32.mrf.mxu3 }
0x1300   : > { %v3753_v62 = vpop.xlane.xlu1 %3752 }
0x1303   : > { %v5478_v61 = vpop.eup %5477 }
0x1304   : > { %v3684_v19 = vsel %vm3545_vm6, %v5478_v61, 0.0  ;;  %v5480_v4 = vpop.eup %5479 }
0x1305   : > { %3685 = vadd.xlane.f32.xlu2 %v3684_v19  ;;  %v3556_v26 = vmul.f32 %v5480_v4, %v6677_v5  ;;  %v3869_v19 = vld [vmem:[%s7139_s10 + $0x20] sm:$0xff] }
0x1306   : > { %v3865_v4 = vld [vmem:[%s7139_s10] sm:$0xff] }
0x1309   : > { %v3381_v14 = vpop.f32.mrf.mxu3 }
0x130a   : > { %v6702_v9 = vadd.f32 %v6699_v2, %v3381_v14  ;;  %v3867_v14 = vld [vmem:[%s7139_s10 + $0x10] sm:$0xff] }
0x1311   : > { %v3513_v40 = vpop.f32.mrf.mxu3 }
0x1312   : > { %v3514_v32 = vadd.f32 %v3513_v40, %v3470_v16  ;;  %v3868_v16 = vld [vmem:[%s7139_s10 + $0x18] sm:$0xff]  ;;  %v3866_v40 = vld [vmem:[%s7139_s10 + $0x8] sm:$0xff] }
0x1314   : > { %3622 = vrot.lane.b32.xlu0 %v3514_v32, %s7126_s21  ;;  %3575 = vmatpush.msrb.mxu1 %v3514_v32 }
0x1315   : > { %3756 = vrot.lane.b32.xlu1 %v3514_v32, %s7128_s29  ;;  %5096 = vmatmul.msk.f32.vlgmr.msrb.gmra.mxu1 %vm3545_vm6, %v3556_v26  ;;  %v3962_v26 = vld [vmem:[%s7141_s15 + $0x70] sm:$0xff] }
0x131d   : > { %3689 = vrot.lane.b32.xlu2 %v3514_v32, %s7127_s25  ;;  %v3963_v32 = vld [vmem:[%s7140_s2 + $0x78] sm:$0xff]  ;;  %s7144_s2 = sld [smem:[#allocation34_spill]] }
0x1323   : > { %s7145_s30 = smov %s7144_s2 }
0x1378   : > { %v3686_v7 = vpop.xlane.xlu2 %3685 }
0x1379   : > { %5481 = vrcp.f32 %v3686_v7  ;;  %v3979_v7 = vld [vmem:[%s7141_s15 + $0xf8] sm:$0xff] }
0x137a   : > { %5483 = vrcp.f32 %v3618_v10  ;;  %v3961_v10 = vld [vmem:[%s7141_s15 + $0x68] sm:$0xff]  ;;  %4004 = vmatpush.msra.mxu0 %v3979_v7 }
0x137b   : > { %5485 = vrcp.f32 %v3753_v62 }
0x137c   : > { %4005 = vmatpush.msra.mxu0 %v3978_v12 }
0x137e   : > { %4006 = vmatpush.msra.mxu0 %v3977_v17 }
0x137f   : > { %v5482_v20 = vpop.eup %5481 }
0x1380   : > { %v3688_v15 = vmul.f32 %v5482_v20, %v5478_v61  ;;  %v3690_v59 = vpop.permute.xlu2 %3689  ;;  %v5484_v60 = vpop.eup %5483  ;;  %v3872_v61 = vld [vmem:[%s7139_s10 + $0x38] sm:$0xff]  ;;  %4007 = vmatpush.msra.mxu0 %v3976_v6 }
0x1381   : > { %3710 = vmatpush.msra.mxu1 %v3690_v59  ;;  %v3620_v3 = vmul.f32 %v5484_v60, %v6657_v58  ;;  %v5486_v46 = vpop.eup %5485  ;;  %3922 = vmatpush.msra.mxu2 %v3872_v61 }
0x1382   : > { %5102 = vmatmul.msk.f32.vlgmr.msra.gmra.mxu1 %vm3545_vm6, %v3688_v15  ;;  %v3755_v1 = vmul.f32 %v5486_v46, %v5476_v54  ;;  %v3875_v54 = vld [vmem:[%s7139_s10 + $0x50] sm:$0xff]  ;;  %v3960_v15 = vld [vmem:[%s7141_s15 + $0x60] sm:$0xff] }
0x1383   : > { %3898 = vmatpush.msrb.mxu1 %v3879_v31  ;;  %3923 = vmatpush.msra.mxu2 %v3870_v0  ;;  %v3948_v31 = vld [vmem:[%s7141_s15] sm:$0xff] }
0x1385   : > { %3899 = vmatpush.msrb.mxu1 %v3877_v13  ;;  %3924 = vmatpush.msra.mxu2 %v3868_v16  ;;  %v3966_v13 = vld [vmem:[%s7141_s15 + $0x90] sm:$0xff] }
0x1386   : > { %v3623_v21 = vpop.permute.xlu0 %3622 }
0x1387   : > { %v3757_v22 = vpop.permute.xlu1 %3756  ;;  %3643 = vmatpush.msra.mxu3 %v3623_v21  ;;  %3900 = vmatpush.msrb.mxu1 %v3875_v54  ;;  %v3881_v54 = vld [vmem:[%s7144_s2] sm:$0x3] }
0x1388   : > { %5099 = vmatmul.msk.f32.vlgmr.msra.gmra.mxu3 %vm3545_vm6, %v3620_v3  ;;  %3925 = vmatpush.msra.mxu2 %v3866_v40 }
0x1389   : > { %3777 = vmatpush.msrb.mxu3 %v3757_v22  ;;  %3901 = vmatpush.msrb.mxu1 %v3873_v56  ;;  %v3883_v56 = vperm.slane %v3881_v54, 0 }
0x138b   : > { %3902 = vmatpush.msrb.mxu1 %v3871_v43  ;;  %3984 = vmatpush.msra.mxu3 %v3963_v32 }
0x138d   : > { %3903 = vmatpush.msrb.mxu1 %v3869_v19  ;;  %3985 = vmatpush.msra.mxu3 %v3962_v26  ;;  %v3884_v19 = vperm.slane %v3881_v54, 1 }
0x138f   : > { %3904 = vmatpush.msrb.mxu1 %v3867_v14  ;;  %3986 = vmatpush.msra.mxu3 %v3961_v10 }
0x1390   : > { %5105 = vmatmul.msk.f32.vlgmr.msrb.gmra.mxu3 %vm3545_vm6, %v3755_v1 }
0x1391   : > { %3905 = vmatpush.msrb.mxu1 %v3865_v4  ;;  %3987 = vmatpush.msra.mxu3 %v3960_v15 }
0x1392   : > { %v3577_v58 = vpop.f32.mrf.mxu1 }
0x13ff   : > { %v3712_v28 = vpop.f32.mrf.mxu1 }
0x140b   : > { %v3645_v5 = vpop.f32.mrf.mxu3 }
0x140c   : > { %3783 = vrot.lane.b32.xlu0 %v3645_v5, %s7125_s3 }
0x1413   : > { %v3779_v18 = vpop.f32.mrf.mxu3 }
0x1414   : > { %3791 = vrot.lane.b32.xlu1 %v3779_v18, %s7118_s9  ;;  %3787 = vrot.lane.b32.xlu0 %v3712_v28, %s7124_s17  ;;  %v3959_v18 = vld [vmem:[%s7141_s15 + $0x58] sm:$0xff] }
0x1415   : > { %3988 = vmatpush.msra.mxu3 %v3959_v18 }
0x1417   : > { %3989 = vmatpush.msra.mxu3 %v3958_v29 }
0x1419   : > { %3990 = vmatpush.msra.mxu3 %v3957_v45 }
0x147e   : > { %v3784_v33 = vpop.permute.xlu0 %3783 }
0x147f   : > { %v3794_v34 = vsel %vm1451_vm9, %v3577_v58, %v3784_v33  ;;  %v5356_v58 = vld [vmem:[%s7143_s24] ss:$0 sm:$0xff] }
0x1480   : > { %v3956_v33 = vld [vmem:[%s7141_s15 + $0x40] sm:$0xff] }
0x1481   : > { %3991 = vmatpush.msra.mxu3 %v3956_v33  ;;  %v5125_v33 = vld [vmem:[%s7130_s18 + $0xf0] sm:$0xff] }
0x1482   : > { %4094 = vmatpush.msra.mxu1 %v5125_v33 }
0x1486   : > { %v3792_v37 = vpop.permute.xlu1 %3791  ;;  %v3788_v39 = vpop.permute.xlu0 %3787 }
0x1487   : > { %v3795_v36 = vsel %vm1273_vm0, %v3794_v34, %v3788_v39  ;;  %v3975_v34 = vld [vmem:[%s7141_s15 + $0xd8] sm:$0xff]  ;;  %v3974_v39 = vld [vmem:[%s7141_s15 + $0xd0] sm:$0xff] }
0x1488   : > { %v3796_v42 = vsel %vm1860_vm10, %v3795_v36, %v3792_v37  ;;  %4008 = vmatpush.msra.mxu0 %v3975_v34  ;;  %v3955_v37 = vld [vmem:[%s7141_s15 + $0x38] sm:$0xff]  ;;  %v3954_v36 = vld [vmem:[%s7141_s15 + $0x30] sm:$0xff]  ;;  %v5123_v34 = vld [vmem:[%s7130_s18 + $0xe0] sm:$0xff] }
0x1489   : > { %5106 = vmatmul.msk.f32.vlgmr.msrb.gmra.mxu0 %vm1309_vm1, %v3796_v42  ;;  %3992 = vmatpush.msra.mxu3 %v3955_v37  ;;  %v3973_v42 = vld [vmem:[%s7141_s15 + $0xc8] sm:$0xff] }
0x148a   : > { %4009 = vmatpush.msra.mxu0 %v3974_v39  ;;  %v5124_v37 = vld [vmem:[%s7130_s18 + $0xe8] sm:$0xff]  ;;  %4095 = vmatpush.msra.mxu1 %v5123_v34  ;;  %v5121_v39 = vld [vmem:[%s7130_s18 + $0xd0] sm:$0xff] }
0x148b   : > { %3993 = vmatpush.msra.mxu3 %v3954_v36  ;;  %v5122_v36 = vld [vmem:[%s7130_s18 + $0xd8] sm:$0xff] }
0x148c   : > { %4010 = vmatpush.msra.mxu0 %v3973_v42  ;;  %4096 = vmatpush.msra.mxu1 %v5121_v39  ;;  %v5119_v42 = vld [vmem:[%s7130_s18 + $0xc0] sm:$0xff] }
0x148e   : > { %4097 = vmatpush.msra.mxu1 %v5119_v42 }
0x1506   : > { %v3829_v47 = vpop.f32.mrf.mxu0 }
0x1507   : > { %v3830_v48 = vadd.f32 %v5354_v44, %v3829_v47  ;;  %v3953_v44 = vld [vmem:[%s7141_s15 + $0x28] sm:$0xff]  ;;  %v3972_v47 = vld [vmem:[%s7141_s15 + $0xc0] sm:$0xff] }
0x1508   : > { %3994 = vmatpush.msra.mxu3 %v3953_v44  ;;  %4011 = vmatpush.msra.mxu0 %v3972_v47  ;;  %v5120_v44 = vld [vmem:[%s7130_s18 + $0xc8] sm:$0xff]  ;;  %v5117_v47 = vld [vmem:[%s7130_s18 + $0xb0] sm:$0xff] }
0x1509   : > { %v6731_v50 = vadd.f32 %v5531_v49, %v3830_v48  ;;  %v3952_v48 = vld [vmem:[%s7141_s15 + $0x20] sm:$0xff]  ;;  %v3971_v49 = vld [vmem:[%s7141_s15 + $0xb8] sm:$0xff]  ;;  %4098 = vmatpush.msra.mxu1 %v5117_v47 }
0x150a   : > { %3995 = vmatpush.msra.mxu3 %v3952_v48  ;;  %4012 = vmatpush.msra.mxu0 %v3971_v49  ;;  %v5118_v48 = vld [vmem:[%s7130_s18 + $0xb8] sm:$0xff]  ;;  %v5115_v49 = vld [vmem:[%s7130_s18 + $0xa0] sm:$0xff] }
0x150b   : > { %v3835_v38 = vsel %vm1309_vm1, %v6731_v50, 0.0  ;;  %4099 = vmatpush.msra.mxu1 %v5115_v49 }
0x150c   : > { %3836 = vadd.xlane.f32.xlu2 %v3835_v38  ;;  %v3951_v38 = vld [vmem:[%s7141_s15 + $0x18] sm:$0xff] }
0x150d   : > { %3996 = vmatpush.msra.mxu3 %v3951_v38  ;;  %v5116_v38 = vld [vmem:[%s7130_s18 + $0xa8] sm:$0xff] }
0x157f   : > { %v3837_v51 = vpop.xlane.xlu2 %3836 }
0x1580   : > { %v3838_v35 = vmul.f32 %v3837_v51, %v5923_v23  ;;  %v3970_v51 = vld [vmem:[%s7141_s15 + $0xb0] sm:$0xff] }
0x1581   : > { %4013 = vmatpush.msra.mxu0 %v3970_v51  ;;  %v5113_v51 = vld [vmem:[%s7130_s18 + $0x90] sm:$0xff] }
0x1582   : > { %v3839_v52 = vsub.f32 %v6731_v50, %v3838_v35  ;;  %v3950_v35 = vld [vmem:[%s7141_s15 + $0x10] sm:$0xff]  ;;  %4100 = vmatpush.msra.mxu1 %v5113_v51 }
0x1583   : > { %3997 = vmatpush.msra.mxu3 %v3950_v35  ;;  %v5114_v35 = vld [vmem:[%s7130_s18 + $0x98] sm:$0xff] }
0x1584   : > { %v3840_v11 = vmul.f32 %v3839_v52, %v3839_v52 }
0x1586   : > { %v3841_v55 = vsel %vm1309_vm1, %v3840_v11, 0.0  ;;  %v3949_v11 = vld [vmem:[%s7141_s15 + $0x8] sm:$0xff] }
0x1587   : > { %3842 = vadd.xlane.f32.xlu0 %v3841_v55  ;;  %v3968_v55 = vld [vmem:[%s7141_s15 + $0xa0] sm:$0xff]  ;;  %3998 = vmatpush.msra.mxu3 %v3949_v11  ;;  %v5112_v11 = vld [vmem:[%s7130_s18 + $0x88] sm:$0xff] }
0x1589   : > { %3999 = vmatpush.msra.mxu3 %v3948_v31 }
0x15fa   : > { %v3843_v20 = vpop.xlane.xlu0 %3842 }
0x15fb   : > { %v3844_v62 = vmul.f32 %v3843_v20, %v5923_v23 }
0x15fd   : > { %v3845_v59 = vadd.f32 1e-05, %v3844_v62 }
0x15ff   : > { %5487 = vrsqrt.f32 %v3845_v59  ;;  %vm3852_vm2 = vweird.f32 %v3845_v59 }
0x1605   : > { %v5488_v60 = vpop.eup %5487 }
0x1606   : > { %v3847_v3 = vmul.f32 %v5488_v60, %v3845_v59  ;;  %vm3853_vm15 = vweird.f32 %v5488_v60 }
0x1607   : > { %vm3854_vm3 = vmor %vm3852_vm2, %vm3853_vm15 }
0x1608   : > { %v3848_v21 = vmul.f32 %v5488_v60, %v3847_v3 }
0x160a   : > { %v3849_v22 = vmul.f32 0.5, %v3848_v21 }
0x160c   : > { %v3850_v46 = vsub.f32 1.5, %v3849_v22 }
0x160e   : > { %v3851_v1 = vmul.f32 %v5488_v60, %v3850_v46 }
0x1610   : > { %v3855_v24 = vsel %vm3854_vm3, %v5488_v60, %v3851_v1 }
0x1611   : > { %v3856_v27 = vmul.f32 %v3855_v24, %v3839_v52  ;;  %v3969_v52 = vld [vmem:[%s7141_s15 + $0xa8] sm:$0xff] }
0x1612   : > { %4014 = vmatpush.msra.mxu0 %v3969_v52  ;;  %v5111_v52 = vld [vmem:[%s7130_s18 + $0x80] sm:$0xff] }
0x1613   : > { %v3860_v5 = vmul.f32 %v5355_v25, %v3856_v27  ;;  %v5357_v25 = vld [vmem:[%s7146_s11] ss:$0 sm:$0xff]  ;;  %4101 = vmatpush.msra.mxu1 %v5111_v52 }
0x1614   : > { %4015 = vmatpush.msra.mxu0 %v3968_v55 }
0x1615   : > { %v3864_v28 = vadd.f32 %v5356_v58, %v3860_v5 }
0x1616   : > { %4016 = vmatpush.msra.mxu0 %v3967_v57 }
0x1617   : > { %5107 = vmatmul.msk.f32.vlgmr.msrb.gmra.mxu1 %vm1309_vm1, %v3864_v28  ;;  %5108 = vmatmul.msk.f32.vlgmr.msra.gmra.mxu2 %vm1309_vm1, %v3864_v28 }
0x1618   : > { %4017 = vmatpush.msra.mxu0 %v3966_v13 }
0x161a   : > { %4018 = vmatpush.msra.mxu0 %v3965_v53 }
0x161c   : > { %4019 = vmatpush.msra.mxu0 %v3964_v8 }
0x1694   : > { %v3907_v41 = vpop.f32.mrf.mxu1 }
0x1695   : > { %v3908_v43 = vadd.f32 %v3907_v41, %v3883_v56 }
0x1697   : > { %v3932_v61 = vmul.f32 0.044715, %v3908_v43  ;;  %v3930_v59 = vmul.f32 0.5, %v3908_v43 }
0x1699   : > { %v3934_v0 = vmul.f32 %v3932_v61, %v3908_v43 }
0x169a   : > { %v3927_v14 = vpop.f32.mrf.mxu2 }
0x169b   : > { %v3936_v16 = vmul.f32 %v3934_v0, %v3908_v43  ;;  %v3928_v4 = vadd.f32 %v3927_v14, %v3884_v19  ;;  %v5359_v0 = vld [vmem:[%s7132_s14 + $0x1] ss:$0 sm:$0xff] }
0x169d   : > { %v3933_v40 = vmul.f32 0.044715, %v3928_v4  ;;  %v3938_v32 = vadd.f32 %v3936_v16, %v3908_v43  ;;  %v3931_v22 = vmul.f32 0.5, %v3928_v4  ;;  %v5358_v43 = vld [vmem:[%s7131_s8 + $0x1] ss:$0 sm:$0xff] }
0x169f   : > { %v3935_v26 = vmul.f32 %v3933_v40, %v3928_v4  ;;  %v3940_v7 = vmul.f32 0.7978846, %v3938_v32 }
0x16a1   : > { %v3937_v10 = vmul.f32 %v3935_v26, %v3928_v4  ;;  %5489 = vtanh.f32 %v3940_v7 }
0x16a3   : > { %v3939_v20 = vadd.f32 %v3937_v10, %v3928_v4  ;;  %v5127_v4 = vld [vmem:[%s7133_s6 + $0x2] sm:$0x3]  ;;  %s5552_s6 = scalar_lea.hbm %s5849_s20, 16 }
0x16a4   : > { %v4079_v40 = vperm.slane %v5127_v4, 0  ;;  %v4080_v7 = vperm.slane %v5127_v4, 1 }
0x16a5   : > { %v3941_v62 = vmul.f32 0.7978846, %v3939_v20 }
0x16a7   : > { %v5490_v15 = vpop.eup %5489  ;;  %5491 = vtanh.f32 %v3941_v62 }
0x16a8   : > { %v3944_v60 = vadd.f32 1.0, %v5490_v15 }
0x16aa   : > { %v3946_v3 = vmul.f32 %v3944_v60, %v3930_v59 }
0x16ac   : > { %4000 = vmatmul.f32.vlgmr.msra.gmra.mxu3 %v3946_v3 }
0x16ad   : > { %v5492_v21 = vpop.eup %5491 }
0x16ae   : > { %v3945_v46 = vadd.f32 1.0, %v5492_v21 }
0x16b0   : > { %v3947_v1 = vmul.f32 %v3945_v46, %v3931_v22 }
0x16b2   : > { %4020 = vmatmul.f32.vlgmr.msra.gmra.mxu0 %v3947_v1 }
0x172f   : > { %v4001_v24 = vpop.f32.mrf.mxu3  ;;  %v4021_v58 = vpop.f32.mrf.mxu0 }
0x1730   : > { %v4002_v27 = vadd.f32 %v5357_v25, %v4001_v24 }
0x1732   : > { %v4022_v5 = vadd.f32 %v4021_v58, %v4002_v27 }
0x1734   : > { %v6794_v28 = vadd.f32 %v4022_v5, %v6731_v50  ;;  %v5126_v50 = vld [vmem:[%s7130_s18 + $0xf8] sm:$0xff] }
0x1735   : > { %4114 = vmatpush.msrb.mxu2 %v5126_v50 }
0x1736   : > { %v4029_v18 = vsel %vm1309_vm1, %v6794_v28, 0.0 }
0x1737   : > { %4030 = vadd.xlane.f32.xlu1 %v4029_v18  ;;  %4115 = vmatpush.msrb.mxu2 %v5124_v37 }
0x1739   : > { %4116 = vmatpush.msrb.mxu2 %v5122_v36 }
0x173b   : > { %4117 = vmatpush.msrb.mxu2 %v5120_v44 }
0x173d   : > { %4118 = vmatpush.msrb.mxu2 %v5118_v48 }
0x173f   : > { %4119 = vmatpush.msrb.mxu2 %v5116_v38 }
0x1741   : > { %4120 = vmatpush.msrb.mxu2 %v5114_v35 }
0x1743   : > { %4121 = vmatpush.msrb.mxu2 %v5112_v11 }
0x17aa   : > { %v4031_v12 = vpop.xlane.xlu1 %4030 }
0x17ab   : > { %v4032_v29 = vmul.f32 %v4031_v12, %v5923_v23 }
0x17ad   : > { %v4033_v17 = vsub.f32 %v6794_v28, %v4032_v29 }
0x17af   : > { %v4034_v45 = vmul.f32 %v4033_v17, %v4033_v17 }
0x17b1   : > { %v4035_v6 = vsel %vm1309_vm1, %v4034_v45, 0.0 }
0x17b2   : > { %4036 = vadd.xlane.f32.xlu2 %v4035_v6 }
0x1825   : > { %v4037_v55 = vpop.xlane.xlu2 %4036 }
0x1826   : > { %v4038_v31 = vmul.f32 %v4037_v55, %v5923_v23 }
0x1828   : > { %v4039_v57 = vadd.f32 1e-05, %v4038_v31 }
0x182a   : > { %5493 = vrsqrt.f32 %v4039_v57  ;;  %vm4046_vm5 = vweird.f32 %v4039_v57 }
0x1830   : > { %v5494_v13 = vpop.eup %5493 }
0x1831   : > { %v4041_v53 = vmul.f32 %v5494_v13, %v4039_v57  ;;  %vm4047_vm4 = vweird.f32 %v5494_v13 }
0x1832   : > { %vm4048_vm7 = vmor %vm4046_vm5, %vm4047_vm4 }
0x1833   : > { %v4042_v54 = vmul.f32 %v5494_v13, %v4041_v53 }
0x1835   : > { %v4043_v8 = vmul.f32 0.5, %v4042_v54 }
0x1837   : > { %v4044_v56 = vsub.f32 1.5, %v4043_v8 }
0x1839   : > { %v4045_v41 = vmul.f32 %v5494_v13, %v4044_v56 }
0x183b   : > { %v4049_v61 = vsel %vm4048_vm7, %v5494_v13, %v4045_v41 }
0x183c   : > { %v4050_v19 = vmul.f32 %v4049_v61, %v4033_v17 }
0x183e   : > { %v4054_v14 = vmul.f32 %v5358_v43, %v4050_v19 }
0x1840   : > { %v4058_v16 = vadd.f32 %v5359_v0, %v4054_v14 }
0x1842   : > { %5128 = vmatmul.msk.f32.vlgmr.msra.gmra.mxu1 %vm1309_vm1, %v4058_v16  ;;  %5129 = vmatmul.msk.f32.vlgmr.msrb.gmra.mxu2 %vm1309_vm1, %v4058_v16 }
0x18bf   : > { %v4103_v32 = vpop.f32.mrf.mxu1 }
0x18c0   : > { %v4104_v26 = vadd.f32 %v4103_v32, %v4079_v40 }
0x18c2   : > { %4127 = vrot.lane.b32.xlu0 %v4104_v26, %s7123_s13 }
0x18c5   : > { %v4123_v10 = vpop.f32.mrf.mxu2 }
0x18c6   : > { %v6824_v20 = vadd.f32 %v4123_v10, %v4080_v7 }
0x18c8   : > { %4184 = vmatpush.msra.mxu2 %v6824_v20 }
0x18ca   : > { %4189 = vrot.lane.b32.xlu0 %v4104_v26, %s7126_s21 }
0x18d2   : > { %4257 = vrot.lane.b32.xlu0 %v4104_v26, %s7127_s25 }
0x18da   : > { %4326 = vrot.lane.b32.xlu0 %v4104_v26, %s7125_s3 }
0x1934   : > { %v4128_v62 = vpop.permute.xlu0 %4127 }
0x1935   : > { %5130 = vmatpush.xpose.msk.msrb.mxu1 %vm1451_vm9, %v4128_v62 }
0x1938   : > { %5131 = vmatmul.msk.f32.vlgmr.msrb.gmra.mxu1 %vm1451_vm9, %v4104_v26 }
0x193c   : > { %v4190_v15 = vpop.permute.xlu0 %4189 }
0x1944   : > { %v4258_v59 = vpop.permute.xlu0 %4257 }
0x194c   : > { %v4327_v60 = vpop.permute.xlu0 %4326 }
0x194d   : > { %5139 = vmatpush.xpose.msk.msrb.mxu0 %vm1451_vm9, %v4327_v60  ;;  %v5148_v60 = vld [vmem:[%s7137_s16 + $0x70] sm:$0xff] }
0x19b5   : > { %v4150_v3 = vpop.f32.mrf.mxu1 }
0x19b6   : > { %v4153_v21 = vmul.f32 0.25, %v4150_v3  ;;  %v5147_v3 = vld [vmem:[%s7137_s16 + $0x68] sm:$0xff] }
0x19b8   : > { %v4154_v22 = vadd.f32 %v4153_v21, %v6632_v30  ;;  %v5146_v21 = vld [vmem:[%s7137_s16 + $0x60] sm:$0xff] }
0x19ba   : > { %v4155_v46 = vsel %vm3545_vm6, %v4154_v22, -inf }
0x19bb   : > { %4156 = vmax.xlane.f32.xlu1 %v4155_v46  ;;  %v5144_v46 = vld [vmem:[%s7137_s16 + $0x50] sm:$0xff] }
0x19d4   : > { %4191 = vrot.lane.b32.xlu1 %v4104_v26, %s7118_s9 }
0x19dc   : > { %4324 = vrot.lane.b32.xlu1 %v4104_v26, %s7128_s29 }
0x1a2e   : > { %v4157_v1 = vpop.xlane.xlu1 %4156 }
0x1a2f   : > { %v4158_v25 = vsub.f32 %v4154_v22, %v4157_v1  ;;  %v5145_v22 = vld [vmem:[%s7137_s16 + $0x58] sm:$0xff]  ;;  %v5143_v1 = vld [vmem:[%s7137_s16 + $0x48] sm:$0xff] }
0x1a31   : > { %v4159_v24 = vmul.f32 1.442695, %v4158_v25 }
0x1a33   : > { %5495 = vpow2.f32 %v4159_v24  ;;  %v5142_v24 = vld [vmem:[%s7137_s16 + $0x40] sm:$0xff] }
0x1a39   : > { %v5496_v27 = vpop.eup %5495 }
0x1a3a   : > { %v4161_v58 = vsel %vm3545_vm6, %v5496_v27, 0.0 }
0x1a3b   : > { %4162 = vadd.xlane.f32.xlu2 %v4161_v58 }
0x1a46   : > { %v4192_v5 = vpop.permute.xlu1 %4191 }
0x1a47   : > { %5133 = vmatpush.xpose.msk.msrb.mxu3 %vm1451_vm9, %v4192_v5 }
0x1a4a   : > { %5134 = vmatmul.msk.f32.vlgmr.msrb.gmra.mxu3 %vm1451_vm9, %v4190_v15 }
0x1a4e   : > { %v4325_v18 = vpop.permute.xlu1 %4324 }
0x1a4f   : > { %5140 = vmatmul.msk.f32.vlgmr.msrb.gmra.mxu0 %vm1451_vm9, %v4325_v18 }
0x1a53   : > { %4259 = vrot.lane.b32.xlu2 %v4104_v26, %s7124_s17 }
0x1aae   : > { %v4163_v12 = vpop.xlane.xlu2 %4162 }
0x1aaf   : > { %5497 = vrcp.f32 %v4163_v12 }
0x1ab5   : > { %v5498_v29 = vpop.eup %5497 }
0x1ab6   : > { %v4165_v17 = vmul.f32 %v5498_v29, %v5496_v27  ;;  %v4260_v45 = vpop.permute.xlu2 %4259 }
0x1ab7   : > { %5136 = vmatpush.xpose.msk.msrb.mxu2 %vm1451_vm9, %v4260_v45 }
0x1ab8   : > { %5132 = vmatmul.msk.f32.vlgmr.msra.gmra.mxu2 %vm3545_vm6, %v4165_v17  ;;  %v5360_v17 = vld [vmem:[%s7138_s5 + $0x1] ss:$0 sm:$0xff] }
0x1ac0   : > { %5137 = vmatmul.msk.f32.vlgmr.msrb.gmra.mxu2 %vm1451_vm9, %v4258_v59  ;;  %v5149_v59 = vld [vmem:[%s7137_s16 + $0x78] sm:$0xff] }
0x1ac1   : > { %4431 = vmatpush.msra.mxu2 %v5149_v59  ;;  %v5203_v59 = vld [vmem:[%s7141_s15 + $0x1f0] sm:$0xff] }
0x1ac3   : > { %4432 = vmatpush.msra.mxu2 %v5148_v60  ;;  %v5188_v60 = vld [vmem:[%s7141_s15 + $0x178] sm:$0xff] }
0x1ac5   : > { %4433 = vmatpush.msra.mxu2 %v5147_v3  ;;  %v5202_v3 = vld [vmem:[%s7141_s15 + $0x1e8] sm:$0xff] }
0x1ac7   : > { %4434 = vmatpush.msra.mxu2 %v5146_v21  ;;  %v5201_v21 = vld [vmem:[%s7141_s15 + $0x1e0] sm:$0xff] }
0x1ac9   : > { %4435 = vmatpush.msra.mxu2 %v5145_v22  ;;  %v5187_v22 = vld [vmem:[%s7141_s15 + $0x170] sm:$0xff] }
0x1acb   : > { %4436 = vmatpush.msra.mxu2 %v5144_v46  ;;  %v5200_v46 = vld [vmem:[%s7141_s15 + $0x1d8] sm:$0xff] }
0x1acc   : > { %v4349_v6 = vpop.f32.mrf.mxu0 }
0x1acd   : > { %v4352_v33 = vmul.f32 0.25, %v4349_v6  ;;  %v4214_v50 = vpop.f32.mrf.mxu3  ;;  %4437 = vmatpush.msra.mxu2 %v5143_v1  ;;  %v5186_v1 = vld [vmem:[%s7141_s15 + $0x168] sm:$0xff] }
0x1ace   : > { %v4217_v34 = vmul.f32 0.25, %v4214_v50 }
0x1acf   : > { %v4353_v37 = vadd.f32 %v4352_v33, %v6632_v30  ;;  %4438 = vmatpush.msra.mxu2 %v5142_v24  ;;  %v5185_v24 = vld [vmem:[%s7141_s15 + $0x160] sm:$0xff] }
0x1ad0   : > { %v4218_v39 = vadd.f32 %v4217_v34, %v6632_v30 }
0x1ad1   : > { %v4354_v36 = vsel %vm3545_vm6, %v4353_v37, -inf }
0x1ad2   : > { %4355 = vmax.xlane.f32.xlu1 %v4354_v36  ;;  %v4219_v42 = vsel %vm3545_vm6, %v4218_v39, -inf }
0x1ad3   : > { %4220 = vmax.xlane.f32.xlu2 %v4219_v42 }
0x1b3b   : > { %v6849_v44 = vpop.f32.mrf.mxu2 }
0x1b43   : > { %v4282_v47 = vpop.f32.mrf.mxu2 }
0x1b44   : > { %v4285_v48 = vmul.f32 0.25, %v4282_v47  ;;  %v5169_v47 = vld [vmem:[%s7139_s10 + $0xf8] sm:$0xff] }
0x1b45   : > { %v4356_v49 = vpop.xlane.xlu1 %4355  ;;  %4533 = vmatpush.msra.mxu0 %v5169_v47  ;;  %v5190_v47 = vld [vmem:[%s7141_s15 + $0x188] sm:$0xff] }
0x1b46   : > { %v4357_v38 = vsub.f32 %v4353_v37, %v4356_v49  ;;  %v4221_v51 = vpop.xlane.xlu2 %4220  ;;  %v4286_v35 = vadd.f32 %v4285_v48, %v6632_v30  ;;  %v5166_v48 = vld [vmem:[%s7139_s10 + $0xe0] sm:$0xff]  ;;  %v5167_v49 = vld [vmem:[%s7139_s10 + $0xe8] sm:$0xff] }
0x1b47   : > { %v4222_v52 = vsub.f32 %v4218_v39, %v4221_v51  ;;  %4534 = vmatpush.msra.mxu0 %v5167_v49  ;;  %v5165_v51 = vld [vmem:[%s7139_s10 + $0xd8] sm:$0xff] }
0x1b48   : > { %v4358_v11 = vmul.f32 1.442695, %v4357_v38  ;;  %v4287_v55 = vsel %vm3545_vm6, %v4286_v35, -inf  ;;  %v5164_v38 = vld [vmem:[%s7139_s10 + $0xd0] sm:$0xff] }
0x1b49   : > { %v4223_v31 = vmul.f32 1.442695, %v4222_v52  ;;  %4288 = vmax.xlane.f32.xlu0 %v4287_v55  ;;  %4535 = vmatpush.msra.mxu0 %v5165_v51  ;;  %v5161_v52 = vld [vmem:[%s7139_s10 + $0xb8] sm:$0xff]  ;;  %v5159_v55 = vld [vmem:[%s7139_s10 + $0xa8] sm:$0xff]  ;;  %v5189_v51 = vld [vmem:[%s7141_s15 + $0x180] sm:$0xff] }
0x1b4a   : > { %5499 = vpow2.f32 %v4358_v11  ;;  %v5158_v11 = vld [vmem:[%s7139_s10 + $0xa0] sm:$0xff] }
0x1b4b   : > { %5501 = vpow2.f32 %v4223_v31  ;;  %v5156_v31 = vld [vmem:[%s7139_s10 + $0x90] sm:$0xff] }
0x1b50   : > { %v5500_v57 = vpop.eup %5499 }
0x1b51   : > { %v5502_v13 = vpop.eup %5501  ;;  %v4360_v53 = vsel %vm3545_vm6, %v5500_v57, 0.0 }
0x1b52   : > { %4361 = vadd.xlane.f32.xlu1 %v4360_v53  ;;  %v4225_v54 = vsel %vm3545_vm6, %v5502_v13, 0.0  ;;  %v5155_v53 = vld [vmem:[%s7139_s10 + $0x88] sm:$0xff] }
0x1b53   : > { %4226 = vadd.xlane.f32.xlu2 %v4225_v54 }
0x1b6b   : > { %4231 = vrot.lane.b32.xlu2 %v6824_v20, %s7126_s21  ;;  %4365 = vrot.lane.b32.xlu1 %v6824_v20, %s7128_s29  ;;  %s7149_s21 = sld [smem:[#allocation39_spill]]  ;;  %s1233_s29 = sand.u32 1, %s5586_s1  }
0x1bbc   : > { %v4289_v30 = vpop.xlane.xlu0 %4288 }
0x1bbd   : > { %v4290_v8 = vsub.f32 %v4286_v35, %v4289_v30  ;;  %v5160_v35 = vld [vmem:[%s7139_s10 + $0xb0] sm:$0xff] }
0x1bbf   : > { %v4291_v56 = vmul.f32 1.442695, %v4290_v8 }
0x1bc1   : > { %5503 = vpow2.f32 %v4291_v56 }
0x1bc5   : > { %v4362_v16 = vpop.xlane.xlu1 %4361 }
0x1bc6   : > { %v4227_v41 = vpop.xlane.xlu2 %4226 }
0x1bc7   : > { %v5504_v43 = vpop.eup %5503  ;;  %5505 = vrcp.f32 %v4227_v41 }
0x1bc8   : > { %v4293_v61 = vsel %vm3545_vm6, %v5504_v43, 0.0  ;;  %5507 = vrcp.f32 %v4362_v16 }
0x1bc9   : > { %4294 = vadd.xlane.f32.xlu0 %v4293_v61 }
0x1bcd   : > { %v5506_v19 = vpop.eup %5505 }
0x1bce   : > { %v4229_v0 = vmul.f32 %v5506_v19, %v5502_v13  ;;  %v4232_v14 = vpop.permute.xlu2 %4231  ;;  %v5508_v4 = vpop.eup %5507  ;;  %v5154_v13 = vld [vmem:[%s7139_s10 + $0x80] sm:$0xff] }
0x1bcf   : > { %4252 = vmatpush.msra.mxu1 %v4232_v14  ;;  %v4364_v40 = vmul.f32 %v5508_v4, %v5500_v57  ;;  %v5157_v57 = vld [vmem:[%s7139_s10 + $0x98] sm:$0xff] }
0x1bd0   : > { %5135 = vmatmul.msk.f32.vlgmr.msra.gmra.mxu1 %vm3545_vm6, %v4229_v0 }
0x1bdd   : > { %v4366_v32 = vpop.permute.xlu1 %4365  ;;  %4298 = vrot.lane.b32.xlu0 %v6824_v20, %s7127_s25  ;;  %s7150_s25 = sld [smem:[#allocation40_spill]] }
0x1bde   : > { %4386 = vmatpush.msrb.mxu1 %v4366_v32  ;;  %v5361_v32 = vld [vmem:[%s7142_s19 + $0x1] ss:$0 sm:$0xff] }
0x1bdf   : > { %5141 = vmatmul.msk.f32.vlgmr.msrb.gmra.mxu1 %vm3545_vm6, %v4364_v40 }
0x1be0   : > { %4601 = vmatpush.msra.mxu1 %v5188_v60 }
0x1be2   : > { %4602 = vmatpush.msra.mxu1 %v5187_v22 }
0x1be4   : > { %4603 = vmatpush.msra.mxu1 %v5186_v1 }
0x1be6   : > { %4604 = vmatpush.msra.mxu1 %v5185_v24 }
0x1c3c   : > { %v4295_v26 = vpop.xlane.xlu0 %4294 }
0x1c3d   : > { %5509 = vrcp.f32 %v4295_v26 }
0x1c43   : > { %v5510_v7 = vpop.eup %5509 }
0x1c44   : > { %v4297_v62 = vmul.f32 %v5510_v7, %v5504_v43  ;;  %v5362_v7 = vld [vmem:[%s7143_s24 + $0x1] ss:$0 sm:$0xff] }
0x1c4d   : > { %v4254_v10 = vpop.f32.mrf.mxu1 }
0x1c4e   : > { %4392 = vrot.lane.b32.xlu2 %v4254_v10, %s7125_s3  ;;  %s4925_s3 = sshll.u32 %s1233_s29, 3 }
0x1c4f   : > { %v4299_v15 = vpop.permute.xlu0 %4298  ;;  %s1235_s2 = scalar_lea.vmem [#allocation2], %s4925_s3 }
0x1c50   : > { %4319 = vmatpush.msra.mxu3 %v4299_v15 }
0x1c51   : > { %5138 = vmatmul.msk.f32.vlgmr.msra.gmra.mxu3 %vm3545_vm6, %v4297_v62 }
0x1c5c   : > { %v4388_v20 = vpop.f32.mrf.mxu1 }
0x1c5d   : > { %4400 = vrot.lane.b32.xlu2 %v4388_v20, %s7118_s9  ;;  %v5204_v20 = vld [vmem:[%s7141_s15 + $0x1f8] sm:$0xff]  ;;  %s7147_s9 = sshll.u32 %s5909_s26, 4 }
0x1c5e   : > { %4621 = vmatpush.msrb.mxu2 %v5204_v20  ;;  %s6948_s13 = scalar_lea.vmem %s5844_s12, %s7147_s9  ;;  %v5363_v20 = vld [vmem:[%s7146_s11 + $0x1] ss:$0 sm:$0xff]  ;;  %s5208_s9 = sshll.u32 %s5877_s0, 3 }
0x1c60   : > { %4622 = vmatpush.msrb.mxu2 %v5203_v59 }
0x1c62   : > { %4623 = vmatpush.msrb.mxu2 %v5202_v3 }
0x1c64   : > { %4624 = vmatpush.msrb.mxu2 %v5201_v21 }
0x1c66   : > { %4625 = vmatpush.msrb.mxu2 %v5200_v46 }
0x1ca8   : > { %v4393_v27 = vpop.permute.xlu2 %4392 }
0x1ca9   : > { %v4403_v58 = vsel %vm1451_vm9, %v6849_v44, %v4393_v27  ;;  %v5168_v44 = vld [vmem:[%s7139_s10 + $0xf0] sm:$0xff]  ;;  %v5198_v27 = vld [vmem:[%s7141_s15 + $0x1c8] sm:$0xff] }
0x1caa   : > { %4513 = vmatpush.msrb.mxu3 %v5168_v44  ;;  %v5177_v44 = vld [vmem:[%s7141_s15 + $0x120] sm:$0xff] }
0x1cac   : > { %4514 = vmatpush.msrb.mxu3 %v5166_v48 }
0x1cae   : > { %4515 = vmatpush.msrb.mxu3 %v5164_v38  ;;  %v5176_v38 = vld [vmem:[%s7141_s15 + $0x118] sm:$0xff] }
0x1cb7   : > { %v4401_v18 = vpop.permute.xlu2 %4400 }
0x1cd4   : > { %v4321_v25 = vpop.f32.mrf.mxu3 }
0x1cd5   : > { %4396 = vrot.lane.b32.xlu0 %v4321_v25, %s7124_s17  ;;  %v5199_v25 = vld [vmem:[%s7141_s15 + $0x1d0] sm:$0xff]  ;;  %s7148_s17 = sld [smem:[#allocation41_spill]] }
0x1cd6   : > { %4626 = vmatpush.msrb.mxu2 %v5199_v25 }
0x1cd8   : > { %4627 = vmatpush.msrb.mxu2 %v5198_v27 }
0x1d47   : > { %v4397_v5 = vpop.permute.xlu0 %4396 }
0x1d48   : > { %v4404_v12 = vsel %vm1273_vm0, %v4403_v58, %v4397_v5  ;;  %v5184_v58 = vld [vmem:[%s7141_s15 + $0x158] sm:$0xff]  ;;  %v5197_v5 = vld [vmem:[%s7141_s15 + $0x1c0] sm:$0xff] }
0x1d49   : > { %v4405_v29 = vsel %vm1860_vm10, %v4404_v12, %v4401_v18  ;;  %4605 = vmatpush.msra.mxu1 %v5184_v58  ;;  %4628 = vmatpush.msrb.mxu2 %v5197_v5  ;;  %v5183_v18 = vld [vmem:[%s7141_s15 + $0x150] sm:$0xff]  ;;  %v5196_v12 = vld [vmem:[%s7141_s15 + $0x1b8] sm:$0xff] }
0x1d4a   : > { %5151 = vmatmul.msk.f32.vlgmr.msra.gmra.mxu2 %vm1309_vm1, %v4405_v29  ;;  %v5182_v29 = vld [vmem:[%s7141_s15 + $0x148] sm:$0xff] }
0x1d4b   : > { %4606 = vmatpush.msra.mxu1 %v5183_v18  ;;  %4629 = vmatpush.msrb.mxu2 %v5196_v12 }
0x1d4d   : > { %4607 = vmatpush.msra.mxu1 %v5182_v29  ;;  %v4681_v29 = vld [vmem:[%s7148_s17 + $0x38] sm:$0xff] }
0x1dcd   : > { %v4440_v45 = vpop.f32.mrf.mxu2 }
0x1dce   : > { %v4441_v6 = vadd.f32 %v5360_v17, %v4440_v45  ;;  %v5195_v17 = vld [vmem:[%s7141_s15 + $0x1b0] sm:$0xff] }
0x1dcf   : > { %4630 = vmatpush.msrb.mxu2 %v5195_v17  ;;  %v4680_v17 = vld [vmem:[%s7148_s17 + $0x30] sm:$0xff] }
0x1dd0   : > { %v6883_v33 = vadd.f32 %v4441_v6, %v6794_v28  ;;  %v3379_v28 = vadd.f32 %v6699_v2, %v6695_v63  ;;  %v5162_v63 = vld [vmem:[%s7139_s10 + $0xc0] sm:$0xff]  ;;  %v5163_v2 = vld [vmem:[%s7139_s10 + $0xc8] sm:$0xff] }
0x1dd1   : > { %4516 = vmatpush.msrb.mxu3 %v5162_v63  ;;  %4536 = vmatpush.msra.mxu0 %v5163_v2  ;;  %v5181_v6 = vld [vmem:[%s7141_s15 + $0x140] sm:$0xff]  ;;  %v5175_v2 = vld [vmem:[%s7141_s15 + $0x110] sm:$0xff] }
0x1dd2   : > { %v4448_v50 = vsel %vm1309_vm1, %v6883_v33, 0.0  ;;  %4608 = vmatpush.msra.mxu1 %v5181_v6  ;;  %v4678_v6 = vld [vmem:[%s7148_s17 + $0x20] sm:$0xff] }
0x1dd3   : > { %4449 = vadd.xlane.f32.xlu1 %v4448_v50  ;;  %4517 = vmatpush.msrb.mxu3 %v5160_v35  ;;  %v5194_v50 = vld [vmem:[%s7141_s15 + $0x1a8] sm:$0xff] }
0x1dd4   : > { %4537 = vmatpush.msra.mxu0 %v5161_v52  ;;  %4631 = vmatpush.msrb.mxu2 %v5194_v50  ;;  %v5174_v35 = vld [vmem:[%s7141_s15 + $0x108] sm:$0xff]  ;;  %v5170_v52 = vld [vmem:[%s7145_s30 + $0x2] sm:$0x3]  ;;  %v4677_v50 = vld [vmem:[%s7148_s17 + $0x18] sm:$0xff] }
0x1dd5   : > { %4518 = vmatpush.msrb.mxu3 %v5158_v11  ;;  %v5173_v11 = vld [vmem:[%s7141_s15 + $0x100] sm:$0xff] }
0x1dd6   : > { %4538 = vmatpush.msra.mxu0 %v5159_v55  ;;  %v4499_v55 = vperm.slane %v5170_v52, 1 }
0x1dd7   : > { %4519 = vmatpush.msrb.mxu3 %v5156_v31 }
0x1dd8   : > { %4539 = vmatpush.msra.mxu0 %v5157_v57 }
0x1dd9   : > { %4520 = vmatpush.msrb.mxu3 %v5154_v13 }
0x1dda   : > { %4540 = vmatpush.msra.mxu0 %v5155_v53  ;;  %v4498_v53 = vperm.slane %v5170_v52, 0 }
0x1ddb   : > { %4697 = vmatpush.msra.mxu3 %v4681_v29 }
0x1ddd   : > { %4698 = vmatpush.msra.mxu3 %v4680_v17 }
0x1e46   : > { %v4450_v34 = vpop.xlane.xlu1 %4449 }
0x1e47   : > { %v4451_v37 = vmul.f32 %v4450_v34, %v5923_v23  ;;  %v5180_v34 = vld [vmem:[%s7141_s15 + $0x138] sm:$0xff] }
0x1e48   : > { %4609 = vmatpush.msra.mxu1 %v5180_v34  ;;  %v4676_v34 = vld [vmem:[%s7148_s17 + $0x10] sm:$0xff] }
0x1e49   : > { %v4452_v39 = vsub.f32 %v6883_v33, %v4451_v37  ;;  %v5193_v37 = vld [vmem:[%s7141_s15 + $0x1a0] sm:$0xff] }
0x1e4a   : > { %4632 = vmatpush.msrb.mxu2 %v5193_v37  ;;  %v4675_v37 = vld [vmem:[%s7148_s17 + $0x8] sm:$0xff] }
0x1e4b   : > { %v4453_v36 = vmul.f32 %v4452_v39, %v4452_v39 }
0x1e4d   : > { %v4454_v42 = vsel %vm1309_vm1, %v4453_v36, 0.0  ;;  %v5192_v36 = vld [vmem:[%s7141_s15 + $0x198] sm:$0xff] }
0x1e4e   : > { %4455 = vadd.xlane.f32.xlu0 %v4454_v42  ;;  %v5178_v42 = vld [vmem:[%s7141_s15 + $0x128] sm:$0xff]  ;;  %4633 = vmatpush.msrb.mxu2 %v5192_v36 }
0x1e56   : > { %3384 = vmax.xlane.f32.xlu0 %v3379_v28 }
0x1ec1   : > { %v4456_v54 = vpop.xlane.xlu0 %4455 }
0x1ec2   : > { %v4457_v30 = vmul.f32 %v4456_v54, %v5923_v23 }
0x1ec4   : > { %v4458_v8 = vadd.f32 1e-05, %v4457_v30 }
0x1ec6   : > { %5511 = vrsqrt.f32 %v4458_v8  ;;  %vm4465_vm9 = vweird.f32 %v4458_v8 }
0x1ec9   : > { %v3385_v56 = vpop.xlane.xlu0 %3384 }
0x1eca   : > { %v6909_v41 = vsub.f32 %v3379_v28, %v3385_v56  ;;  %v5191_v28 = vld [vmem:[%s7141_s15 + $0x190] sm:$0xff] }
0x1ecb   : > { %4634 = vmatpush.msrb.mxu2 %v5191_v28 }
0x1ecc   : > { %v5512_v43 = vpop.eup %5511  ;;  %v3390_v61 = vmul.f32 1.442695, %v6909_v41 }
0x1ecd   : > { %v4460_v19 = vmul.f32 %v5512_v43, %v4458_v8  ;;  %vm4466_vm0 = vweird.f32 %v5512_v43  ;;  %4635 = vmatpush.msrb.mxu2 %v5190_v47 }
0x1ece   : > { %5513 = vpow2.f32 %v3390_v61  ;;  %vm4467_vm10 = vmor %vm4465_vm9, %vm4466_vm0 }
0x1ecf   : > { %v4461_v0 = vmul.f32 %v5512_v43, %v4460_v19  ;;  %4636 = vmatpush.msrb.mxu2 %v5189_v51 }
0x1ed1   : > { %v4462_v14 = vmul.f32 0.5, %v4461_v0 }
0x1ed3   : > { %v4463_v16 = vsub.f32 1.5, %v4462_v14 }
0x1ed4   : > { %v5514_v4 = vpop.eup %5513 }
0x1ed5   : > { %v4464_v40 = vmul.f32 %v5512_v43, %v4463_v16  ;;  %3394 = vadd.xlane.f32.xlu0 %v5514_v4 }
0x1ed7   : > { %v4468_v26 = vsel %vm4467_vm10, %v5512_v43, %v4464_v40 }
0x1ed8   : > { %v4469_v10 = vmul.f32 %v4468_v26, %v4452_v39  ;;  %v5179_v39 = vld [vmem:[%s7141_s15 + $0x130] sm:$0xff] }
0x1ed9   : > { %4610 = vmatpush.msra.mxu1 %v5179_v39 }
0x1eda   : > { %v4473_v62 = vmul.f32 %v5361_v32, %v4469_v10 }
0x1edb   : > { %4611 = vmatpush.msra.mxu1 %v5178_v42 }
0x1edc   : > { %v4477_v15 = vadd.f32 %v5362_v7, %v4473_v62 }
0x1edd   : > { %4612 = vmatpush.msra.mxu1 %v5177_v44 }
0x1ede   : > { %5171 = vmatmul.msk.f32.vlgmr.msrb.gmra.mxu3 %vm1309_vm1, %v4477_v15  ;;  %5172 = vmatmul.msk.f32.vlgmr.msra.gmra.mxu0 %vm1309_vm1, %v4477_v15 }
0x1edf   : > { %4613 = vmatpush.msra.mxu1 %v5176_v38 }
0x1ee1   : > { %4614 = vmatpush.msra.mxu1 %v5175_v2 }
0x1ee3   : > { %4615 = vmatpush.msra.mxu1 %v5174_v35  ;;  %v5364_v35 = vld [vmem:[%s7149_s21] ss:$0 sm:$0xff]  ;;  %s4746_s21 = sshll.u32 %s1235_s2, 4  ;;  %s4747_s21 = int_to_ptr.vmem [resolvable:$true] %s4746_s21 }
0x1ee5   : > { %4616 = vmatpush.msra.mxu1 %v5173_v11  ;;  %v5365_v11 = vld [vmem:[%s7150_s25] ss:$0 sm:$0xff] }
0x1f48   : > { %v3395_v45 = vpop.xlane.xlu0 %3394 }
0x1f49   : > { %5515 = vlog2.f32 %v3395_v45  ;;  %v4679_v45 = vld [vmem:[%s7148_s17 + $0x28] sm:$0xff] }
0x1f4a   : > { %4699 = vmatpush.msra.mxu3 %v4679_v45 }
0x1f4c   : > { %4700 = vmatpush.msra.mxu3 %v4678_v6 }
0x1f4e   : > { %4701 = vmatpush.msra.mxu3 %v4677_v50 }
0x1f4f   : > { %v5516_v48 = vpop.eup %5515 }
0x1f50   : > { %v3399_v49 = vmul.f32 0.6931472, %v5516_v48  ;;  %4702 = vmatpush.msra.mxu3 %v4676_v34 }
0x1f52   : > { %v3402_v63 = vsub.f32 %v6909_v41, %v3399_v49  ;;  %4703 = vmatpush.msra.mxu3 %v4675_v37 }
0x1f54   : > { %3404 = vst [vmem:[%s6948_s13] sm:$0xff] %v3402_v63 }
0x1f5b   : > { %v4542_v31 = vpop.f32.mrf.mxu0 }
0x1f5c   : > { %v4543_v57 = vadd.f32 %v4542_v31, %v4499_v55 }
0x1f5e   : > { %v4548_v13 = vmul.f32 0.044715, %v4543_v57  ;;  %v4546_v40 = vmul.f32 0.5, %v4543_v57 }
0x1f60   : > { %v4550_v54 = vmul.f32 %v4548_v13, %v4543_v57  ;;  %v5366_v13 = vld [vmem:[%s7151_s4] ss:$0 sm:$0xff]  ;;  %s4727_s4 = scalar_lea.sflag [#allocation3], %s1233_s29 }
0x1f61   : > { %v4522_v30 = vpop.f32.mrf.mxu3 }
0x1f62   : > { %v4552_v8 = vmul.f32 %v4550_v54, %v4543_v57  ;;  %v4523_v56 = vadd.f32 %v4522_v30, %v4498_v53 }
0x1f64   : > { %v4547_v41 = vmul.f32 0.044715, %v4523_v56  ;;  %v4554_v43 = vadd.f32 %v4552_v8, %v4543_v57  ;;  %v4545_v10 = vmul.f32 0.5, %v4523_v56 }
0x1f66   : > { %v4549_v61 = vmul.f32 %v4547_v41, %v4523_v56  ;;  %v4556_v19 = vmul.f32 0.7978846, %v4554_v43 }
0x1f68   : > { %v4551_v0 = vmul.f32 %v4549_v61, %v4523_v56  ;;  %5517 = vtanh.f32 %v4556_v19 }
0x1f6a   : > { %v4553_v14 = vadd.f32 %v4551_v0, %v4523_v56 }
0x1f6c   : > { %v4555_v16 = vmul.f32 0.7978846, %v4553_v14 }
0x1f6e   : > { %v5518_v4 = vpop.eup %5517  ;;  %5519 = vtanh.f32 %v4555_v16 }
0x1f6f   : > { %v4560_v32 = vadd.f32 1.0, %v5518_v4 }
0x1f71   : > { %v4562_v26 = vmul.f32 %v4560_v32, %v4546_v40 }
0x1f73   : > { %4637 = vmatmul.f32.vlgmr.msrb.gmra.mxu2 %v4562_v26 }
0x1f74   : > { %v5520_v7 = vpop.eup %5519 }
0x1f75   : > { %v4559_v62 = vadd.f32 1.0, %v5520_v7 }
0x1f77   : > { %v4561_v15 = vmul.f32 %v4559_v62, %v4545_v10 }
0x1f79   : > { %4617 = vmatmul.f32.vlgmr.msra.gmra.mxu1 %v4561_v15 }
0x1ff6   : > { %v4618_v59 = vpop.f32.mrf.mxu1  ;;  %v4638_v3 = vpop.f32.mrf.mxu2 }
0x1ff7   : > { %v4619_v60 = vadd.f32 %v5363_v20, %v4618_v59 }
0x1ff9   : > { %v4639_v21 = vadd.f32 %v4638_v3, %v4619_v60 }
0x1ffb   : > { %v4641_v22 = vadd.f32 %v4639_v21, %v6883_v33 }
0x1ffd   : > { %v4644_v46 = vsel %vm1309_vm1, %v4641_v22, 0.0 }
0x1ffe   : > { %4645 = vadd.xlane.f32.xlu2 %v4644_v46 }
0x2006   : > { %3386 = vmax.xlane.f32.xlu2 %v6702_v9 }
0x2071   : > { %v4646_v1 = vpop.xlane.xlu2 %4645 }
0x2072   : > { %v4647_v25 = vmul.f32 %v4646_v1, %v5923_v23 }
0x2074   : > { %v4648_v24 = vsub.f32 %v4641_v22, %v4647_v25 }
0x2076   : > { %v4649_v27 = vmul.f32 %v4648_v24, %v4648_v24 }
0x2078   : > { %v4650_v58 = vsel %vm1309_vm1, %v4649_v27, 0.0 }
0x2079   : > { %4651 = vadd.xlane.f32.xlu1 %v4650_v58  ;;  %v3387_v5 = vpop.xlane.xlu2 %3386 }
0x207a   : > { %v3389_v33 = vsub.f32 %v6702_v9, %v3387_v5  ;;  %v4674_v9 = vld [vmem:[%s7148_s17] sm:$0xff] }
0x207b   : > { %4704 = vmatpush.msra.mxu3 %v4674_v9 }
0x207c   : > { %v3392_v18 = vmul.f32 1.442695, %v3389_v33 }
0x207e   : > { %5521 = vpow2.f32 %v3392_v18 }
0x2084   : > { %v5522_v12 = vpop.eup %5521 }
0x2085   : > { %3396 = vadd.xlane.f32.xlu2 %v5522_v12 }
0x20ec   : > { %v4652_v39 = vpop.xlane.xlu1 %4651 }
0x20ed   : > { %v4653_v36 = vmul.f32 %v4652_v39, %v5923_v23 }
0x20ef   : > { %v4654_v42 = vadd.f32 1e-05, %v4653_v36 }
0x20f1   : > { %5523 = vrsqrt.f32 %v4654_v42  ;;  %vm4661_vm8 = vweird.f32 %v4654_v42 }
0x20f7   : > { %v5524_v28 = vpop.eup %5523 }
0x20f8   : > { %v4656_v44 = vmul.f32 %v5524_v28, %v4654_v42  ;;  %v3397_v47 = vpop.xlane.xlu2 %3396  ;;  %vm4662_vm6 = vweird.f32 %v5524_v28 }
0x20f9   : > { %5525 = vlog2.f32 %v3397_v47  ;;  %vm4663_vm11 = vmor %vm4661_vm8, %vm4662_vm6 }
0x20fa   : > { %v4657_v48 = vmul.f32 %v5524_v28, %v4656_v44 }
0x20fc   : > { %v4658_v49 = vmul.f32 0.5, %v4657_v48 }
0x20fe   : > { %v4659_v38 = vsub.f32 1.5, %v4658_v49 }
0x20ff   : > { %v5526_v51 = vpop.eup %5525 }
0x2100   : > { %v4660_v63 = vmul.f32 %v5524_v28, %v4659_v38  ;;  %v3401_v2 = vmul.f32 0.6931472, %v5526_v51 }
0x2102   : > { %v4664_v23 = vsel %vm4663_vm11, %v5524_v28, %v4660_v63  ;;  %v3403_v52 = vsub.f32 %v3389_v33, %v3401_v2 }
0x2103   : > { %v4665_v55 = vmul.f32 %v4664_v23, %v4648_v24 }
0x2104   : > { %3405 = vst [vmem:[%s6948_s13 + $0x8] sm:$0xff] %v3403_v52  ;;  %s4744_s13 = scalar_lea.hbm %s5849_s20, %s5208_s9 }
0x2105   : > { %v4669_v31 = vmul.f32 %v5364_v35, %v4665_v55  ;;  %s4748_s25 = sshll.u32 %s4744_s13, 4  ;;  %s4749_s25 = int_to_ptr.hbm [resolvable:$true] %s4748_s25 }
0x2106   : > { %s5546_s5 = sshra.s32 %s4749_s25, 4  ;;  %s5547_s5 = int_to_ptr.hbm [resolvable:$true] %s5546_s5 }
0x2107   : > { %v4673_v57 = vadd.f32 %v5365_v11, %v4669_v31  ;;  %s5548_s3 = scalar_lea.hbm %s5547_s5, 8  ;;  %p5553_p0 = scmp.lt.s32.totalorder %s5547_s5, %s5849_s20 }
0x2108   : > { %p5549_p11 = scmp.ne.s32.totalorder %s5547_s5, %s5548_s3  ;;  %p5554_p1 = scmp.lt.s32.totalorder %s5552_s6, %s5548_s3 }
0x2109   : > { %5206 = vmatmul.msk.f32.vlgmr.msra.gmra.mxu3 %vm1309_vm1, %v4673_v57 }
0x210a   : > { %p5550_p12 = pnand %p5549_p11, %p5894_p5  ;;  %p5555_p2 = por %p5554_p1, %p5553_p0 }
0x210c   : > { %p5551_p13 = pneg %p5550_p12 }
0x210e   : > { %p5556_p3 = pnand %p5555_p2, %p5551_p13 }
0x218c   : > { %v4706_v53 = vpop.f32.mrf.mxu3 }
0x218d   : > { %v4707_v54 = vadd.f32 %v5366_v13, %v4706_v53 }
0x218f   : > { %4710 = vmax.xlane.f32.xlu1 %v4707_v54  ;;  %4709 = vst [vmem:[%s1235_s2] sm:$0xff] %v4707_v54 }
0x2202   : > { %v4711_v30 = vpop.xlane.xlu1 %4710 }
0x2203   : > { %v4712_v8 = vsub.f32 %v4707_v54, %v4711_v30 }
0x2205   : > { %v4713_v56 = vmul.f32 1.442695, %v4712_v8 }
0x2207   : > { %5527 = vpow2.f32 %v4713_v56 }
0x220d   : > { %v5528_v41 = vpop.eup %5527 }
0x220e   : > { %4715 = vadd.xlane.f32.xlu1 %v5528_v41 }
0x220f   : > { %5559 = shalt.err (!%p5556_p3)
}
0x2210   : > { %5217 = dma.vmem_to_hbm [thread:$0]  (%p5894_p5), %s4747_s21, 128, %s4749_s25, %s4727_s4  }
0x2211   : > { %s7152_s0 = sshll.u32 %s5909_s26, 3 }
0x2212   : > { %s1262_s29 = scalar_lea.vmem %s5854_s27, %s7152_s0 }
0x2281   : > { %v4716_v43 = vpop.xlane.xlu1 %4715 }
0x2282   : > { %5529 = vlog2.f32 %v4716_v43 }
0x2288   : > { %v5530_v61 = vpop.eup %5529 }
0x2289   : > { %v4718_v19 = vmul.f32 0.6931472, %v5530_v61 }
0x228b   : > { %v4719_v0 = vsub.f32 %v4712_v8, %v4718_v19 }
0x228d   : > { %4720 = vst [vmem:[%s1262_s29] sm:$0xff] %v4719_v0 }
0x228e PF: > { %p5223_p4 = scmp.ge.s32.totalorder %s5594_s7, 2  ;;  %s4771_s6 = sand.u32 1, %s5582_s28  }
0x228f   : > { %s4772_s22 = scalar_lea.sflag [#allocation3], %s4771_s6 }
0x2290   : > { %p5220_p7 = pnand %p5223_p4, %p5898_p6 }
0x2292   : > { %p5221_p8 = pneg %p5220_p7 }
0x2294   : > { %5577 = dma.done.wait (%p5221_p8), %s4772_s22, 128  }
0x2295   : > { %5579 = vsyncadd (%p5221_p8), %s4772_s22, 4294967168  ;;  %s7153_s7 = sld [smem:[#allocation44_spill]]  ;;  %s7156_s28 = smov %s5586_s1 }
0x2296   : > { %s7154_s4 = sld [smem:[#allocation43_spill]] }
0x2297   : > { %s7155_s2 = sld [smem:[#allocation45_spill]] }
0x229b   : > { %p92_p5 = scmp.ge.s32.totalorder %s7153_s7, 4  }
0x229c   : > { %s7157_s1 = smov %s7154_s4 }
0x229d   :  { %94 = sbr.rel (!%p92_p5) target bundleno = 93 (0x5d), region = 301 }
0x22a2   :  { %4785 = vsyncpa [#allocation3], 1 }
0x22a3   :  { %4787 = vsyncpa [#allocation3 + $0x1], 1 }

</bundles_post_ra>
